<compile_context>
chip_gen: v6e
topology: v6e:2x2x1
jax: 0.10.0
libtpu: 0.0.40
codegen_flags: <defaults>
</compile_context>

<pallas_src>
import functools

import numpy as np
import jax
import jax.numpy as jnp
from jax import lax
from jax.experimental import pallas as pl
from jax.experimental.pallas import tpu as pltpu


# ----------------------------------------------------------------------------
# Fused Pallas kernel: all ThLISTA layers in one call (per batch tile).
#   x <- SoftThresh_beta( W1 @ x + W2 @ y ), repeated num_layers times.
# Real "stacked" operands:
#   w1_ref: (2Np, 2Np), w2_ref: (2Np, 2Mp), y_ref: (2Mp, Bt), out: (2Np, Bt)
# ----------------------------------------------------------------------------
def _thlista_kernel(num_layers, Np, n_chunks, unroll, precision, dot_dtype,
                    beta_ref, w1_ref, w2_ref, y_ref, out_ref):
    f32 = jnp.float32

    if num_layers <= 0:                       # x stays at its zero init
        out_ref[...] = jnp.zeros(out_ref.shape, f32)
        return

    beta = beta_ref[0]                        # SMEM scalar
    Bt = out_ref.shape[1]
    cw = Bt // n_chunks                       # 128-lane-aligned chunk width

    w1 = w1_ref[...]                          # (2Np, 2Np) — resident all layers

    # Loop-invariant  W2 @ y  (hoisted): one dot for the whole batch tile,
    # then cheap lane-aligned chunk views.
    b_full = jnp.dot(w2_ref[...], y_ref[...],
                     preferred_element_type=f32, precision=precision)
    bs = [b_full[:, c * cw:(c + 1) * cw] for c in range(n_chunks)]

    def shrink(s):
        # complex soft threshold:  s * max(1 - beta/|s|, 0)   (rsqrt -> EUP)
        sr = s[:Np, :]
        si = s[Np:, :]
        inv_mag = lax.rsqrt(sr * sr + si * si + 1e-30)
        scale = jnp.maximum(1.0 - beta * inv_mag, 0.0)
        # multiply scale into each half separately; no (2N, Bt) broadcast copy
        return jnp.concatenate([sr * scale, si * scale], axis=0)

    # Layer 0: x == 0, so W1 @ x is dead -> apply shrinkage to b directly.
    xs0 = tuple(shrink(b) for b in bs)

    def layer(_, xs):
        # independent per-chunk chains: MXU dot of one chunk overlaps the
        # VPU/EUP shrinkage of the other inside the unrolled loop body.
        return tuple(
            shrink(jnp.dot(w1, xc.astype(dot_dtype),
                           preferred_element_type=f32, precision=precision) + bc)
            for xc, bc in zip(xs, bs))

    xs = lax.fori_loop(0, num_layers - 1, layer, xs0, unroll=unroll)

    for c in range(n_chunks):                 # lane-dense, unmasked stores
        out_ref[:, c * cw:(c + 1) * cw] = xs[c]


# ----------------------------------------------------------------------------
# Glue (plain JAX): Toeplitz construction, real block-matrix packing, call.
# ----------------------------------------------------------------------------
def make_toeplitz(v1):
    """W1[i, j] = v1[N - 1 + i - j], v1 has length 2N-1."""
    n = (v1.shape[0] + 1) // 2
    i = jnp.arange(n)[:, None]
    j = jnp.arange(n)[None, :]
    return v1[n - 1 + i - j]


def thlista_forward(vr, vi, ar, ai, yr, yi, beta, num_layers, use_bf16=False):
    N = vr.shape[0]
    M, B = yr.shape

    # Matmul operand dtype / precision is explicit.  Default: f32 operands,
    # HIGHEST precision (matches the complex128 reference within ~1e-5).
    # use_bf16=True halves the operand footprint and MXU passes when N/B are
    # large, at the cost of accumulated bf16 rounding over the layers.
    dot_dtype = jnp.bfloat16 if use_bf16 else jnp.float32
    precision = lax.Precision.DEFAULT if use_bf16 else lax.Precision.HIGHEST

    # Pad N, M to sublane multiples so the s[:N]/s[N:] half-slices and the
    # stacked block layout stay (8,128)-tile aligned (16 for bf16 packing).
    sub = 16 if use_bf16 else 8
    Np = -(-N // sub) * sub
    Mp = -(-M // sub) * sub

    # v1 = cat( conj(flip(v)), v[1:] );  W1 = Toeplitz(v1);  W2 = A^H
    v1r = jnp.concatenate([vr[::-1], vr[1:]])
    v1i = jnp.concatenate([-vi[::-1], vi[1:]])
    w1r, w1i = make_toeplitz(v1r), make_toeplitz(v1i)
    w2r, w2i = ar.T, -ai.T

    padNN = lambda a: jnp.pad(a, ((0, Np - N), (0, Np - N)))
    padNM = lambda a: jnp.pad(a, ((0, Np - N), (0, Mp - M)))

    # Real block forms of the complex operators (padded rows/cols are zero and
    # stay zero through the shrinkage).
    w1_big = jnp.block([[padNN(w1r), -padNN(w1i)],
                        [padNN(w1i), padNN(w1r)]]).astype(dot_dtype)   # (2Np,2Np)
    w2_big = jnp.block([[padNM(w2r), -padNM(w2i)],
                        [padNM(w2i), padNM(w2r)]]).astype(dot_dtype)   # (2Np,2Mp)

    # Pad batch to a lane-dense multiple of 128; pick a batch tile and grid.
    Bp = -(-B // 128) * 128
    Bt = next(t for t in (512, 256, 128) if Bp % t == 0)
    n_chunks = 2 if Bt >= 256 else 1
    grid = (Bp // Bt,)

    yr_p = jnp.pad(yr, ((0, Mp - M), (0, Bp - B)))
    yi_p = jnp.pad(yi, ((0, Mp - M), (0, Bp - B)))
    y_stack = jnp.concatenate([yr_p, yi_p], axis=0).astype(dot_dtype)  # (2Mp,Bp)

    beta_arr = jnp.asarray([beta], jnp.float32)

    # Full unroll for modest depth; partial unroll for long chains.
    unroll = True if num_layers <= 32 else 4

    # VMEM budget: double-buffered inputs + per-layer temporaries; capped
    # conservatively for v7x's 64 MiB physical VMEM (v5e/v6e have 128 MiB).
    isz = jnp.dtype(dot_dtype).itemsize
    est = (2 * ((2 * Np) * (2 * Np) * isz + (2 * Np) * (2 * Mp) * isz
                + (2 * Mp) * Bt * isz + (2 * Np) * Bt * 4)
           + 6 * (2 * Np) * Bt * 4)
    vmem_limit = int(min(max(2 * est, 32 * 2**20), 48 * 2**20))

    kernel = functools.partial(_thlista_kernel, num_layers, Np, n_chunks,
                               unroll, precision, dot_dtype)

    z_stack = pl.pallas_call(
        kernel,
        out_shape=jax.ShapeDtypeStruct((2 * Np, Bp), jnp.float32),
        grid_spec=pltpu.PrefetchScalarGridSpec(
            num_scalar_prefetch=1,                      # beta -> SMEM
            grid=grid,
            in_specs=[
                pl.BlockSpec((2 * Np, 2 * Np), lambda i, beta: (0, 0)),  # W1 resident
                pl.BlockSpec((2 * Np, 2 * Mp), lambda i, beta: (0, 0)),  # W2 resident
                pl.BlockSpec((2 * Mp, Bt), lambda i, beta: (0, i)),      # y tile
            ],
            out_specs=pl.BlockSpec((2 * Np, Bt), lambda i, beta: (0, i)),
        ),
        compiler_params=pltpu.CompilerParams(
            dimension_semantics=("parallel",),          # batch tiles -> both TCs (v7x)
            vmem_limit_bytes=vmem_limit),
    )(beta_arr, w1_big, w2_big, y_stack)

    return z_stack[:N, :B], z_stack[Np:Np + N, :B]


# ----------------------------------------------------------------------------
# Pure numpy complex128 reference (mirrors the PyTorch forward)
# ----------------------------------------------------------------------------
def reference(v, A, y, beta, num_layers):
    N = v.shape[0]
    v1 = np.concatenate([np.conj(v[::-1]), v[1:]])
    i = np.arange(N)[:, None]
    j = np.arange(N)[None, :]
    W1 = v1[N - 1 + i - j]
    W2 = A.conj().T
    x = np.zeros((N, y.shape[1]), dtype=np.complex128)
    for _ in range(num_layers):
        s = W1 @ x + W2 @ y
        mag = np.abs(s)
        scale = np.where(mag > 0,
                         np.maximum(mag - beta, 0.0) / np.maximum(mag, 1e-30),
                         0.0)
        x = s * scale
    return x


if __name__ == "__main__":
    N, M, B = 32, 16, 8          # v: (N,), A: (M, N), y: (M, B)
    num_layers = 10
    beta = 0.01

    key = jax.random.PRNGKey(0)
    k1, k2, k3, k4, k5, k6 = jax.random.split(key, 6)
    # small scales keep the 10-layer iteration numerically tame
    vr = 0.02 * jax.random.normal(k1, (N,), jnp.float32)
    vi = 0.02 * jax.random.normal(k2, (N,), jnp.float32)
    ar = jax.random.normal(k3, (M, N), jnp.float32) / np.sqrt(M)
    ai = jax.random.normal(k4, (M, N), jnp.float32) / np.sqrt(M)
    yr = jax.random.normal(k5, (M, B), jnp.float32)
    yi = jax.random.normal(k6, (M, B), jnp.float32)

    fwd = jax.jit(functools.partial(thlista_forward, beta=beta,
                                    num_layers=num_layers))
    zr, zi = fwd(vr, vi, ar, ai, yr, yi)
    jax.block_until_ready((zr, zi))

    # check against complex128 numpy reference
    v_np = np.asarray(vr, np.float64) + 1j * np.asarray(vi, np.float64)
    A_np = np.asarray(ar, np.float64) + 1j * np.asarray(ai, np.float64)
    y_np = np.asarray(yr, np.float64) + 1j * np.asarray(yi, np.float64)
    z_ref = reference(v_np, A_np, y_np, beta, num_layers)

    z_got = np.asarray(zr, np.float64) + 1j * np.asarray(zi, np.float64)
    np.testing.assert_allclose(z_got, z_ref, rtol=3e-3, atol=3e-3)
    print("KERNEL_OK")
</pallas_src>

<mosaic_0001>
module attributes {stable_mosaic.version = 11 : i64} {
  func.func @_thlista_kernel(%arg0: i32, %arg1: memref<1xf32, #tpu.memory_space<smem>>, %arg2: memref<64x64xf32, #tpu.memory_space<vmem>>, %arg3: memref<64x32xf32, #tpu.memory_space<vmem>>, %arg4: memref<32x128xf32, #tpu.memory_space<vmem>>, %arg5: memref<64x128xf32, #tpu.memory_space<vmem>>) attributes {dimension_semantics = [#tpu.dimension_semantics<parallel>], iteration_bounds = array<i64: 1>, scalar_prefetch = 1 : i64, scratch_operands = 0 : i64, tpu.core_type = #tpu.core_type<tc>, window_params = [{pipeline_mode = #tpu.pipeline_mode<synchronous>, transform_indices = @transform_0, window_bounds = array<i64: 64, 64>}, {pipeline_mode = #tpu.pipeline_mode<synchronous>, transform_indices = @transform_1, window_bounds = array<i64: 64, 32>}, {transform_indices = @transform_2, window_bounds = array<i64: 32, 128>}, {transform_indices = @transform_3, window_bounds = array<i64: 64, 128>}]} {
    %c0 = arith.constant 0 : index
    %0 = memref.load %arg1[%c0] : memref<1xf32, #tpu.memory_space<smem>>
    %c0_0 = arith.constant 0 : index
    %c0_1 = arith.constant 0 : index
    %1 = vector.load %arg2[%c0_0, %c0_1] : memref<64x64xf32, #tpu.memory_space<vmem>>, vector<64x64xf32>
    %c0_2 = arith.constant 0 : index
    %c0_3 = arith.constant 0 : index
    %2 = vector.load %arg3[%c0_2, %c0_3] : memref<64x32xf32, #tpu.memory_space<vmem>>, vector<64x32xf32>
    %c0_4 = arith.constant 0 : index
    %c0_5 = arith.constant 0 : index
    %3 = vector.load %arg4[%c0_4, %c0_5] : memref<32x128xf32, #tpu.memory_space<vmem>>, vector<32x128xf32>
    %cst = arith.constant dense<0.000000e+00> : vector<64x128xf32>
    %4 = tpu.matmul %2, %3, %cst {dimension_numbers = #tpu.dot_dimension_numbers<[1], [0], [0], [1], [0, 0, 1, 1], [], []>, precision = #tpu.contract_precision<fp32>} : vector<64x32xf32>, vector<32x128xf32>, vector<64x128xf32> -> vector<64x128xf32>
    %5 = vector.extract_strided_slice %4 {offsets = [0, 0], sizes = [32, 128], strides = [1, 1]} : vector<64x128xf32> to vector<32x128xf32>
    %6 = vector.extract_strided_slice %4 {offsets = [32, 0], sizes = [32, 128], strides = [1, 1]} : vector<64x128xf32> to vector<32x128xf32>
    %7 = arith.mulf %5, %5 : vector<32x128xf32>
    %8 = arith.mulf %6, %6 : vector<32x128xf32>
    %9 = arith.addf %7, %8 : vector<32x128xf32>
    %cst_6 = arith.constant 1.000000e-30 : f32
    %10 = vector.broadcast %cst_6 : f32 to vector<32x128xf32>
    %11 = arith.addf %9, %10 : vector<32x128xf32>
    %12 = math.rsqrt %11 : vector<32x128xf32>
    %13 = vector.broadcast %0 : f32 to vector<32x128xf32>
    %14 = arith.mulf %13, %12 : vector<32x128xf32>
    %cst_7 = arith.constant 1.000000e+00 : f32
    %15 = vector.broadcast %cst_7 : f32 to vector<32x128xf32>
    %16 = arith.subf %15, %14 : vector<32x128xf32>
    %cst_8 = arith.constant 0.000000e+00 : f32
    %17 = vector.broadcast %cst_8 : f32 to vector<32x128xf32>
    %18 = arith.maximumf %16, %17 : vector<32x128xf32>
    %19 = arith.mulf %5, %18 : vector<32x128xf32>
    %20 = arith.mulf %6, %18 : vector<32x128xf32>
    %21 = tpu.concatenate %19, %20 in 0 : vector<32x128xf32>, vector<32x128xf32> -> vector<64x128xf32>
    %c0_i32 = arith.constant 0 : i32
    %cst_9 = arith.constant dense<0.000000e+00> : vector<64x128xf32>
    %22 = tpu.matmul %1, %21, %cst_9 {dimension_numbers = #tpu.dot_dimension_numbers<[1], [0], [0], [1], [0, 0, 1, 1], [], []>, precision = #tpu.contract_precision<fp32>} : vector<64x64xf32>, vector<64x128xf32>, vector<64x128xf32> -> vector<64x128xf32>
    %23 = arith.addf %22, %4 : vector<64x128xf32>
    %24 = vector.extract_strided_slice %23 {offsets = [0, 0], sizes = [32, 128], strides = [1, 1]} : vector<64x128xf32> to vector<32x128xf32>
    %25 = vector.extract_strided_slice %23 {offsets = [32, 0], sizes = [32, 128], strides = [1, 1]} : vector<64x128xf32> to vector<32x128xf32>
    %26 = arith.mulf %24, %24 : vector<32x128xf32>
    %27 = arith.mulf %25, %25 : vector<32x128xf32>
    %28 = arith.addf %26, %27 : vector<32x128xf32>
    %cst_10 = arith.constant 1.000000e-30 : f32
    %29 = vector.broadcast %cst_10 : f32 to vector<32x128xf32>
    %30 = arith.addf %28, %29 : vector<32x128xf32>
    %31 = math.rsqrt %30 : vector<32x128xf32>
    %32 = vector.broadcast %0 : f32 to vector<32x128xf32>
    %33 = arith.mulf %32, %31 : vector<32x128xf32>
    %cst_11 = arith.constant 1.000000e+00 : f32
    %34 = vector.broadcast %cst_11 : f32 to vector<32x128xf32>
    %35 = arith.subf %34, %33 : vector<32x128xf32>
    %cst_12 = arith.constant 0.000000e+00 : f32
    %36 = vector.broadcast %cst_12 : f32 to vector<32x128xf32>
    %37 = arith.maximumf %35, %36 : vector<32x128xf32>
    %38 = arith.mulf %24, %37 : vector<32x128xf32>
    %39 = arith.mulf %25, %37 : vector<32x128xf32>
    %40 = tpu.concatenate %38, %39 in 0 : vector<32x128xf32>, vector<32x128xf32> -> vector<64x128xf32>
    %c1_i32 = arith.constant 1 : i32
    %cst_13 = arith.constant dense<0.000000e+00> : vector<64x128xf32>
    %41 = tpu.matmul %1, %40, %cst_13 {dimension_numbers = #tpu.dot_dimension_numbers<[1], [0], [0], [1], [0, 0, 1, 1], [], []>, precision = #tpu.contract_precision<fp32>} : vector<64x64xf32>, vector<64x128xf32>, vector<64x128xf32> -> vector<64x128xf32>
    %42 = arith.addf %41, %4 : vector<64x128xf32>
    %43 = vector.extract_strided_slice %42 {offsets = [0, 0], sizes = [32, 128], strides = [1, 1]} : vector<64x128xf32> to vector<32x128xf32>
    %44 = vector.extract_strided_slice %42 {offsets = [32, 0], sizes = [32, 128], strides = [1, 1]} : vector<64x128xf32> to vector<32x128xf32>
    %45 = arith.mulf %43, %43 : vector<32x128xf32>
    %46 = arith.mulf %44, %44 : vector<32x128xf32>
    %47 = arith.addf %45, %46 : vector<32x128xf32>
    %cst_14 = arith.constant 1.000000e-30 : f32
    %48 = vector.broadcast %cst_14 : f32 to vector<32x128xf32>
    %49 = arith.addf %47, %48 : vector<32x128xf32>
    %50 = math.rsqrt %49 : vector<32x128xf32>
    %51 = vector.broadcast %0 : f32 to vector<32x128xf32>
    %52 = arith.mulf %51, %50 : vector<32x128xf32>
    %cst_15 = arith.constant 1.000000e+00 : f32
    %53 = vector.broadcast %cst_15 : f32 to vector<32x128xf32>
    %54 = arith.subf %53, %52 : vector<32x128xf32>
    %cst_16 = arith.constant 0.000000e+00 : f32
    %55 = vector.broadcast %cst_16 : f32 to vector<32x128xf32>
    %56 = arith.maximumf %54, %55 : vector<32x128xf32>
    %57 = arith.mulf %43, %56 : vector<32x128xf32>
    %58 = arith.mulf %44, %56 : vector<32x128xf32>
    %59 = tpu.concatenate %57, %58 in 0 : vector<32x128xf32>, vector<32x128xf32> -> vector<64x128xf32>
    %c2_i32 = arith.constant 2 : i32
    %cst_17 = arith.constant dense<0.000000e+00> : vector<64x128xf32>
    %60 = tpu.matmul %1, %59, %cst_17 {dimension_numbers = #tpu.dot_dimension_numbers<[1], [0], [0], [1], [0, 0, 1, 1], [], []>, precision = #tpu.contract_precision<fp32>} : vector<64x64xf32>, vector<64x128xf32>, vector<64x128xf32> -> vector<64x128xf32>
    %61 = arith.addf %60, %4 : vector<64x128xf32>
    %62 = vector.extract_strided_slice %61 {offsets = [0, 0], sizes = [32, 128], strides = [1, 1]} : vector<64x128xf32> to vector<32x128xf32>
    %63 = vector.extract_strided_slice %61 {offsets = [32, 0], sizes = [32, 128], strides = [1, 1]} : vector<64x128xf32> to vector<32x128xf32>
    %64 = arith.mulf %62, %62 : vector<32x128xf32>
    %65 = arith.mulf %63, %63 : vector<32x128xf32>
    %66 = arith.addf %64, %65 : vector<32x128xf32>
    %cst_18 = arith.constant 1.000000e-30 : f32
    %67 = vector.broadcast %cst_18 : f32 to vector<32x128xf32>
    %68 = arith.addf %66, %67 : vector<32x128xf32>
    %69 = math.rsqrt %68 : vector<32x128xf32>
    %70 = vector.broadcast %0 : f32 to vector<32x128xf32>
    %71 = arith.mulf %70, %69 : vector<32x128xf32>
    %cst_19 = arith.constant 1.000000e+00 : f32
    %72 = vector.broadcast %cst_19 : f32 to vector<32x128xf32>
    %73 = arith.subf %72, %71 : vector<32x128xf32>
    %cst_20 = arith.constant 0.000000e+00 : f32
    %74 = vector.broadcast %cst_20 : f32 to vector<32x128xf32>
    %75 = arith.maximumf %73, %74 : vector<32x128xf32>
    %76 = arith.mulf %62, %75 : vector<32x128xf32>
    %77 = arith.mulf %63, %75 : vector<32x128xf32>
    %78 = tpu.concatenate %76, %77 in 0 : vector<32x128xf32>, vector<32x128xf32> -> vector<64x128xf32>
    %c3_i32 = arith.constant 3 : i32
    %cst_21 = arith.constant dense<0.000000e+00> : vector<64x128xf32>
    %79 = tpu.matmul %1, %78, %cst_21 {dimension_numbers = #tpu.dot_dimension_numbers<[1], [0], [0], [1], [0, 0, 1, 1], [], []>, precision = #tpu.contract_precision<fp32>} : vector<64x64xf32>, vector<64x128xf32>, vector<64x128xf32> -> vector<64x128xf32>
    %80 = arith.addf %79, %4 : vector<64x128xf32>
    %81 = vector.extract_strided_slice %80 {offsets = [0, 0], sizes = [32, 128], strides = [1, 1]} : vector<64x128xf32> to vector<32x128xf32>
    %82 = vector.extract_strided_slice %80 {offsets = [32, 0], sizes = [32, 128], strides = [1, 1]} : vector<64x128xf32> to vector<32x128xf32>
    %83 = arith.mulf %81, %81 : vector<32x128xf32>
    %84 = arith.mulf %82, %82 : vector<32x128xf32>
    %85 = arith.addf %83, %84 : vector<32x128xf32>
    %cst_22 = arith.constant 1.000000e-30 : f32
    %86 = vector.broadcast %cst_22 : f32 to vector<32x128xf32>
    %87 = arith.addf %85, %86 : vector<32x128xf32>
    %88 = math.rsqrt %87 : vector<32x128xf32>
    %89 = vector.broadcast %0 : f32 to vector<32x128xf32>
    %90 = arith.mulf %89, %88 : vector<32x128xf32>
    %cst_23 = arith.constant 1.000000e+00 : f32
    %91 = vector.broadcast %cst_23 : f32 to vector<32x128xf32>
    %92 = arith.subf %91, %90 : vector<32x128xf32>
    %cst_24 = arith.constant 0.000000e+00 : f32
    %93 = vector.broadcast %cst_24 : f32 to vector<32x128xf32>
    %94 = arith.maximumf %92, %93 : vector<32x128xf32>
    %95 = arith.mulf %81, %94 : vector<32x128xf32>
    %96 = arith.mulf %82, %94 : vector<32x128xf32>
    %97 = tpu.concatenate %95, %96 in 0 : vector<32x128xf32>, vector<32x128xf32> -> vector<64x128xf32>
    %c4_i32 = arith.constant 4 : i32
    %cst_25 = arith.constant dense<0.000000e+00> : vector<64x128xf32>
    %98 = tpu.matmul %1, %97, %cst_25 {dimension_numbers = #tpu.dot_dimension_numbers<[1], [0], [0], [1], [0, 0, 1, 1], [], []>, precision = #tpu.contract_precision<fp32>} : vector<64x64xf32>, vector<64x128xf32>, vector<64x128xf32> -> vector<64x128xf32>
    %99 = arith.addf %98, %4 : vector<64x128xf32>
    %100 = vector.extract_strided_slice %99 {offsets = [0, 0], sizes = [32, 128], strides = [1, 1]} : vector<64x128xf32> to vector<32x128xf32>
    %101 = vector.extract_strided_slice %99 {offsets = [32, 0], sizes = [32, 128], strides = [1, 1]} : vector<64x128xf32> to vector<32x128xf32>
    %102 = arith.mulf %100, %100 : vector<32x128xf32>
    %103 = arith.mulf %101, %101 : vector<32x128xf32>
    %104 = arith.addf %102, %103 : vector<32x128xf32>
    %cst_26 = arith.constant 1.000000e-30 : f32
    %105 = vector.broadcast %cst_26 : f32 to vector<32x128xf32>
    %106 = arith.addf %104, %105 : vector<32x128xf32>
    %107 = math.rsqrt %106 : vector<32x128xf32>
    %108 = vector.broadcast %0 : f32 to vector<32x128xf32>
    %109 = arith.mulf %108, %107 : vector<32x128xf32>
    %cst_27 = arith.constant 1.000000e+00 : f32
    %110 = vector.broadcast %cst_27 : f32 to vector<32x128xf32>
    %111 = arith.subf %110, %109 : vector<32x128xf32>
    %cst_28 = arith.constant 0.000000e+00 : f32
    %112 = vector.broadcast %cst_28 : f32 to vector<32x128xf32>
    %113 = arith.maximumf %111, %112 : vector<32x128xf32>
    %114 = arith.mulf %100, %113 : vector<32x128xf32>
    %115 = arith.mulf %101, %113 : vector<32x128xf32>
    %116 = tpu.concatenate %114, %115 in 0 : vector<32x128xf32>, vector<32x128xf32> -> vector<64x128xf32>
    %c5_i32 = arith.constant 5 : i32
    %cst_29 = arith.constant dense<0.000000e+00> : vector<64x128xf32>
    %117 = tpu.matmul %1, %116, %cst_29 {dimension_numbers = #tpu.dot_dimension_numbers<[1], [0], [0], [1], [0, 0, 1, 1], [], []>, precision = #tpu.contract_precision<fp32>} : vector<64x64xf32>, vector<64x128xf32>, vector<64x128xf32> -> vector<64x128xf32>
    %118 = arith.addf %117, %4 : vector<64x128xf32>
    %119 = vector.extract_strided_slice %118 {offsets = [0, 0], sizes = [32, 128], strides = [1, 1]} : vector<64x128xf32> to vector<32x128xf32>
    %120 = vector.extract_strided_slice %118 {offsets = [32, 0], sizes = [32, 128], strides = [1, 1]} : vector<64x128xf32> to vector<32x128xf32>
    %121 = arith.mulf %119, %119 : vector<32x128xf32>
    %122 = arith.mulf %120, %120 : vector<32x128xf32>
    %123 = arith.addf %121, %122 : vector<32x128xf32>
    %cst_30 = arith.constant 1.000000e-30 : f32
    %124 = vector.broadcast %cst_30 : f32 to vector<32x128xf32>
    %125 = arith.addf %123, %124 : vector<32x128xf32>
    %126 = math.rsqrt %125 : vector<32x128xf32>
    %127 = vector.broadcast %0 : f32 to vector<32x128xf32>
    %128 = arith.mulf %127, %126 : vector<32x128xf32>
    %cst_31 = arith.constant 1.000000e+00 : f32
    %129 = vector.broadcast %cst_31 : f32 to vector<32x128xf32>
    %130 = arith.subf %129, %128 : vector<32x128xf32>
    %cst_32 = arith.constant 0.000000e+00 : f32
    %131 = vector.broadcast %cst_32 : f32 to vector<32x128xf32>
    %132 = arith.maximumf %130, %131 : vector<32x128xf32>
    %133 = arith.mulf %119, %132 : vector<32x128xf32>
    %134 = arith.mulf %120, %132 : vector<32x128xf32>
    %135 = tpu.concatenate %133, %134 in 0 : vector<32x128xf32>, vector<32x128xf32> -> vector<64x128xf32>
    %c6_i32 = arith.constant 6 : i32
    %cst_33 = arith.constant dense<0.000000e+00> : vector<64x128xf32>
    %136 = tpu.matmul %1, %135, %cst_33 {dimension_numbers = #tpu.dot_dimension_numbers<[1], [0], [0], [1], [0, 0, 1, 1], [], []>, precision = #tpu.contract_precision<fp32>} : vector<64x64xf32>, vector<64x128xf32>, vector<64x128xf32> -> vector<64x128xf32>
    %137 = arith.addf %136, %4 : vector<64x128xf32>
    %138 = vector.extract_strided_slice %137 {offsets = [0, 0], sizes = [32, 128], strides = [1, 1]} : vector<64x128xf32> to vector<32x128xf32>
    %139 = vector.extract_strided_slice %137 {offsets = [32, 0], sizes = [32, 128], strides = [1, 1]} : vector<64x128xf32> to vector<32x128xf32>
    %140 = arith.mulf %138, %138 : vector<32x128xf32>
    %141 = arith.mulf %139, %139 : vector<32x128xf32>
    %142 = arith.addf %140, %141 : vector<32x128xf32>
    %cst_34 = arith.constant 1.000000e-30 : f32
    %143 = vector.broadcast %cst_34 : f32 to vector<32x128xf32>
    %144 = arith.addf %142, %143 : vector<32x128xf32>
    %145 = math.rsqrt %144 : vector<32x128xf32>
    %146 = vector.broadcast %0 : f32 to vector<32x128xf32>
    %147 = arith.mulf %146, %145 : vector<32x128xf32>
    %cst_35 = arith.constant 1.000000e+00 : f32
    %148 = vector.broadcast %cst_35 : f32 to vector<32x128xf32>
    %149 = arith.subf %148, %147 : vector<32x128xf32>
    %cst_36 = arith.constant 0.000000e+00 : f32
    %150 = vector.broadcast %cst_36 : f32 to vector<32x128xf32>
    %151 = arith.maximumf %149, %150 : vector<32x128xf32>
    %152 = arith.mulf %138, %151 : vector<32x128xf32>
    %153 = arith.mulf %139, %151 : vector<32x128xf32>
    %154 = tpu.concatenate %152, %153 in 0 : vector<32x128xf32>, vector<32x128xf32> -> vector<64x128xf32>
    %c7_i32 = arith.constant 7 : i32
    %cst_37 = arith.constant dense<0.000000e+00> : vector<64x128xf32>
    %155 = tpu.matmul %1, %154, %cst_37 {dimension_numbers = #tpu.dot_dimension_numbers<[1], [0], [0], [1], [0, 0, 1, 1], [], []>, precision = #tpu.contract_precision<fp32>} : vector<64x64xf32>, vector<64x128xf32>, vector<64x128xf32> -> vector<64x128xf32>
    %156 = arith.addf %155, %4 : vector<64x128xf32>
    %157 = vector.extract_strided_slice %156 {offsets = [0, 0], sizes = [32, 128], strides = [1, 1]} : vector<64x128xf32> to vector<32x128xf32>
    %158 = vector.extract_strided_slice %156 {offsets = [32, 0], sizes = [32, 128], strides = [1, 1]} : vector<64x128xf32> to vector<32x128xf32>
    %159 = arith.mulf %157, %157 : vector<32x128xf32>
    %160 = arith.mulf %158, %158 : vector<32x128xf32>
    %161 = arith.addf %159, %160 : vector<32x128xf32>
    %cst_38 = arith.constant 1.000000e-30 : f32
    %162 = vector.broadcast %cst_38 : f32 to vector<32x128xf32>
    %163 = arith.addf %161, %162 : vector<32x128xf32>
    %164 = math.rsqrt %163 : vector<32x128xf32>
    %165 = vector.broadcast %0 : f32 to vector<32x128xf32>
    %166 = arith.mulf %165, %164 : vector<32x128xf32>
    %cst_39 = arith.constant 1.000000e+00 : f32
    %167 = vector.broadcast %cst_39 : f32 to vector<32x128xf32>
    %168 = arith.subf %167, %166 : vector<32x128xf32>
    %cst_40 = arith.constant 0.000000e+00 : f32
    %169 = vector.broadcast %cst_40 : f32 to vector<32x128xf32>
    %170 = arith.maximumf %168, %169 : vector<32x128xf32>
    %171 = arith.mulf %157, %170 : vector<32x128xf32>
    %172 = arith.mulf %158, %170 : vector<32x128xf32>
    %173 = tpu.concatenate %171, %172 in 0 : vector<32x128xf32>, vector<32x128xf32> -> vector<64x128xf32>
    %c8_i32 = arith.constant 8 : i32
    %cst_41 = arith.constant dense<0.000000e+00> : vector<64x128xf32>
    %174 = tpu.matmul %1, %173, %cst_41 {dimension_numbers = #tpu.dot_dimension_numbers<[1], [0], [0], [1], [0, 0, 1, 1], [], []>, precision = #tpu.contract_precision<fp32>} : vector<64x64xf32>, vector<64x128xf32>, vector<64x128xf32> -> vector<64x128xf32>
    %175 = arith.addf %174, %4 : vector<64x128xf32>
    %176 = vector.extract_strided_slice %175 {offsets = [0, 0], sizes = [32, 128], strides = [1, 1]} : vector<64x128xf32> to vector<32x128xf32>
    %177 = vector.extract_strided_slice %175 {offsets = [32, 0], sizes = [32, 128], strides = [1, 1]} : vector<64x128xf32> to vector<32x128xf32>
    %178 = arith.mulf %176, %176 : vector<32x128xf32>
    %179 = arith.mulf %177, %177 : vector<32x128xf32>
    %180 = arith.addf %178, %179 : vector<32x128xf32>
    %cst_42 = arith.constant 1.000000e-30 : f32
    %181 = vector.broadcast %cst_42 : f32 to vector<32x128xf32>
    %182 = arith.addf %180, %181 : vector<32x128xf32>
    %183 = math.rsqrt %182 : vector<32x128xf32>
    %184 = vector.broadcast %0 : f32 to vector<32x128xf32>
    %185 = arith.mulf %184, %183 : vector<32x128xf32>
    %cst_43 = arith.constant 1.000000e+00 : f32
    %186 = vector.broadcast %cst_43 : f32 to vector<32x128xf32>
    %187 = arith.subf %186, %185 : vector<32x128xf32>
    %cst_44 = arith.constant 0.000000e+00 : f32
    %188 = vector.broadcast %cst_44 : f32 to vector<32x128xf32>
    %189 = arith.maximumf %187, %188 : vector<32x128xf32>
    %190 = arith.mulf %176, %189 : vector<32x128xf32>
    %191 = arith.mulf %177, %189 : vector<32x128xf32>
    %192 = tpu.concatenate %190, %191 in 0 : vector<32x128xf32>, vector<32x128xf32> -> vector<64x128xf32>
    %c0_45 = arith.constant 0 : index
    %c0_46 = arith.constant 0 : index
    %193 = vector.load %arg5[%c0_45, %c0_46] : memref<64x128xf32, #tpu.memory_space<vmem>>, vector<64x128xf32>
    tpu.vector_store %arg5[%c0_45, %c0_46], %192 {strides = array<i32>} : memref<64x128xf32, #tpu.memory_space<vmem>>, vector<64x128xf32>,
    return
  }
  func.func @transform_0(%arg0: i32, %arg1: memref<1xf32, #tpu.memory_space<smem>>) -> (i32, i32) {
    %c0_i32 = arith.constant 0 : i32
    %c0_i32_0 = arith.constant 0 : i32
    %c0_i32_1 = arith.constant 0 : i32
    return %c0_i32, %c0_i32_0 : i32, i32
  }
  func.func @transform_1(%arg0: i32, %arg1: memref<1xf32, #tpu.memory_space<smem>>) -> (i32, i32) {
    %c0_i32 = arith.constant 0 : i32
    %c0_i32_0 = arith.constant 0 : i32
    %c0_i32_1 = arith.constant 0 : i32
    return %c0_i32, %c0_i32_0 : i32, i32
  }
  func.func @transform_2(%arg0: i32, %arg1: memref<1xf32, #tpu.memory_space<smem>>) -> (i32, i32) {
    %c0_i32 = arith.constant 0 : i32
    %c0_i32_0 = arith.constant 0 : i32
    return %c0_i32, %arg0 : i32, i32
  }
  func.func @transform_3(%arg0: i32, %arg1: memref<1xf32, #tpu.memory_space<smem>>) -> (i32, i32) {
    %c0_i32 = arith.constant 0 : i32
    %c0_i32_0 = arith.constant 0 : i32
    return %c0_i32, %arg0 : i32, i32
  }
}

</mosaic_0001>

<bundles_post_ra>
// kernel: neg.4
= control target key start
LH: loop header
LB: loop body
LE: loop exit
PB: predicated region body
PF: predicated region fallthrough
CT: control target
= control target key end

     0   :  { %s24_s0 = inlined_call_operand.vmem [shape: f32[32], index: 0, kind: input, shape index: {}]   ;;  %s25_s1 = inlined_call_operand.vmem [shape: f32[32], index: 1, kind: output, shape index: {}]  }
   0x1   :  { %v2_v0 = vld [vmem:[%s24_s0] sm:$0x1] }
   0x2   :  { %v5_v1 = vxor.u32 2147483648, %v2_v0 }
   0x4   :  { %7 = vst [vmem:[%s25_s1] sm:$0x1] %v5_v1 }

// kernel: neg.6
= control target key start
LH: loop header
LB: loop body
LE: loop exit
PB: predicated region body
PF: predicated region fallthrough
CT: control target
= control target key end

     0   :  { %s72_s0 = inlined_call_operand.vmem [shape: f32[32,32], index: 0, kind: input, shape index: {}]   ;;  %s73_s1 = inlined_call_operand.vmem [shape: f32[32,32], index: 1, kind: output, shape index: {}]  }
   0x1   :  { %v2_v0 = vld [vmem:[%s72_s0] sm:$0xff]  ;;  %v32_v1 = vld [vmem:[%s72_s0 + $0x8] sm:$0xff]  ;;  %v34_v2 = vld [vmem:[%s72_s0 + $0x10] sm:$0xff] }
   0x2   :  { %v5_v3 = vxor.u32 2147483648, %v2_v0  ;;  %v12_v4 = vxor.u32 2147483648, %v32_v1  ;;  %v20_v5 = vxor.u32 2147483648, %v34_v2  ;;  %v36_v6 = vld [vmem:[%s72_s0 + $0x18] sm:$0xff] }
   0x3   :  { %v28_v7 = vxor.u32 2147483648, %v36_v6 }
   0x4   :  { %7 = vst [vmem:[%s73_s1] sm:$0xff] %v5_v3  ;;  %33 = vst [vmem:[%s73_s1 + $0x8] sm:$0xff] %v12_v4 }
   0x5   :  { %35 = vst [vmem:[%s73_s1 + $0x10] sm:$0xff] %v20_v5  ;;  %37 = vst [vmem:[%s73_s1 + $0x18] sm:$0xff] %v28_v7 }

// kernel: thlista_forward.1
= control target key start
LH: loop header
LB: loop body
LE: loop exit
PB: predicated region body
PF: predicated region fallthrough
CT: control target
= control target key end

     0   :  { %vm37_vm0 = vcmask 261120   ;;  %vm889_vm1 = vcmask 523264   ;;  %s13926_s3 = inlined_call_operand.vmem [shape: f32[32,128], index: 3, kind: input, shape index: {}]   ;;  %s13927_s2 = inlined_call_operand.vmem [shape: f32[64,32], index: 2, kind: input, shape index: {}]   ;;  %s13928_s1 = inlined_call_operand.vmem [shape: f32[64,64], index: 1, kind: input, shape index: {}]   ;;  %s13929_s0 = inlined_call_operand.<no memory space> [shape: f32[1], index: 0, kind: input, shape index: {}]   ;;  %s13930_s4 = inlined_call_operand.vmem [shape: f32[64,128], index: 4, kind: output, shape index: {}]  }
   0x1   :  { %v36_v0 = vld [vmem:[%s13926_s3 + $0x18] sm:$0xff]  ;;  %v35_v1 = vld [vmem:[%s13926_s3 + $0x10] sm:$0xff]  ;;  %v34_v2 = vld [vmem:[%s13926_s3 + $0x8] sm:$0xff] }
   0x2   :  { %v11510_v3 = vand.u32 4294901760, %v36_v0  ;;  %v11512_v4 = vand.u32 4294901760, %v35_v1  ;;  %v11514_v5 = vand.u32 4294901760, %v34_v2  ;;  %v33_v6 = vld [vmem:[%s13926_s3] sm:$0xff]  ;;  %v26_v8 = vld [vmem:[%s13927_s2 + $0x8] sm:$0xff]  ;;  %v27_v12 = vld [vmem:[%s13927_s2 + $0x10] sm:$0xff] }
   0x3   :  { %v25_v7 = vld [vmem:[%s13927_s2] sm:$0xff]  ;;  %v11525_v9 = vand.u32 4294901760, %v33_v6  ;;  %v42_v11 = vsel %vm37_vm0, %v26_v8, 0  ;;  %v28_v13 = vld [vmem:[%s13927_s2 + $0x18] sm:$0xff]  ;;  %v45_v19 = vsel %vm37_vm0, %v27_v12, 0  ;;  %v30_v39 = vld [vmem:[%s13927_s2 + $0x28] sm:$0xff] }
   0x4   :  { %v39_v10 = vsel %vm37_vm0, %v25_v7, 0  ;;  %9764 = vmatprep.subr.mxu0 %v11510_v3  ;;  %v11537_v14 = vsub.f32 %v36_v0, %v11510_v3  ;;  %v11541_v16 = vand.u32 4294901760, %v42_v11  ;;  %v11544_v17 = vsub.f32 %v35_v1, %v11512_v4  ;;  %v29_v38 = vld [vmem:[%s13927_s2 + $0x20] sm:$0xff]  ;;  %v31_v47 = vld [vmem:[%s13927_s2 + $0x30] sm:$0xff]  ;;  %v32_v48 = vld [vmem:[%s13927_s2 + $0x38] sm:$0xff] }
   0x5   :  { %v11539_v15 = vand.u32 4294901760, %v39_v10  ;;  %9765 = vmatpush3.msra.mxu0 %v11510_v3  ;;  %v11548_v18 = vsub.f32 %v34_v2, %v11514_v5  ;;  %v48_v20 = vsel %vm37_vm0, %v28_v13, 0  ;;  %v11553_v21 = vsub.f32 %v33_v6, %v11525_v9 }
   0x6   :  { %9766 = vmatprep.subr.mxu0 %v11512_v4  ;;  %v11557_v22 = vand.u32 4294901760, %v11537_v14  ;;  %v11563_v24 = vsub.f32 %v42_v11, %v11541_v16  ;;  %v11566_v25 = vand.u32 4294901760, %v11544_v17  ;;  %v11573_v27 = vand.u32 4294901760, %v45_v19 }
   0x7   :  { %v11560_v23 = vsub.f32 %v39_v10, %v11539_v15  ;;  %9792 = vmatprep.mubr.f32.mxu1 %v11539_v15  ;;  %9767 = vmatpush3.msra.mxu0 %v11512_v4  ;;  %v11571_v26 = vand.u32 4294901760, %v11548_v18  ;;  %v11575_v28 = vand.u32 4294901760, %v48_v20  ;;  %v11578_v29 = vand.u32 4294901760, %v11553_v21 }
   0x8   :  { %9768 = vmatprep.subr.mxu0 %v11514_v5  ;;  %v239_v30 = vsub.f32 %v11537_v14, %v11557_v22  ;;  %v143_v32 = vand.u32 4294901760, %v11563_v24  ;;  %v246_v33 = vsub.f32 %v11544_v17, %v11566_v25  ;;  %v11591_v35 = vsub.f32 %v45_v19, %v11573_v27 }
   0x9   :  { %v133_v31 = vand.u32 4294901760, %v11560_v23  ;;  %9769 = vmatpush3.msra.mxu0 %v11514_v5  ;;  %v253_v34 = vsub.f32 %v11548_v18, %v11571_v26  ;;  %v11594_v36 = vsub.f32 %v48_v20, %v11575_v28  ;;  %v260_v37 = vsub.f32 %v11553_v21, %v11578_v29 }
   0xa   :  { %9770 = vmatprep.subr.mxu0 %v11525_v9  ;;  %v240_v40 = vand.u32 4294901760, %v239_v30  ;;  %v144_v42 = vsub.f32 %v11563_v24, %v143_v32  ;;  %v247_v43 = vand.u32 4294901760, %v246_v33  ;;  %v153_v45 = vand.u32 4294901760, %v11591_v35 }
   0xb   :  { %v134_v41 = vsub.f32 %v11560_v23, %v133_v31  ;;  %9771 = vmatpush3.msra.mxu0 %v11525_v9  ;;  %v254_v44 = vand.u32 4294901760, %v253_v34  ;;  %v163_v46 = vand.u32 4294901760, %v11594_v36  ;;  %v51_v51 = vsel %vm37_vm0, %v29_v38, 0 }
   0xc   :  { %9784 = vmatprep.subr.mxu1 %v240_v40  ;;  %v145_v50 = vand.u32 4294901760, %v144_v42  ;;  %9804 = vmatprep.subr.mxu0 %v11537_v14  ;;  %v54_v52 = vsel %vm37_vm0, %v30_v39, 0  ;;  %v154_v53 = vsub.f32 %v11591_v35, %v153_v45  ;;  %v11629_v55 = vand.u32 4294901760, %v51_v51 }
   0xd   :  { %v135_v49 = vand.u32 4294901760, %v134_v41  ;;  %9785 = vmatpush3.msra.mxu1 %v240_v40  ;;  %v164_v54 = vsub.f32 %v11594_v36, %v163_v46  ;;  %v11631_v56 = vand.u32 4294901760, %v54_v52  ;;  %v261_v57 = vand.u32 4294901760, %v260_v37 }
   0xe   :  { %9786 = vmatprep.subr.mxu1 %v247_v43  ;;  %v57_v58 = vsel %vm37_vm0, %v31_v47, 0  ;;  %v60_v59 = vsel %vm37_vm0, %v32_v48, 0  ;;  %v155_v60 = vand.u32 4294901760, %v154_v53  ;;  %v11636_v62 = vsub.f32 %v51_v51, %v11629_v55 }
   0xf   :  { %9772 = vmatprep.mubr.f32.mxu0 %v135_v49  ;;  %9787 = vmatpush3.msra.mxu1 %v247_v43  ;;  %v165_v61 = vand.u32 4294901760, %v164_v54  ;;  %v11639_v63 = vsub.f32 %v54_v52, %v11631_v56  ;;  %v11642_v0 = vand.u32 4294901760, %v57_v58  ;;  %v11644_v1 = vand.u32 4294901760, %v60_v59 }
  0x10   :  { %9773 = vmatmul.mubr.f32.vlgmr.msra.gmra.mxu0 %v145_v50  ;;  %9788 = vmatprep.subr.mxu1 %v254_v44  ;;  %v173_v2 = vand.u32 4294901760, %v11636_v62 }
  0x11   :  { %9805 = vmatpush3.msra.mxu0 %v11537_v14  ;;  %9775 = vmatprep.mubr.f32.mxu0 %v155_v60  ;;  %v183_v6 = vand.u32 4294901760, %v11639_v63  ;;  %v11650_v7 = vsub.f32 %v57_v58, %v11642_v0  ;;  %v11653_v8 = vsub.f32 %v60_v59, %v11644_v1 }
  0x12   :  { %9789 = vmatpush3.msra.mxu1 %v254_v44  ;;  %9806 = vmatprep.subr.mxu0 %v11544_v17  ;;  %v174_v10 = vsub.f32 %v11636_v62, %v173_v2 }
  0x13   :  { %9790 = vmatprep.subr.mxu1 %v261_v57  ;;  %v184_v11 = vsub.f32 %v11639_v63, %v183_v6  ;;  %v193_v12 = vand.u32 4294901760, %v11650_v7  ;;  %v203_v13 = vand.u32 4294901760, %v11653_v8  ;;  %9807 = vmatpush3.msra.mxu0 %v11544_v17  ;;  %v19_v17 = vld [vmem:[%s13928_s1 + $0x10] sm:$0xff] }
  0x14   :  { %9776 = vmatmul.mubr.f32.gmra.mxu0 %v165_v61  ;;  %9791 = vmatpush3.msra.mxu1 %v261_v57  ;;  %v175_v14 = vand.u32 4294901760, %v174_v10 }
  0x15   :  { %9793 = vmatmul.mubr.f32.vlgmr.msra.gmra.mxu1 %v11541_v16  ;;  %9824 = vmatprep.subr.mxu1 %v11510_v3  ;;  %v185_v19 = vand.u32 4294901760, %v184_v11  ;;  %v194_v20 = vsub.f32 %v11650_v7, %v193_v12  ;;  %v204_v30 = vsub.f32 %v11653_v8, %v203_v13 }
  0x16   :  { %9825 = vmatpush3.msra.mxu1 %v11510_v3  ;;  %9795 = vmatprep.mubr.f32.mxu1 %v11573_v27 }
  0x17   :  { %9826 = vmatprep.subr.mxu1 %v11512_v4  ;;  %9778 = vmatprep.mubr.f32.mxu0 %v175_v14  ;;  %v195_v33 = vand.u32 4294901760, %v194_v20  ;;  %v205_v34 = vand.u32 4294901760, %v204_v30 }
  0x18   :  { %9827 = vmatpush3.msra.mxu1 %v11512_v4  ;;  %9779 = vmatmul.mubr.f32.gmra.mxu0 %v185_v19 }
  0x19   :  { %9796 = vmatmul.mubr.f32.gmra.mxu1 %v11575_v28  ;;  %9808 = vmatprep.subr.mxu0 %v11548_v18 }
  0x1a   :  { %9798 = vmatprep.mubr.f32.mxu1 %v11629_v55  ;;  %9781 = vmatprep.mubr.f32.mxu0 %v195_v33 }
  0x1b   :  { %9809 = vmatpush3.msra.mxu0 %v11548_v18  ;;  %9828 = vmatprep.subr.mxu1 %v11514_v5  ;;  %v11753_v18 = vsel %vm889_vm1, %v19_v17, 0 }
  0x1c   :  { %9810 = vmatprep.subr.mxu0 %v11553_v21  ;;  %9782 = vmatmul.mubr.f32.gmra.mxu0 %v205_v34 }
  0x1d   :  { %9799 = vmatmul.mubr.f32.gmra.mxu1 %v11631_v56  ;;  %9811 = vmatpush3.msra.mxu0 %v11553_v21  ;;  %v20_v21 = vld [vmem:[%s13928_s1 + $0x18] sm:$0xff] }
  0x1e   :  { %9812 = vmatprep.mubr.f32.mxu0 %v11560_v23  ;;  %9829 = vmatpush3.msra.mxu1 %v11514_v5  ;;  %v11762_v23 = vsel %vm889_vm1, %v20_v21, 0 }
  0x1f   :  { %9801 = vmatprep.mubr.f32.mxu1 %v11642_v0  ;;  %9830 = vmatprep.subr.mxu1 %v11525_v9 }
  0x20   :  { %9844 = vmatprep.subr.mxu0 %v11557_v22  ;;  %9813 = vmatmul.mubr.f32.vlgmr.msra.gmra.mxu0 %v11563_v24 }
  0x21   :  { %9802 = vmatmul.mubr.f32.gmra.mxu1 %v11644_v1  ;;  %9815 = vmatprep.mubr.f32.mxu0 %v11591_v35  ;;  %v24_v35 = vld [vmem:[%s13928_s1 + $0x38] sm:$0xff] }
  0x22   :  { %9831 = vmatpush3.msra.mxu1 %v11525_v9  ;;  %9832 = vmatprep.mubr.f32.mxu1 %v133_v31  ;;  %v23_v31 = vld [vmem:[%s13928_s1 + $0x30] sm:$0xff] }
  0x23   :  { %9845 = vmatpush3.msra.mxu0 %v11557_v22  ;;  %9864 = vmatprep.subr.mxu1 %v11510_v3 }
  0x24   :  { %9846 = vmatprep.subr.mxu0 %v11566_v25  ;;  %9816 = vmatmul.mubr.f32.gmra.mxu0 %v11594_v36  ;;  %v11791_v36 = vsel %vm889_vm1, %v24_v35, 0 }
  0x25   :  { %9833 = vmatmul.mubr.f32.vlgmr.msra.gmra.mxu1 %v143_v32  ;;  %9818 = vmatprep.mubr.f32.mxu0 %v11636_v62  ;;  %v11785_v32 = vsel %vm889_vm1, %v23_v31, 0 }
  0x26   :  { %9865 = vmatpush3.msra.mxu1 %v11510_v3  ;;  %9835 = vmatprep.mubr.f32.mxu1 %v153_v45  ;;  %v17_v3 = vld [vmem:[%s13928_s1] sm:$0xff] }
  0x27   :  { %9847 = vmatpush3.msra.mxu0 %v11566_v25  ;;  %9866 = vmatprep.subr.mxu1 %v11512_v4  ;;  %v21_v25 = vld [vmem:[%s13928_s1 + $0x20] sm:$0xff] }
  0x28   :  { %9848 = vmatprep.subr.mxu0 %v11571_v26  ;;  %9819 = vmatmul.mubr.f32.gmra.mxu0 %v11639_v63 }
  0x29   :  { %9836 = vmatmul.mubr.f32.gmra.mxu1 %v163_v46  ;;  %9821 = vmatprep.mubr.f32.mxu0 %v11650_v7 }
  0x2a   :  { %9867 = vmatpush3.msra.mxu1 %v11512_v4  ;;  %9838 = vmatprep.mubr.f32.mxu1 %v173_v2  ;;  %v891_v4 = vsel %vm889_vm1, %v17_v3, 0 }
  0x2b   :  { %9849 = vmatpush3.msra.mxu0 %v11571_v26  ;;  %9868 = vmatprep.subr.mxu1 %v11514_v5  ;;  %v11770_v26 = vsel %vm889_vm1, %v21_v25, 0 }
  0x2c   :  { %9850 = vmatprep.subr.mxu0 %v11578_v29  ;;  %9822 = vmatmul.mubr.f32.gmra.mxu0 %v11653_v8 }
  0x2d   :  { %9839 = vmatmul.mubr.f32.gmra.mxu1 %v183_v6  ;;  %9851 = vmatpush3.msra.mxu0 %v11578_v29 }
  0x2e   :  { %9852 = vmatprep.mubr.f32.mxu0 %v11539_v15  ;;  %9869 = vmatpush3.msra.mxu1 %v11514_v5  ;;  %v18_v5 = vld [vmem:[%s13928_s1 + $0x8] sm:$0xff] }
  0x2f   :  { %9841 = vmatprep.mubr.f32.mxu1 %v193_v12  ;;  %9870 = vmatprep.subr.mxu1 %v11525_v9 }
  0x30   :  { %9853 = vmatmul.mubr.f32.vlgmr.msra.gmra.mxu0 %v11541_v16  ;;  %9871 = vmatpush3.msra.mxu1 %v11525_v9  ;;  %v11740_v9 = vand.u32 4294901760, %v891_v4 }
  0x31   :  { %9842 = vmatmul.mubr.f32.gmra.mxu1 %v203_v13  ;;  %9855 = vmatprep.mubr.f32.mxu0 %v11573_v27 }
  0x32   :  { %9872 = vmatprep.mubr.f32.mxu1 %v11539_v15  ;;  %14055 = vst [vmem:[#allocation4_spill] sm:$0xff] %v11740_v9  ;;  %v11743_v15 = vsel %vm889_vm1, %v18_v5, 0 }
  0x34   :  { %9856 = vmatmul.mubr.f32.gmra.mxu0 %v11575_v28 }
  0x35   :  { %9873 = vmatmul.mubr.f32.vlgmr.msra.gmra.mxu1 %v11541_v16  ;;  %9858 = vmatprep.mubr.f32.mxu0 %v11629_v55  ;;  %v11746_v16 = vsub.f32 %v891_v4, %v11740_v9 }
  0x36   :  { %9875 = vmatprep.mubr.f32.mxu1 %v11573_v27  ;;  %v22_v27 = vld [vmem:[%s13928_s1 + $0x28] sm:$0xff] }
  0x37   :  { %14056 = vst [vmem:[#allocation5_spill] sm:$0xff] %v11746_v16  ;;  %v11759_v22 = vand.u32 4294901760, %v11746_v16  ;;  %v11778_v29 = vsel %vm889_vm1, %v22_v27, 0 }
  0x38   :  { %9859 = vmatmul.mubr.f32.gmra.mxu0 %v11631_v56 }
  0x39   :  { %9876 = vmatmul.mubr.f32.gmra.mxu1 %v11575_v28  ;;  %9861 = vmatprep.mubr.f32.mxu0 %v11642_v0  ;;  %14057 = vst [vmem:[#allocation6_spill] sm:$0xff] %v11759_v22  ;;  %v990_v24 = vsub.f32 %v11746_v16, %v11759_v22 }
  0x3a   :  { %9878 = vmatprep.mubr.f32.mxu1 %v11629_v55 }
  0x3b   :  { %v11775_v28 = vand.u32 4294901760, %v990_v24 }
  0x3c   :  { %9862 = vmatmul.mubr.f32.gmra.mxu0 %v11644_v1 }
  0x3d   :  { %9879 = vmatmul.mubr.f32.gmra.mxu1 %v11631_v56  ;;  %14058 = vst [vmem:[#allocation7_spill] sm:$0xff] %v11775_v28  ;;  %9900 = vmatprep.mubr.f32.mxu0 %v11775_v28 }
  0x3e   :  { %9881 = vmatprep.mubr.f32.mxu1 %v11642_v0 }
  0x41   :  { %9882 = vmatmul.mubr.f32.gmra.mxu1 %v11644_v1 }
  0x42   :  { %9928 = vmatprep.mubr.f32.mxu1 %v11740_v9 }
  0xd0   :  { %v9774_v37 = vpop.f32.mrf.mxu0 }
  0xd2   :  { %v137_v38 = vpop.f32.mrf.mxu0 }
  0xd4   :  { %v9777_v39 = vpop.f32.mrf.mxu0 }
  0xd5   :  { %v9794_v40 = vpop.f32.mrf.mxu1 }
  0xd6   :  { %v157_v41 = vpop.f32.mrf.mxu0  ;;  %v305_v11 = vadd.f32 %v9794_v40, %v9774_v37 }
  0xd7   :  { %v298_v42 = vpop.f32.mrf.mxu1 }
  0xd8   :  { %v9780_v43 = vpop.f32.mrf.mxu0  ;;  %v299_v12 = vadd.f32 %v298_v42, %v137_v38 }
  0xd9   :  { %v9797_v44 = vpop.f32.mrf.mxu1 }
  0xda   :  { %v177_v45 = vpop.f32.mrf.mxu0  ;;  %v317_v30 = vadd.f32 %v9797_v44, %v9777_v39 }
  0xdb   :  { %v310_v46 = vpop.f32.mrf.mxu1 }
  0xdc   :  { %v9783_v47 = vpop.f32.mrf.mxu0  ;;  %v311_v21 = vadd.f32 %v310_v46, %v157_v41 }
  0xdd   :  { %v9800_v48 = vpop.f32.mrf.mxu1 }
  0xde   :  { %v197_v49 = vpop.f32.mrf.mxu0  ;;  %v329_v19 = vadd.f32 %v9800_v48, %v9780_v43 }
  0xdf   :  { %v322_v50 = vpop.f32.mrf.mxu1 }
  0xe0   :  { %v9814_v51 = vpop.f32.mrf.mxu0  ;;  %v323_v4 = vadd.f32 %v322_v50, %v177_v45 }
  0xe1   :  { %v9803_v52 = vpop.f32.mrf.mxu1  ;;  %v428_v20 = vadd.f32 %v9814_v51, %v305_v11 }
  0xe2   :  { %v420_v53 = vpop.f32.mrf.mxu0  ;;  %v341_v35 = vadd.f32 %v9803_v52, %v9783_v47 }
  0xe3   :  { %v334_v54 = vpop.f32.mrf.mxu1  ;;  %v421_v33 = vadd.f32 %v420_v53, %v299_v12 }
  0xe4   :  { %v9817_v55 = vpop.f32.mrf.mxu0  ;;  %v335_v40 = vadd.f32 %v334_v54, %v197_v49 }
  0xe5   :  { %v9834_v56 = vpop.f32.mrf.mxu1  ;;  %v442_v24 = vadd.f32 %v9817_v55, %v317_v30 }
  0xe6   :  { %v434_v57 = vpop.f32.mrf.mxu0  ;;  %v555_v5 = vadd.f32 %v9834_v56, %v428_v20 }
  0xe7   :  { %v546_v58 = vpop.f32.mrf.mxu1  ;;  %v435_v42 = vadd.f32 %v434_v57, %v311_v21 }
  0xe8   :  { %v9820_v59 = vpop.f32.mrf.mxu0  ;;  %v547_v25 = vadd.f32 %v546_v58, %v421_v33 }
  0xe9   :  { %v9837_v60 = vpop.f32.mrf.mxu1  ;;  %v456_v17 = vadd.f32 %v9820_v59, %v329_v19 }
  0xea   :  { %v448_v61 = vpop.f32.mrf.mxu0  ;;  %v571_v43 = vadd.f32 %v9837_v60, %v442_v24 }
  0xeb   :  { %v562_v62 = vpop.f32.mrf.mxu1  ;;  %v449_v28 = vadd.f32 %v448_v61, %v323_v4 }
  0xec   :  { %v9823_v63 = vpop.f32.mrf.mxu0  ;;  %v563_v41 = vadd.f32 %v562_v62, %v435_v42 }
  0xed   :  { %v9840_v0 = vpop.f32.mrf.mxu1  ;;  %v470_v51 = vadd.f32 %v9823_v63, %v341_v35 }
  0xee   :  { %v462_v1 = vpop.f32.mrf.mxu0  ;;  %v587_v37 = vadd.f32 %v9840_v0, %v456_v17 }
  0xef   :  { %v578_v2 = vpop.f32.mrf.mxu1  ;;  %v463_v46 = vadd.f32 %v462_v1, %v335_v40 }
  0xf0   :  { %v9854_v6 = vpop.f32.mrf.mxu0  ;;  %v579_v53 = vadd.f32 %v578_v2, %v449_v28 }
  0xf1   :  { %v9843_v7 = vpop.f32.mrf.mxu1  ;;  %v692_v38 = vadd.f32 %v9854_v6, %v555_v5 }
  0xf2   :  { %v685_v8 = vpop.f32.mrf.mxu0  ;;  %v603_v58 = vadd.f32 %v9843_v7, %v470_v51 }
  0xf3   :  { %v594_v10 = vpop.f32.mrf.mxu1  ;;  %v686_v48 = vadd.f32 %v685_v8, %v547_v25  ;;  %v11828_v25 = vstv %s13929_s0 }
  0xf4   :  { %v9857_v13 = vpop.f32.mrf.mxu0  ;;  %v595_v54 = vadd.f32 %v594_v10, %v463_v46  ;;  %14065 = vst [vmem:[#allocation14_spill] sm:$0xff] %v11828_v25 }
  0xf5   :  { %v9874_v14 = vpop.f32.mrf.mxu1  ;;  %v704_v55 = vadd.f32 %v9857_v13, %v571_v43 }
  0xf6   :  { %v697_v34 = vpop.f32.mrf.mxu0  ;;  %v11793_v45 = vadd.f32 %v9874_v14, %v692_v38 }
  0xf7   :  { %v802_v3 = vpop.f32.mrf.mxu1  ;;  %v698_v57 = vadd.f32 %v697_v34, %v563_v41 }
  0xf8   :  { %v9860_v27 = vpop.f32.mrf.mxu0  ;;  %14059 = vst [vmem:[#allocation8_spill] sm:$0xff] %v11793_v45  ;;  %v11795_v56 = vadd.f32 %v802_v3, %v686_v48  ;;  %v849_v62 = vmul.f32 %v11793_v45, %v11793_v45 }
  0xf9   :  { %v9877_v31 = vpop.f32.mrf.mxu1  ;;  %v716_v50 = vadd.f32 %v9860_v27, %v587_v37 }
  0xfa   :  { %v709_v39 = vpop.f32.mrf.mxu0  ;;  %14060 = vst [vmem:[#allocation9_spill] sm:$0xff] %v11795_v56  ;;  %v11799_v60 = vadd.f32 %v9877_v31, %v704_v55  ;;  %v848_v7 = vmul.f32 %v11795_v56, %v11795_v56 }
  0xfb   :  { %v814_v44 = vpop.f32.mrf.mxu1  ;;  %v710_v59 = vadd.f32 %v709_v39, %v579_v53 }
  0xfc   :  { %v9863_v47 = vpop.f32.mrf.mxu0  ;;  %14062 = vst [vmem:[#allocation11_spill] sm:$0xff] %v11799_v60  ;;  %v11807_v2 = vadd.f32 %v814_v44, %v698_v57  ;;  %v851_v14 = vmul.f32 %v11799_v60, %v11799_v60 }
  0xfd   :  { %v9880_v52 = vpop.f32.mrf.mxu1  ;;  %v728_v63 = vadd.f32 %v9863_v47, %v603_v58 }
  0xfe   :  { %v11797_v49 = vadd.f32 %v9880_v52, %v716_v50  ;;  %v721_v61 = vpop.f32.mrf.mxu0  ;;  %v850_v34 = vmul.f32 %v11807_v2, %v11807_v2  ;;  %v11839_v52 = vand.u32 4294901760, %v11743_v15 }
  0xff   :  { %v826_v28 = vpop.f32.mrf.mxu1  ;;  %v722_v8 = vadd.f32 %v721_v61, %v595_v54 }
 0x100   :  { %14061 = vst [vmem:[#allocation10_spill] sm:$0xff] %v11797_v49  ;;  %v11801_v0 = vadd.f32 %v826_v28, %v710_v59  ;;  %v853_v1 = vmul.f32 %v11797_v49, %v11797_v49  ;;  %14066 = vst [vmem:[#allocation15_spill] sm:$0xff] %v11839_v52 }
 0x101   :  { %v9883_v6 = vpop.f32.mrf.mxu1 }
 0x102   :  { %v11811_v10 = vadd.f32 %v9883_v6, %v728_v63  ;;  %v857_v11 = vadd.f32 %v853_v1, %v849_v62  ;;  %v852_v12 = vmul.f32 %v11801_v0, %v11801_v0 }
 0x103   :  { %v838_v13 = vpop.f32.mrf.mxu1 }
 0x104   :  { %14063 = vst [vmem:[#allocation12_spill] sm:$0xff] %v11811_v10  ;;  %v11817_v19 = vadd.f32 %v838_v13, %v722_v8  ;;  %v855_v20 = vmul.f32 %v11811_v10, %v11811_v10  ;;  %v861_v30 = vadd.f32 1e-30, %v857_v11  ;;  %v856_v33 = vadd.f32 %v852_v12, %v848_v7 }
 0x105   :  { %v11857_v7 = vsub.f32 %v11743_v15, %v11839_v52  ;;  %v11860_v8 = vand.u32 4294901760, %v11753_v18 }
 0x106   :  { %14064 = vst [vmem:[#allocation13_spill] sm:$0xff] %v11817_v19  ;;  %v859_v3 = vadd.f32 %v855_v20, %v851_v14  ;;  %v854_v4 = vmul.f32 %v11817_v19, %v11817_v19  ;;  %11396 = vrsqrt.f32 %v861_v30  ;;  %v860_v5 = vadd.f32 1e-30, %v856_v33 }
 0x107   :  { %14067 = vst [vmem:[#allocation16_spill] sm:$0xff] %v11857_v7  ;;  %14068 = vst [vmem:[#allocation17_spill] sm:$0xff] %v11860_v8  ;;  %v11876_v20 = vand.u32 4294901760, %v11762_v23 }
 0x108   :  { %v863_v17 = vadd.f32 1e-30, %v859_v3  ;;  %v858_v21 = vadd.f32 %v854_v4, %v850_v34  ;;  %11398 = vrsqrt.f32 %v860_v5  ;;  %v11895_v5 = vand.u32 4294901760, %v11857_v7 }
 0x109   :  { %14069 = vst [vmem:[#allocation18_spill] sm:$0xff] %v11876_v20 }
 0x10a   :  { %11400 = vrsqrt.f32 %v863_v17  ;;  %v862_v24 = vadd.f32 1e-30, %v858_v21  ;;  %14070 = vst [vmem:[#allocation19_spill] sm:$0xff] %v11895_v5  ;;  %v11899_v17 = vsub.f32 %v11753_v18, %v11860_v8  ;;  %v11902_v21 = vand.u32 4294901760, %v11770_v26 }
 0x10c   :  { %11402 = vrsqrt.f32 %v862_v24  ;;  %14071 = vst [vmem:[#allocation20_spill] sm:$0xff] %v11899_v17  ;;  %14072 = vst [vmem:[#allocation21_spill] sm:$0xff] %v11902_v21 }
 0x113   :  { %v11397_v27 = vpop.eup %11396 }
 0x114   :  { %v870_v31 = vmul.f32 %v11397_v27, %v11828_v25 }
 0x115   :  { %v11399_v35 = vpop.eup %11398 }
 0x116   :  { %v874_v37 = vsub.f32 1.0, %v870_v31  ;;  %v869_v38 = vmul.f32 %v11399_v35, %v11828_v25 }
 0x117   :  { %v11401_v40 = vpop.eup %11400 }
 0x118   :  { %v872_v42 = vmul.f32 %v11401_v40, %v11828_v25  ;;  %v878_v43 = vmax.f32 %v874_v37, 0.0  ;;  %v873_v48 = vsub.f32 1.0, %v869_v38  ;;  %v11921_v37 = vsub.f32 %v11762_v23, %v11876_v20 }
 0x119   :  { %v11403_v39 = vpop.eup %11402  ;;  %v11924_v38 = vand.u32 4294901760, %v11778_v29  ;;  %v1000_v23 = vsub.f32 %v11857_v7, %v11895_v5 }
 0x11a   :  { %v876_v44 = vsub.f32 1.0, %v872_v42  ;;  %v871_v51 = vmul.f32 %v11403_v39, %v11828_v25  ;;  %v886_v53 = vmul.f32 %v878_v43, %v11797_v49  ;;  %v877_v50 = vmax.f32 %v873_v48, 0.0  ;;  %14073 = vst [vmem:[#allocation22_spill] sm:$0xff] %v11921_v37 }
 0x11b   :  { %v882_v6 = vmul.f32 %v878_v43, %v11793_v45  ;;  %14074 = vst [vmem:[#allocation23_spill] sm:$0xff] %v11924_v38  ;;  %v11938_v39 = vand.u32 4294901760, %v11899_v17 }
 0x11c   :  { %v880_v41 = vmax.f32 %v876_v44, 0.0  ;;  %v875_v46 = vsub.f32 1.0, %v871_v51  ;;  %v11835_v55 = vand.u32 4294901760, %v886_v53  ;;  %v885_v47 = vmul.f32 %v877_v50, %v11801_v0 }
 0x11d   :  { %v881_v15 = vmul.f32 %v877_v50, %v11795_v56  ;;  %v11892_v4 = vand.u32 4294901760, %v882_v6  ;;  %14075 = vst [vmem:[#allocation24_spill] sm:$0xff] %v11938_v39 }
 0x11e   :  { %v888_v58 = vmul.f32 %v880_v41, %v11811_v10  ;;  %v879_v59 = vmax.f32 %v875_v46, 0.0  ;;  %v11842_v54 = vand.u32 4294901760, %v885_v47  ;;  %v884_v57 = vmul.f32 %v880_v41, %v11799_v60 }
 0x11f   :  { %v11846_v61 = vsub.f32 %v886_v53, %v11835_v55  ;;  %v11917_v18 = vand.u32 4294901760, %v881_v15  ;;  %v11941_v44 = vsub.f32 %v882_v6, %v11892_v4  ;;  %v11951_v41 = vsub.f32 %v11770_v26, %v11902_v21 }
 0x120   :  { %v11848_v28 = vand.u32 4294901760, %v888_v58  ;;  %v887_v63 = vmul.f32 %v879_v59, %v11817_v19  ;;  %v11851_v62 = vand.u32 4294901760, %v884_v57  ;;  %v883_v1 = vmul.f32 %v879_v59, %v11807_v2 }
 0x121   :  { %v11871_v14 = vsub.f32 %v885_v47, %v11842_v54  ;;  %v11886_v34 = vand.u32 4294901760, %v11846_v61  ;;  %14076 = vst [vmem:[#allocation25_spill] sm:$0xff] %v11951_v41  ;;  %v11955_v46 = vand.u32 4294901760, %v11921_v37  ;;  %v11958_v47 = vsub.f32 %v881_v15, %v11917_v18 }
 0x122   :  { %9884 = vmatprep.subr.mxu0 %v11848_v28  ;;  %v11863_v11 = vand.u32 4294901760, %v887_v63  ;;  %v11866_v12 = vsub.f32 %v888_v58, %v11848_v28  ;;  %v11868_v13 = vand.u32 4294901760, %v883_v1  ;;  %v11889_v3 = vsub.f32 %v884_v57, %v11851_v62 }
 0x123   :  { %9885 = vmatpush3.msra.mxu0 %v11848_v28  ;;  %v11911_v31 = vand.u32 4294901760, %v11871_v14  ;;  %v1101_v43 = vsub.f32 %v11846_v61, %v11886_v34  ;;  %14077 = vst [vmem:[#allocation26_spill] sm:$0xff] %v11955_v46  ;;  %v11965_v26 = vsub.f32 %v11778_v29, %v11924_v38  ;;  %v11968_v57 = vand.u32 4294901760, %v11785_v32 }
 0x124   :  { %9886 = vmatprep.subr.mxu0 %v11863_v11  ;;  %v11880_v30 = vand.u32 4294901760, %v11866_v12  ;;  %v11883_v33 = vsub.f32 %v887_v63, %v11863_v11  ;;  %v11914_v35 = vsub.f32 %v883_v1, %v11868_v13  ;;  %v11932_v48 = vand.u32 4294901760, %v11889_v3 }
 0x125   :  { %9887 = vmatpush3.msra.mxu0 %v11863_v11  ;;  %v1108_v53 = vsub.f32 %v11871_v14, %v11911_v31  ;;  %v1102_v58 = vand.u32 4294901760, %v1101_v43  ;;  %14078 = vst [vmem:[#allocation27_spill] sm:$0xff] %v11965_v26  ;;  %14079 = vst [vmem:[#allocation28_spill] sm:$0xff] %v11968_v57  ;;  %v11971_v63 = vand.u32 4294901760, %v1000_v23  ;;  %v1010_v1 = vsub.f32 %v11899_v17, %v11938_v39 }
 0x126   :  { %9888 = vmatprep.subr.mxu0 %v11835_v55  ;;  %v1087_v24 = vsub.f32 %v11866_v12, %v11880_v30  ;;  %v11908_v27 = vand.u32 4294901760, %v11883_v33  ;;  %v11947_v50 = vand.u32 4294901760, %v11914_v35  ;;  %v1115_v59 = vsub.f32 %v11889_v3, %v11932_v48 }
 0x127   :  { %9889 = vmatpush3.msra.mxu0 %v11835_v55  ;;  %14080 = vst [vmem:[#allocation29_spill] sm:$0xff] %v11971_v63  ;;  %v11976_v6 = vand.u32 4294901760, %v11941_v44  ;;  %v1109_v15 = vand.u32 4294901760, %v1108_v53  ;;  %v11991_v43 = vand.u32 4294901760, %v11958_v47  ;;  %v11999_v53 = vsub.f32 %v11785_v32, %v11968_v57 }
 0x128   :  { %9890 = vmatprep.subr.mxu0 %v11842_v54  ;;  %v1088_v40 = vand.u32 4294901760, %v1087_v24  ;;  %v1094_v42 = vsub.f32 %v11883_v33, %v11908_v27  ;;  %v1122_v29 = vsub.f32 %v11914_v35, %v11947_v50  ;;  %v11982_v24 = vand.u32 4294901760, %v11951_v41 }
 0x129   :  { %9891 = vmatpush3.msra.mxu0 %v11842_v54  ;;  %v1116_v23 = vand.u32 4294901760, %v1115_v59  ;;  %14084 = vst [vmem:[#allocation33_spill] sm:$0xff] %v11999_v53  ;;  %v1129_v25 = vsub.f32 %v11941_v44, %v11976_v6 }
 0x12a   :  { %9892 = vmatprep.subr.mxu0 %v11851_v62  ;;  %9912 = vmatprep.subr.mxu1 %v1088_v40  ;;  %v1095_v51 = vand.u32 4294901760, %v1094_v42  ;;  %14081 = vst [vmem:[#allocation30_spill] sm:$0xff] %v11982_v24  ;;  %v1020_v42 = vsub.f32 %v11921_v37, %v11955_v46  ;;  %v1123_v19 = vand.u32 4294901760, %v1122_v29  ;;  %v1030_v59 = vsub.f32 %v11951_v41, %v11982_v24 }
 0x12b   :  { %9893 = vmatpush3.msra.mxu0 %v11851_v62  ;;  %9913 = vmatpush3.msra.mxu1 %v1088_v40  ;;  %v11985_v40 = vand.u32 4294901760, %v11791_v36  ;;  %v12022_v29 = vand.u32 4294901760, %v11999_v53 }
 0x12c   :  { %9894 = vmatprep.subr.mxu0 %v11868_v13  ;;  %9914 = vmatprep.subr.mxu1 %v1095_v51  ;;  %v12014_v32 = vand.u32 4294901760, %v1020_v42  ;;  %v12027_v42 = vand.u32 4294901760, %v1030_v59 }
 0x12d   :  { %9895 = vmatpush3.msra.mxu0 %v11868_v13  ;;  %9915 = vmatpush3.msra.mxu1 %v1095_v51  ;;  %14082 = vst [vmem:[#allocation31_spill] sm:$0xff] %v11985_v40  ;;  %v11995_v51 = vand.u32 4294901760, %v11965_v26  ;;  %v12011_v10 = vsub.f32 %v11791_v36, %v11985_v40  ;;  %14086 = vst [vmem:[#allocation35_spill] sm:$0xff] %v12022_v29  ;;  %v1130_v36 = vand.u32 4294901760, %v1129_v25 }
 0x12e   :  { %9896 = vmatprep.subr.mxu0 %v11892_v4  ;;  %9916 = vmatprep.subr.mxu1 %v1102_v58  ;;  %v1050_v25 = vsub.f32 %v11999_v53, %v12022_v29 }
 0x12f   :  { %9897 = vmatpush3.msra.mxu0 %v11892_v4  ;;  %9917 = vmatpush3.msra.mxu1 %v1102_v58  ;;  %14083 = vst [vmem:[#allocation32_spill] sm:$0xff] %v11995_v51  ;;  %v12002_v58 = vand.u32 4294901760, %v1010_v1  ;;  %14085 = vst [vmem:[#allocation34_spill] sm:$0xff] %v12011_v10  ;;  %v1136_v1 = vsub.f32 %v11958_v47, %v11991_v43 }
 0x130   :  { %9898 = vmatprep.subr.mxu0 %v11917_v18  ;;  %9918 = vmatprep.subr.mxu1 %v1109_v15 }
 0x131   :  { %9899 = vmatpush3.msra.mxu0 %v11917_v18  ;;  %9919 = vmatpush3.msra.mxu1 %v1109_v15  ;;  %v1040_v15 = vsub.f32 %v11965_v26, %v11995_v51 }
 0x132   :  { %9901 = vmatmul.mubr.f32.vlgmr.msra.gmra.mxu0 %v11971_v63  ;;  %9920 = vmatprep.subr.mxu1 %v1116_v23 }
 0x133   :  { %9940 = vmatprep.subr.mxu0 %v11866_v12  ;;  %9921 = vmatpush3.msra.mxu1 %v1116_v23  ;;  %v12030_v23 = vand.u32 4294901760, %v12011_v10  ;;  %v12034_v63 = vand.u32 4294901760, %v1040_v15 }
 0x134   :  { %9941 = vmatpush3.msra.mxu0 %v11866_v12  ;;  %9922 = vmatprep.subr.mxu1 %v1123_v19  ;;  %v1137_v12 = vand.u32 4294901760, %v1136_v1 }
 0x135   :  { %9942 = vmatprep.subr.mxu0 %v11883_v33  ;;  %9903 = vmatprep.mubr.f32.mxu0 %v12002_v58  ;;  %14087 = vst [vmem:[#allocation36_spill] sm:$0xff] %v12030_v23 }
 0x136   :  { %9923 = vmatpush3.msra.mxu1 %v1123_v19  ;;  %9943 = vmatpush3.msra.mxu0 %v11883_v33  ;;  %v1060_v19 = vsub.f32 %v12011_v10, %v12030_v23  ;;  %v12046_v33 = vand.u32 4294901760, %v1050_v25 }
 0x137   :  { %9904 = vmatmul.mubr.f32.gmra.mxu0 %v12014_v32  ;;  %9924 = vmatprep.subr.mxu1 %v1130_v36 }
 0x138   :  { %9944 = vmatprep.subr.mxu0 %v11846_v61  ;;  %9925 = vmatpush3.msra.mxu1 %v1130_v36  ;;  %14088 = vst [vmem:[#allocation37_spill] sm:$0xff] %v12046_v33 }
 0x139   :  { %9945 = vmatpush3.msra.mxu0 %v11846_v61  ;;  %9926 = vmatprep.subr.mxu1 %v1137_v12  ;;  %v12052_v61 = vand.u32 4294901760, %v1060_v19 }
 0x13a   :  { %9946 = vmatprep.subr.mxu0 %v11871_v14  ;;  %9906 = vmatprep.mubr.f32.mxu0 %v12027_v42 }
 0x13b   :  { %9927 = vmatpush3.msra.mxu1 %v1137_v12  ;;  %9947 = vmatpush3.msra.mxu0 %v11871_v14  ;;  %14089 = vst [vmem:[#allocation38_spill] sm:$0xff] %v12052_v61 }
 0x13c   :  { %9907 = vmatmul.mubr.f32.gmra.mxu0 %v12034_v63  ;;  %9929 = vmatmul.mubr.f32.vlgmr.msra.gmra.mxu1 %v11839_v52 }
 0x13d   :  { %9948 = vmatprep.subr.mxu0 %v11889_v3  ;;  %9968 = vmatprep.subr.mxu1 %v11848_v28 }
 0x13e   :  { %9949 = vmatpush3.msra.mxu0 %v11889_v3  ;;  %9969 = vmatpush3.msra.mxu1 %v11848_v28 }
 0x13f   :  { %9950 = vmatprep.subr.mxu0 %v11914_v35  ;;  %9970 = vmatprep.subr.mxu1 %v11863_v11 }
 0x140   :  { %9909 = vmatprep.mubr.f32.mxu0 %v12046_v33  ;;  %9931 = vmatprep.mubr.f32.mxu1 %v11860_v8 }
 0x141   :  { %9951 = vmatpush3.msra.mxu0 %v11914_v35  ;;  %9971 = vmatpush3.msra.mxu1 %v11863_v11 }
 0x142   :  { %9910 = vmatmul.mubr.f32.gmra.mxu0 %v12052_v61  ;;  %9932 = vmatmul.mubr.f32.gmra.mxu1 %v11876_v20 }
 0x143   :  { %9952 = vmatprep.subr.mxu0 %v11941_v44  ;;  %9972 = vmatprep.subr.mxu1 %v11835_v55 }
 0x144   :  { %9953 = vmatpush3.msra.mxu0 %v11941_v44  ;;  %9973 = vmatpush3.msra.mxu1 %v11835_v55 }
 0x145   :  { %9954 = vmatprep.subr.mxu0 %v11958_v47  ;;  %9974 = vmatprep.subr.mxu1 %v11842_v54 }
 0x146   :  { %9934 = vmatprep.mubr.f32.mxu1 %v11902_v21  ;;  %9955 = vmatpush3.msra.mxu0 %v11958_v47 }
 0x147   :  { %9956 = vmatprep.mubr.f32.mxu0 %v11746_v16  ;;  %9975 = vmatpush3.msra.mxu1 %v11842_v54 }
 0x148   :  { %9935 = vmatmul.mubr.f32.gmra.mxu1 %v11924_v38  ;;  %9957 = vmatmul.mubr.f32.vlgmr.msra.gmra.mxu0 %v11857_v7 }
 0x149   :  { %9976 = vmatprep.subr.mxu1 %v11851_v62  ;;  %9996 = vmatprep.subr.mxu0 %v11880_v30 }
 0x14a   :  { %9977 = vmatpush3.msra.mxu1 %v11851_v62  ;;  %9997 = vmatpush3.msra.mxu0 %v11880_v30 }
 0x14b   :  { %9978 = vmatprep.subr.mxu1 %v11868_v13  ;;  %9998 = vmatprep.subr.mxu0 %v11908_v27 }
 0x14c   :  { %9937 = vmatprep.mubr.f32.mxu1 %v11968_v57  ;;  %9959 = vmatprep.mubr.f32.mxu0 %v11899_v17 }
 0x14d   :  { %9979 = vmatpush3.msra.mxu1 %v11868_v13  ;;  %9999 = vmatpush3.msra.mxu0 %v11908_v27 }
 0x14e   :  { %9938 = vmatmul.mubr.f32.gmra.mxu1 %v11985_v40  ;;  %9960 = vmatmul.mubr.f32.gmra.mxu0 %v11921_v37 }
 0x14f   :  { %9980 = vmatprep.subr.mxu1 %v11892_v4  ;;  %10000 = vmatprep.subr.mxu0 %v11886_v34 }
 0x150   :  { %9981 = vmatpush3.msra.mxu1 %v11892_v4  ;;  %10001 = vmatpush3.msra.mxu0 %v11886_v34 }
 0x151   :  { %9982 = vmatprep.subr.mxu1 %v11917_v18  ;;  %10002 = vmatprep.subr.mxu0 %v11911_v31 }
 0x152   :  { %9962 = vmatprep.mubr.f32.mxu0 %v11951_v41  ;;  %9983 = vmatpush3.msra.mxu1 %v11917_v18 }
 0x153   :  { %9984 = vmatprep.mubr.f32.mxu1 %v11759_v22  ;;  %10003 = vmatpush3.msra.mxu0 %v11911_v31 }
 0x154   :  { %9963 = vmatmul.mubr.f32.gmra.mxu0 %v11965_v26  ;;  %9985 = vmatmul.mubr.f32.vlgmr.msra.gmra.mxu1 %v11895_v5 }
 0x155   :  { %10004 = vmatprep.subr.mxu0 %v11932_v48  ;;  %10024 = vmatprep.subr.mxu1 %v11848_v28 }
 0x156   :  { %10005 = vmatpush3.msra.mxu0 %v11932_v48  ;;  %10025 = vmatpush3.msra.mxu1 %v11848_v28 }
 0x157   :  { %10006 = vmatprep.subr.mxu0 %v11947_v50  ;;  %10026 = vmatprep.subr.mxu1 %v11863_v11 }
 0x158   :  { %9965 = vmatprep.mubr.f32.mxu0 %v11999_v53  ;;  %9987 = vmatprep.mubr.f32.mxu1 %v11938_v39 }
 0x159   :  { %10007 = vmatpush3.msra.mxu0 %v11947_v50  ;;  %10027 = vmatpush3.msra.mxu1 %v11863_v11 }
 0x15a   :  { %9966 = vmatmul.mubr.f32.gmra.mxu0 %v12011_v10  ;;  %9988 = vmatmul.mubr.f32.gmra.mxu1 %v11955_v46 }
 0x15b   :  { %10008 = vmatprep.subr.mxu0 %v11976_v6  ;;  %10028 = vmatprep.subr.mxu1 %v11835_v55 }
 0x15c   :  { %10009 = vmatpush3.msra.mxu0 %v11976_v6  ;;  %10029 = vmatpush3.msra.mxu1 %v11835_v55  ;;  %v14090_v55 = vld [vmem:[#allocation7_spill] sm:$0xff] }
 0x15d   :  { %10010 = vmatprep.subr.mxu0 %v11991_v43  ;;  %10030 = vmatprep.subr.mxu1 %v11842_v54 }
 0x15e   :  { %9990 = vmatprep.mubr.f32.mxu1 %v11982_v24  ;;  %10011 = vmatpush3.msra.mxu0 %v11991_v43 }
 0x15f   :  { %10012 = vmatprep.mubr.f32.mxu0 %v11740_v9  ;;  %10031 = vmatpush3.msra.mxu1 %v11842_v54 }
 0x160   :  { %9991 = vmatmul.mubr.f32.gmra.mxu1 %v11995_v51  ;;  %10013 = vmatmul.mubr.f32.vlgmr.msra.gmra.mxu0 %v11839_v52 }
 0x161   :  { %10032 = vmatprep.subr.mxu1 %v11851_v62  ;;  %9993 = vmatprep.mubr.f32.mxu1 %v12022_v29 }
 0x162   :  { %10033 = vmatpush3.msra.mxu1 %v11851_v62  ;;  %10015 = vmatprep.mubr.f32.mxu0 %v11860_v8 }
 0x163   :  { %10034 = vmatprep.subr.mxu1 %v11868_v13 }
 0x164   :  { %10035 = vmatpush3.msra.mxu1 %v11868_v13  ;;  %10016 = vmatmul.mubr.f32.gmra.mxu0 %v11876_v20 }
 0x165   :  { %9994 = vmatmul.mubr.f32.gmra.mxu1 %v12030_v23  ;;  %10036 = vmatprep.subr.mxu1 %v11892_v4 }
 0x166   :  { %10037 = vmatpush3.msra.mxu1 %v11892_v4  ;;  %10018 = vmatprep.mubr.f32.mxu0 %v11902_v21 }
 0x167   :  { %10038 = vmatprep.subr.mxu1 %v11917_v18  ;;  %10040 = vmatprep.mubr.f32.mxu1 %v11740_v9 }
 0x168   :  { %10039 = vmatpush3.msra.mxu1 %v11917_v18  ;;  %10019 = vmatmul.mubr.f32.gmra.mxu0 %v11924_v38 }
 0x169   :  { %10041 = vmatmul.mubr.f32.vlgmr.msra.gmra.mxu1 %v11839_v52  ;;  %10021 = vmatprep.mubr.f32.mxu0 %v11968_v57 }
 0x16a   :  { %10043 = vmatprep.mubr.f32.mxu1 %v11860_v8 }
 0x16c   :  { %10022 = vmatmul.mubr.f32.gmra.mxu0 %v11985_v40 }
 0x16d   :  { %10044 = vmatmul.mubr.f32.gmra.mxu1 %v11876_v20  ;;  %10068 = vmatprep.mubr.f32.mxu0 %v14090_v55 }
 0x16e   :  { %10046 = vmatprep.mubr.f32.mxu1 %v11902_v21 }
 0x171   :  { %10047 = vmatmul.mubr.f32.gmra.mxu1 %v11924_v38 }
 0x172   :  { %10049 = vmatprep.mubr.f32.mxu1 %v11968_v57 }
 0x175   :  { %10050 = vmatmul.mubr.f32.gmra.mxu1 %v11985_v40 }
 0x176   :  { %10096 = vmatprep.mubr.f32.mxu1 %v11740_v9 }
 0x1f2   :  { %v9902_v54 = vpop.f32.mrf.mxu0 }
 0x1f3   :  { %v1004_v10 = vadd.f32 %v9902_v54, %v11793_v45 }
 0x1f4   :  { %v993_v28 = vpop.f32.mrf.mxu0 }
 0x1f5   :  { %v994_v53 = vadd.f32 %v993_v28, %v11795_v56  ;;  %v14091_v28 = vld [vmem:[#allocation12_spill] sm:$0xff] }
 0x1f7   :  { %v9905_v62 = vpop.f32.mrf.mxu0 }
 0x1f8   :  { %v1024_v37 = vadd.f32 %v9905_v62, %v11799_v60 }
 0x1f9   :  { %v1013_v11 = vpop.f32.mrf.mxu0 }
 0x1fa   :  { %v1014_v16 = vadd.f32 %v1013_v11, %v11807_v2 }
 0x1fc   :  { %v9908_v13 = vpop.f32.mrf.mxu0  ;;  %v9930_v14 = vpop.f32.mrf.mxu1 }
 0x1fd   :  { %v1044_v26 = vadd.f32 %v9908_v13, %v11797_v49  ;;  %v1181_v22 = vadd.f32 %v9930_v14, %v1004_v10  ;;  %v14092_v14 = vld [vmem:[#allocation13_spill] sm:$0xff] }
 0x1fe   :  { %v1033_v30 = vpop.f32.mrf.mxu0  ;;  %v1174_v34 = vpop.f32.mrf.mxu1 }
 0x1ff   :  { %v1175_v40 = vadd.f32 %v1174_v34, %v994_v53  ;;  %v1034_v57 = vadd.f32 %v1033_v30, %v11801_v0 }
 0x202   :  { %v9911_v3 = vpop.f32.mrf.mxu0  ;;  %v9933_v4 = vpop.f32.mrf.mxu1 }
 0x203   :  { %v1193_v21 = vadd.f32 %v9933_v4, %v1024_v37  ;;  %v1064_v56 = vadd.f32 %v9911_v3, %v14091_v28 }
 0x204   :  { %v1053_v27 = vpop.f32.mrf.mxu0  ;;  %v1186_v31 = vpop.f32.mrf.mxu1 }
 0x205   :  { %v1054_v49 = vadd.f32 %v1053_v27, %v14092_v14  ;;  %v1187_v62 = vadd.f32 %v1186_v31, %v1014_v16 }
 0x208   :  { %v9936_v35 = vpop.f32.mrf.mxu1  ;;  %v9958_v18 = vpop.f32.mrf.mxu0 }
 0x209   :  { %v1205_v7 = vadd.f32 %v9936_v35, %v1044_v26  ;;  %v1312_v38 = vadd.f32 %v9958_v18, %v1181_v22 }
 0x20a   :  { %v1198_v48 = vpop.f32.mrf.mxu1  ;;  %v1304_v44 = vpop.f32.mrf.mxu0 }
 0x20b   :  { %v1305_v54 = vadd.f32 %v1304_v44, %v1175_v40  ;;  %v1199_v61 = vadd.f32 %v1198_v48, %v1034_v57 }
 0x20e   :  { %v9939_v50 = vpop.f32.mrf.mxu1  ;;  %v9961_v47 = vpop.f32.mrf.mxu0 }
 0x20f   :  { %v1326_v53 = vadd.f32 %v9961_v47, %v1193_v21  ;;  %v1217_v30 = vadd.f32 %v9939_v50, %v1064_v56 }
 0x210   :  { %v1210_v6 = vpop.f32.mrf.mxu1  ;;  %v1318_v43 = vpop.f32.mrf.mxu0 }
 0x211   :  { %v1211_v11 = vadd.f32 %v1210_v6, %v1054_v49  ;;  %v1319_v37 = vadd.f32 %v1318_v43, %v1187_v62 }
 0x214   :  { %v9964_v59 = vpop.f32.mrf.mxu0  ;;  %v9986_v1 = vpop.f32.mrf.mxu1 }
 0x215   :  { %v1340_v13 = vadd.f32 %v9964_v59, %v1205_v7  ;;  %v1443_v10 = vadd.f32 %v9986_v1, %v1312_v38 }
 0x216   :  { %v1332_v15 = vpop.f32.mrf.mxu0  ;;  %v1434_v36 = vpop.f32.mrf.mxu1 }
 0x217   :  { %v1435_v34 = vadd.f32 %v1434_v36, %v1305_v54  ;;  %v1333_v26 = vadd.f32 %v1332_v15, %v1199_v61 }
 0x21a   :  { %v9967_v12 = vpop.f32.mrf.mxu0  ;;  %v9989_v25 = vpop.f32.mrf.mxu1 }
 0x21b   :  { %v1459_v40 = vadd.f32 %v9989_v25, %v1326_v53  ;;  %v1354_v3 = vadd.f32 %v9967_v12, %v1217_v30 }
 0x21c   :  { %v1346_v19 = vpop.f32.mrf.mxu0  ;;  %v1450_v55 = vpop.f32.mrf.mxu1 }
 0x21d   :  { %v1347_v27 = vadd.f32 %v1346_v19, %v1211_v11  ;;  %v1451_v16 = vadd.f32 %v1450_v55, %v1319_v37 }
 0x220   :  { %v9992_v23 = vpop.f32.mrf.mxu1  ;;  %v10014_v29 = vpop.f32.mrf.mxu0 }
 0x221   :  { %v1475_v22 = vadd.f32 %v9992_v23, %v1340_v13  ;;  %v1592_v35 = vadd.f32 %v10014_v29, %v1443_v10 }
 0x222   :  { %v1466_v51 = vpop.f32.mrf.mxu1  ;;  %v1585_v9 = vpop.f32.mrf.mxu0 }
 0x223   :  { %v1586_v4 = vadd.f32 %v1585_v9, %v1435_v34  ;;  %v1467_v57 = vadd.f32 %v1466_v51, %v1333_v26  ;;  %v14093_v34 = vld [vmem:[#allocation14_spill] sm:$0xff] }
 0x224   :  { %v10017_v24 = vpop.f32.mrf.mxu0 }
 0x225   :  { %v9995_v46 = vpop.f32.mrf.mxu1  ;;  %v1604_v21 = vadd.f32 %v10017_v24, %v1459_v40 }
 0x226   :  { %v1597_v39 = vpop.f32.mrf.mxu0  ;;  %v1491_v61 = vadd.f32 %v9995_v46, %v1354_v3 }
 0x227   :  { %v1482_v5 = vpop.f32.mrf.mxu1  ;;  %v1598_v48 = vadd.f32 %v1597_v39, %v1451_v16 }
 0x228   :  { %v10020_v41 = vpop.f32.mrf.mxu0  ;;  %v1483_v49 = vadd.f32 %v1482_v5, %v1347_v27 }
 0x229   :  { %v10042_v17 = vpop.f32.mrf.mxu1  ;;  %v1616_v7 = vadd.f32 %v10020_v41, %v1475_v22 }
 0x22a   :  { %v1609_v45 = vpop.f32.mrf.mxu0  ;;  %v12156_v38 = vadd.f32 %v10042_v17, %v1592_v35 }
 0x22b   :  { %v1706_v20 = vpop.f32.mrf.mxu1  ;;  %v1610_v23 = vadd.f32 %v1609_v45, %v1467_v57 }
 0x22c   :  { %v10023_v18 = vpop.f32.mrf.mxu0  ;;  %v12158_v31 = vadd.f32 %v1706_v20, %v1586_v4  ;;  %v1753_v51 = vmul.f32 %v12156_v38, %v12156_v38 }
 0x22d   :  { %v10045_v60 = vpop.f32.mrf.mxu1  ;;  %v1628_v41 = vadd.f32 %v10023_v18, %v1491_v61 }
 0x22e   :  { %v1725_v50 = vadd.f32 %v10045_v60, %v1604_v21  ;;  %v1621_v9 = vpop.f32.mrf.mxu0  ;;  %v1752_v24 = vmul.f32 %v12158_v31, %v12158_v31 }
 0x22f   :  { %v1718_v44 = vpop.f32.mrf.mxu1  ;;  %v1622_v43 = vadd.f32 %v1621_v9, %v1483_v49 }
 0x230   :  { %v1719_v20 = vadd.f32 %v1718_v44, %v1598_v48  ;;  %v1755_v5 = vmul.f32 %v1725_v50, %v1725_v50 }
 0x231   :  { %v10048_v56 = vpop.f32.mrf.mxu1 }
 0x232   :  { %v1737_v29 = vadd.f32 %v10048_v56, %v1616_v7  ;;  %v1754_v12 = vmul.f32 %v1719_v20, %v1719_v20 }
 0x233   :  { %v1730_v47 = vpop.f32.mrf.mxu1 }
 0x234   :  { %v1757_v17 = vmul.f32 %v1737_v29, %v1737_v29  ;;  %v1731_v6 = vadd.f32 %v1730_v47, %v1610_v23 }
 0x235   :  { %v10051_v55 = vpop.f32.mrf.mxu1 }
 0x236   :  { %v1761_v46 = vadd.f32 %v1757_v17, %v1753_v51  ;;  %v1756_v45 = vmul.f32 %v1731_v6, %v1731_v6  ;;  %v1749_v59 = vadd.f32 %v10051_v55, %v1628_v41 }
 0x237   :  { %v1742_v39 = vpop.f32.mrf.mxu1 }
 0x238   :  { %v1765_v60 = vadd.f32 1e-30, %v1761_v46  ;;  %v1760_v1 = vadd.f32 %v1756_v45, %v1752_v24  ;;  %v1759_v15 = vmul.f32 %v1749_v59, %v1749_v59  ;;  %v1743_v36 = vadd.f32 %v1742_v39, %v1622_v43 }
 0x23a   :  { %11404 = vrsqrt.f32 %v1765_v60  ;;  %v1764_v25 = vadd.f32 1e-30, %v1760_v1  ;;  %v1763_v19 = vadd.f32 %v1759_v15, %v1755_v5  ;;  %v1758_v54 = vmul.f32 %v1743_v36, %v1743_v36 }
 0x23c   :  { %11406 = vrsqrt.f32 %v1764_v25  ;;  %v1767_v13 = vadd.f32 1e-30, %v1763_v19  ;;  %v1762_v10 = vadd.f32 %v1758_v54, %v1754_v12 }
 0x23e   :  { %11408 = vrsqrt.f32 %v1767_v13  ;;  %v1766_v62 = vadd.f32 1e-30, %v1762_v10 }
 0x240   :  { %11410 = vrsqrt.f32 %v1766_v62 }
 0x247   :  { %v11405_v53 = vpop.eup %11404 }
 0x248   :  { %v1773_v30 = vmul.f32 %v11405_v53, %v14093_v34 }
 0x249   :  { %v11407_v26 = vpop.eup %11406 }
 0x24a   :  { %v1777_v22 = vsub.f32 1.0, %v1773_v30  ;;  %v1772_v35 = vmul.f32 %v11407_v26, %v14093_v34 }
 0x24b   :  { %v11409_v11 = vpop.eup %11408 }
 0x24c   :  { %v1781_v37 = vmax.f32 %v1777_v22, 0.0  ;;  %v1776_v40 = vsub.f32 1.0, %v1772_v35  ;;  %v1775_v4 = vmul.f32 %v11409_v11, %v14093_v34 }
 0x24d   :  { %v11411_v18 = vpop.eup %11410 }
 0x24e   :  { %v1789_v44 = vmul.f32 %v1781_v37, %v1737_v29  ;;  %v1780_v3 = vmax.f32 %v1776_v40, 0.0  ;;  %v1779_v57 = vsub.f32 1.0, %v1775_v4  ;;  %v1774_v7 = vmul.f32 %v11411_v18, %v14093_v34  ;;  %v14094_v4 = vld [vmem:[#allocation29_spill] sm:$0xff] }
 0x24f   :  { %v1785_v17 = vmul.f32 %v1781_v37, %v12156_v38 }
 0x250   :  { %v12168_v27 = vand.u32 4294901760, %v1789_v44  ;;  %v1788_v16 = vmul.f32 %v1780_v3, %v1731_v6  ;;  %v1783_v21 = vmax.f32 %v1779_v57, 0.0  ;;  %v1778_v56 = vsub.f32 1.0, %v1774_v7  ;;  %v14095_v7 = vld [vmem:[#allocation38_spill] sm:$0xff] }
 0x251   :  { %v1784_v43 = vmul.f32 %v1780_v3, %v12158_v31 }
 0x252   :  { %v12170_v61 = vand.u32 4294901760, %v1788_v16  ;;  %v1787_v23 = vmul.f32 %v1783_v21, %v1725_v50  ;;  %v1791_v49 = vmul.f32 %v1783_v21, %v1749_v59  ;;  %v1782_v48 = vmax.f32 %v1778_v56, 0.0  ;;  %v14097_v21 = vld [vmem:[#allocation21_spill] sm:$0xff] }
 0x253   :  { %v12173_v9 = vsub.f32 %v1789_v44, %v12168_v27  ;;  %v12201_v59 = vand.u32 4294901760, %v1785_v17  ;;  %v12214_v1 = vand.u32 4294901760, %v1784_v43  ;;  %v14098_v56 = vld [vmem:[#allocation5_spill] sm:$0xff] }
 0x254   :  { %v12175_v47 = vand.u32 4294901760, %v1791_v49  ;;  %v12177_v29 = vand.u32 4294901760, %v1787_v23  ;;  %v1786_v51 = vmul.f32 %v1782_v48, %v1719_v20  ;;  %v1790_v41 = vmul.f32 %v1782_v48, %v1743_v36  ;;  %v14101_v48 = vld [vmem:[#allocation28_spill] sm:$0xff] }
 0x255   :  { %v12181_v6 = vsub.f32 %v1788_v16, %v12170_v61  ;;  %v12199_v45 = vand.u32 4294901760, %v12173_v9  ;;  %v12225_v19 = vsub.f32 %v1785_v17, %v12201_v59  ;;  %v12235_v62 = vsub.f32 %v1784_v43, %v12214_v1  ;;  %v14096_v16 = vld [vmem:[#allocation18_spill] sm:$0xff]  ;;  %v14105_v17 = vld [vmem:[#allocation25_spill] sm:$0xff]  ;;  %v14108_v43 = vld [vmem:[#allocation19_spill] sm:$0xff] }
 0x256   :  { %v1963_v24 = vsub.f32 %v1791_v49, %v12175_v47  ;;  %v12184_v55 = vand.u32 4294901760, %v1790_v41  ;;  %v12186_v50 = vand.u32 4294901760, %v1786_v51  ;;  %10052 = vmatprep.subr.mxu0 %v12175_v47  ;;  %v12192_v20 = vsub.f32 %v1787_v23, %v12177_v29  ;;  %v14099_v23 = vld [vmem:[#allocation23_spill] sm:$0xff]  ;;  %v14100_v49 = vld [vmem:[#allocation16_spill] sm:$0xff] }
 0x257   :  { %10053 = vmatpush3.msra.mxu0 %v12175_v47  ;;  %v12212_v60 = vand.u32 4294901760, %v12181_v6  ;;  %v1979_v12 = vsub.f32 %v12173_v9, %v12199_v45  ;;  %v12243_v26 = vand.u32 4294901760, %v12225_v19  ;;  %v12250_v11 = vand.u32 4294901760, %v12235_v62 }
 0x258   :  { %v1970_v38 = vsub.f32 %v1790_v41, %v12184_v55  ;;  %10054 = vmatprep.subr.mxu0 %v12184_v55  ;;  %v12196_v46 = vand.u32 4294901760, %v1963_v24  ;;  %v12205_v31 = vsub.f32 %v1786_v51, %v12186_v50  ;;  %v12222_v25 = vand.u32 4294901760, %v12192_v20  ;;  %v14103_v51 = vld [vmem:[#allocation31_spill] sm:$0xff]  ;;  %v14104_v41 = vld [vmem:[#allocation22_spill] sm:$0xff] }
 0x259   :  { %10055 = vmatpush3.msra.mxu0 %v12184_v55  ;;  %v1986_v13 = vsub.f32 %v12181_v6, %v12212_v60  ;;  %v1980_v53 = vand.u32 4294901760, %v1979_v12  ;;  %v2007_v40 = vsub.f32 %v12225_v19, %v12243_v26  ;;  %v2014_v44 = vsub.f32 %v12235_v62, %v12250_v11 }
 0x25a   :  { %10056 = vmatprep.subr.mxu0 %v12168_v27  ;;  %v1965_v5 = vsub.f32 %v1963_v24, %v12196_v46  ;;  %v12209_v39 = vand.u32 4294901760, %v1970_v38  ;;  %v12232_v10 = vand.u32 4294901760, %v12205_v31  ;;  %v1993_v30 = vsub.f32 %v12192_v20, %v12222_v25 }
 0x25b   :  { %10057 = vmatpush3.msra.mxu0 %v12168_v27  ;;  %v1987_v22 = vand.u32 4294901760, %v1986_v13  ;;  %v2008_v3 = vand.u32 4294901760, %v2007_v40  ;;  %v2015_v57 = vand.u32 4294901760, %v2014_v44 }
 0x25c   :  { %10058 = vmatprep.subr.mxu0 %v12170_v61  ;;  %v1966_v15 = vand.u32 4294901760, %v1965_v5  ;;  %v1972_v36 = vsub.f32 %v1970_v38, %v12209_v39  ;;  %v2000_v35 = vsub.f32 %v12205_v31, %v12232_v10  ;;  %v1994_v37 = vand.u32 4294901760, %v1993_v30  ;;  %v14116_v5 = vld [vmem:[#allocation35_spill] sm:$0xff] }
 0x25d   :  { %10059 = vmatpush3.msra.mxu0 %v12170_v61 }
 0x25e   :  { %10060 = vmatprep.subr.mxu0 %v12177_v29  ;;  %10080 = vmatprep.subr.mxu1 %v1966_v15  ;;  %v1973_v54 = vand.u32 4294901760, %v1972_v36  ;;  %v2001_v18 = vand.u32 4294901760, %v2000_v35 }
 0x25f   :  { %10061 = vmatpush3.msra.mxu0 %v12177_v29  ;;  %10081 = vmatpush3.msra.mxu1 %v1966_v15 }
 0x260   :  { %10062 = vmatprep.subr.mxu0 %v12186_v50  ;;  %10082 = vmatprep.subr.mxu1 %v1973_v54 }
 0x261   :  { %10063 = vmatpush3.msra.mxu0 %v12186_v50  ;;  %10083 = vmatpush3.msra.mxu1 %v1973_v54 }
 0x262   :  { %10064 = vmatprep.subr.mxu0 %v12201_v59  ;;  %10084 = vmatprep.subr.mxu1 %v1980_v53 }
 0x263   :  { %10065 = vmatpush3.msra.mxu0 %v12201_v59  ;;  %10085 = vmatpush3.msra.mxu1 %v1980_v53 }
 0x264   :  { %10066 = vmatprep.subr.mxu0 %v12214_v1  ;;  %10086 = vmatprep.subr.mxu1 %v1987_v22 }
 0x265   :  { %10067 = vmatpush3.msra.mxu0 %v12214_v1  ;;  %10087 = vmatpush3.msra.mxu1 %v1987_v22 }
 0x266   :  { %10069 = vmatmul.mubr.f32.vlgmr.msra.gmra.mxu0 %v14094_v4  ;;  %10088 = vmatprep.subr.mxu1 %v1994_v37 }
 0x267   :  { %10108 = vmatprep.subr.mxu0 %v1963_v24  ;;  %10089 = vmatpush3.msra.mxu1 %v1994_v37 }
 0x268   :  { %10109 = vmatpush3.msra.mxu0 %v1963_v24  ;;  %10090 = vmatprep.subr.mxu1 %v2001_v18  ;;  %v14107_v24 = vld [vmem:[#allocation27_spill] sm:$0xff] }
 0x269   :  { %10110 = vmatprep.subr.mxu0 %v1970_v38  ;;  %10071 = vmatprep.mubr.f32.mxu0 %v12002_v58 }
 0x26a   :  { %10091 = vmatpush3.msra.mxu1 %v2001_v18  ;;  %10111 = vmatpush3.msra.mxu0 %v1970_v38  ;;  %v14110_v38 = vld [vmem:[#allocation24_spill] sm:$0xff] }
 0x26b   :  { %10072 = vmatmul.mubr.f32.gmra.mxu0 %v12014_v32  ;;  %10092 = vmatprep.subr.mxu1 %v2008_v3 }
 0x26c   :  { %10112 = vmatprep.subr.mxu0 %v12173_v9  ;;  %10093 = vmatpush3.msra.mxu1 %v2008_v3 }
 0x26d   :  { %10113 = vmatpush3.msra.mxu0 %v12173_v9  ;;  %10094 = vmatprep.subr.mxu1 %v2015_v57  ;;  %v14102_v9 = vld [vmem:[#allocation20_spill] sm:$0xff] }
 0x26e   :  { %10114 = vmatprep.subr.mxu0 %v12181_v6  ;;  %10074 = vmatprep.mubr.f32.mxu0 %v12027_v42 }
 0x26f   :  { %10095 = vmatpush3.msra.mxu1 %v2015_v57  ;;  %10115 = vmatpush3.msra.mxu0 %v12181_v6  ;;  %v14106_v6 = vld [vmem:[#allocation6_spill] sm:$0xff] }
 0x270   :  { %10075 = vmatmul.mubr.f32.gmra.mxu0 %v12034_v63  ;;  %10097 = vmatmul.mubr.f32.vlgmr.msra.gmra.mxu1 %v11839_v52 }
 0x271   :  { %10116 = vmatprep.subr.mxu0 %v12192_v20  ;;  %10136 = vmatprep.subr.mxu1 %v12175_v47 }
 0x272   :  { %10117 = vmatpush3.msra.mxu0 %v12192_v20  ;;  %10137 = vmatpush3.msra.mxu1 %v12175_v47  ;;  %v14109_v20 = vld [vmem:[#allocation33_spill] sm:$0xff] }
 0x273   :  { %10118 = vmatprep.subr.mxu0 %v12205_v31  ;;  %10138 = vmatprep.subr.mxu1 %v12184_v55 }
 0x274   :  { %10077 = vmatprep.mubr.f32.mxu0 %v12046_v33  ;;  %10099 = vmatprep.mubr.f32.mxu1 %v11860_v8 }
 0x275   :  { %10119 = vmatpush3.msra.mxu0 %v12205_v31  ;;  %10139 = vmatpush3.msra.mxu1 %v12184_v55  ;;  %v14115_v31 = vld [vmem:[#allocation32_spill] sm:$0xff] }
 0x276   :  { %10078 = vmatmul.mubr.f32.gmra.mxu0 %v14095_v7  ;;  %10100 = vmatmul.mubr.f32.gmra.mxu1 %v14096_v16 }
 0x277   :  { %10120 = vmatprep.subr.mxu0 %v12225_v19  ;;  %10140 = vmatprep.subr.mxu1 %v12168_v27 }
 0x278   :  { %10121 = vmatpush3.msra.mxu0 %v12225_v19  ;;  %10141 = vmatpush3.msra.mxu1 %v12168_v27 }
 0x279   :  { %10122 = vmatprep.subr.mxu0 %v12235_v62  ;;  %10142 = vmatprep.subr.mxu1 %v12170_v61 }
 0x27a   :  { %10102 = vmatprep.mubr.f32.mxu1 %v14097_v21  ;;  %10123 = vmatpush3.msra.mxu0 %v12235_v62 }
 0x27b   :  { %10124 = vmatprep.mubr.f32.mxu0 %v14098_v56  ;;  %10143 = vmatpush3.msra.mxu1 %v12170_v61 }
 0x27c   :  { %10103 = vmatmul.mubr.f32.gmra.mxu1 %v14099_v23  ;;  %10125 = vmatmul.mubr.f32.vlgmr.msra.gmra.mxu0 %v14100_v49 }
 0x27d   :  { %10144 = vmatprep.subr.mxu1 %v12177_v29  ;;  %10164 = vmatprep.subr.mxu0 %v12196_v46 }
 0x27e   :  { %10145 = vmatpush3.msra.mxu1 %v12177_v29  ;;  %10165 = vmatpush3.msra.mxu0 %v12196_v46  ;;  %v14111_v46 = vld [vmem:[#allocation34_spill] sm:$0xff] }
 0x27f   :  { %10146 = vmatprep.subr.mxu1 %v12186_v50  ;;  %10166 = vmatprep.subr.mxu0 %v12209_v39 }
 0x280   :  { %10105 = vmatprep.mubr.f32.mxu1 %v14101_v48  ;;  %10127 = vmatprep.mubr.f32.mxu0 %v14102_v9 }
 0x281   :  { %10147 = vmatpush3.msra.mxu1 %v12186_v50  ;;  %10167 = vmatpush3.msra.mxu0 %v12209_v39 }
 0x282   :  { %10106 = vmatmul.mubr.f32.gmra.mxu1 %v14103_v51  ;;  %10128 = vmatmul.mubr.f32.gmra.mxu0 %v14104_v41 }
 0x283   :  { %10148 = vmatprep.subr.mxu1 %v12201_v59  ;;  %10168 = vmatprep.subr.mxu0 %v12199_v45 }
 0x284   :  { %10149 = vmatpush3.msra.mxu1 %v12201_v59  ;;  %10169 = vmatpush3.msra.mxu0 %v12199_v45  ;;  %v14112_v45 = vld [vmem:[#allocation26_spill] sm:$0xff] }
 0x285   :  { %10150 = vmatprep.subr.mxu1 %v12214_v1  ;;  %10170 = vmatprep.subr.mxu0 %v12212_v60 }
 0x286   :  { %10130 = vmatprep.mubr.f32.mxu0 %v14105_v17  ;;  %10151 = vmatpush3.msra.mxu1 %v12214_v1  ;;  %v14121_v17 = vld [vmem:[#allocation10_spill] sm:$0xff] }
 0x287   :  { %10152 = vmatprep.mubr.f32.mxu1 %v14106_v6  ;;  %10171 = vmatpush3.msra.mxu0 %v12212_v60 }
 0x288   :  { %10131 = vmatmul.mubr.f32.gmra.mxu0 %v14107_v24  ;;  %10153 = vmatmul.mubr.f32.vlgmr.msra.gmra.mxu1 %v14108_v43  ;;  %v14120_v43 = vld [vmem:[#allocation9_spill] sm:$0xff] }
 0x289   :  { %10172 = vmatprep.subr.mxu0 %v12222_v25  ;;  %10192 = vmatprep.subr.mxu1 %v12175_v47 }
 0x28a   :  { %10173 = vmatpush3.msra.mxu0 %v12222_v25  ;;  %10193 = vmatpush3.msra.mxu1 %v12175_v47  ;;  %v14113_v47 = vld [vmem:[#allocation30_spill] sm:$0xff] }
 0x28b   :  { %10174 = vmatprep.subr.mxu0 %v12232_v10  ;;  %10194 = vmatprep.subr.mxu1 %v12184_v55 }
 0x28c   :  { %10133 = vmatprep.mubr.f32.mxu0 %v14109_v20  ;;  %10155 = vmatprep.mubr.f32.mxu1 %v14110_v38 }
 0x28d   :  { %10175 = vmatpush3.msra.mxu0 %v12232_v10  ;;  %10195 = vmatpush3.msra.mxu1 %v12184_v55  ;;  %v14114_v55 = vld [vmem:[#allocation4_spill] sm:$0xff] }
 0x28e   :  { %10134 = vmatmul.mubr.f32.gmra.mxu0 %v14111_v46  ;;  %10156 = vmatmul.mubr.f32.gmra.mxu1 %v14112_v45  ;;  %v14119_v46 = vld [vmem:[#allocation8_spill] sm:$0xff] }
 0x28f   :  { %10176 = vmatprep.subr.mxu0 %v12243_v26  ;;  %10196 = vmatprep.subr.mxu1 %v12168_v27 }
 0x290   :  { %10177 = vmatpush3.msra.mxu0 %v12243_v26  ;;  %10197 = vmatpush3.msra.mxu1 %v12168_v27  ;;  %v14117_v27 = vld [vmem:[#allocation36_spill] sm:$0xff] }
 0x291   :  { %10178 = vmatprep.subr.mxu0 %v12250_v11  ;;  %10198 = vmatprep.subr.mxu1 %v12170_v61 }
 0x292   :  { %10158 = vmatprep.mubr.f32.mxu1 %v14113_v47  ;;  %10179 = vmatpush3.msra.mxu0 %v12250_v11 }
 0x293   :  { %10180 = vmatprep.mubr.f32.mxu0 %v14114_v55  ;;  %10199 = vmatpush3.msra.mxu1 %v12170_v61  ;;  %v14118_v61 = vld [vmem:[#allocation7_spill] sm:$0xff] }
 0x294   :  { %10159 = vmatmul.mubr.f32.gmra.mxu1 %v14115_v31  ;;  %10181 = vmatmul.mubr.f32.vlgmr.msra.gmra.mxu0 %v11839_v52 }
 0x295   :  { %10200 = vmatprep.subr.mxu1 %v12177_v29  ;;  %10161 = vmatprep.mubr.f32.mxu1 %v14116_v5 }
 0x296   :  { %10201 = vmatpush3.msra.mxu1 %v12177_v29  ;;  %10183 = vmatprep.mubr.f32.mxu0 %v11860_v8 }
 0x297   :  { %10202 = vmatprep.subr.mxu1 %v12186_v50 }
 0x298   :  { %10203 = vmatpush3.msra.mxu1 %v12186_v50  ;;  %10184 = vmatmul.mubr.f32.gmra.mxu0 %v14096_v16 }
 0x299   :  { %10162 = vmatmul.mubr.f32.gmra.mxu1 %v14117_v27  ;;  %10204 = vmatprep.subr.mxu1 %v12201_v59 }
 0x29a   :  { %10205 = vmatpush3.msra.mxu1 %v12201_v59  ;;  %10186 = vmatprep.mubr.f32.mxu0 %v14097_v21 }
 0x29b   :  { %10206 = vmatprep.subr.mxu1 %v12214_v1  ;;  %10208 = vmatprep.mubr.f32.mxu1 %v14114_v55 }
 0x29c   :  { %10207 = vmatpush3.msra.mxu1 %v12214_v1  ;;  %10187 = vmatmul.mubr.f32.gmra.mxu0 %v14099_v23 }
 0x29d   :  { %10209 = vmatmul.mubr.f32.vlgmr.msra.gmra.mxu1 %v11839_v52  ;;  %10189 = vmatprep.mubr.f32.mxu0 %v14101_v48 }
 0x29e   :  { %10211 = vmatprep.mubr.f32.mxu1 %v11860_v8 }
 0x2a0   :  { %10190 = vmatmul.mubr.f32.gmra.mxu0 %v14103_v51 }
 0x2a1   :  { %10212 = vmatmul.mubr.f32.gmra.mxu1 %v14096_v16  ;;  %10236 = vmatprep.mubr.f32.mxu0 %v14118_v61 }
 0x2a2   :  { %10214 = vmatprep.mubr.f32.mxu1 %v14097_v21 }
 0x2a5   :  { %10215 = vmatmul.mubr.f32.gmra.mxu1 %v14099_v23 }
 0x2a6   :  { %10217 = vmatprep.mubr.f32.mxu1 %v14101_v48  ;;  %v14122_v48 = vld [vmem:[#allocation11_spill] sm:$0xff] }
 0x2a9   :  { %10218 = vmatmul.mubr.f32.gmra.mxu1 %v14103_v51 }
 0x2aa   :  { %10264 = vmatprep.mubr.f32.mxu1 %v14114_v55 }
 0x326   :  { %v10070_v29 = vpop.f32.mrf.mxu0 }
 0x327   :  { %v1882_v38 = vadd.f32 %v10070_v29, %v14119_v46 }
 0x328   :  { %v1871_v50 = vpop.f32.mrf.mxu0 }
 0x329   :  { %v1872_v24 = vadd.f32 %v1871_v50, %v14120_v43 }
 0x32b   :  { %v10073_v59 = vpop.f32.mrf.mxu0 }
 0x32c   :  { %v1902_v49 = vadd.f32 %v10073_v59, %v14122_v48 }
 0x32d   :  { %v1891_v39 = vpop.f32.mrf.mxu0 }
 0x32e   :  { %v1892_v8 = vadd.f32 %v1891_v39, %v11807_v2 }
 0x330   :  { %v10076_v60 = vpop.f32.mrf.mxu0  ;;  %v10098_v1 = vpop.f32.mrf.mxu1 }
 0x331   :  { %v1922_v41 = vadd.f32 %v10076_v60, %v14121_v17  ;;  %v2059_v51 = vadd.f32 %v10098_v1, %v1882_v38 }
 0x332   :  { %v1911_v15 = vpop.f32.mrf.mxu0  ;;  %v2052_v36 = vpop.f32.mrf.mxu1 }
 0x333   :  { %v2053_v23 = vadd.f32 %v2052_v36, %v1872_v24  ;;  %v1912_v21 = vadd.f32 %v1911_v15, %v11801_v0 }
 0x336   :  { %v10079_v12 = vpop.f32.mrf.mxu0  ;;  %v10101_v25 = vpop.f32.mrf.mxu1 }
 0x337   :  { %v2071_v33 = vadd.f32 %v10101_v25, %v1902_v49  ;;  %v1942_v50 = vadd.f32 %v10079_v12, %v14091_v28 }
 0x338   :  { %v1931_v19 = vpop.f32.mrf.mxu0  ;;  %v2064_v54 = vpop.f32.mrf.mxu1 }
 0x339   :  { %v1932_v1 = vadd.f32 %v1931_v19, %v14092_v14  ;;  %v2065_v59 = vadd.f32 %v2064_v54, %v1892_v8 }
 0x33c   :  { %v10104_v13 = vpop.f32.mrf.mxu1  ;;  %v10126_v10 = vpop.f32.mrf.mxu0 }
 0x33d   :  { %v2083_v16 = vadd.f32 %v10104_v13, %v1922_v41  ;;  %v2190_v7 = vadd.f32 %v10126_v10, %v2059_v51 }
 0x33e   :  { %v2076_v62 = vpop.f32.mrf.mxu1  ;;  %v2182_v53 = vpop.f32.mrf.mxu0 }
 0x33f   :  { %v2183_v29 = vadd.f32 %v2182_v53, %v2053_v23  ;;  %v2077_v43 = vadd.f32 %v2076_v62, %v1912_v21 }
 0x342   :  { %v10107_v30 = vpop.f32.mrf.mxu1  ;;  %v10129_v26 = vpop.f32.mrf.mxu0 }
 0x343   :  { %v2204_v24 = vadd.f32 %v10129_v26, %v2071_v33  ;;  %v2095_v15 = vadd.f32 %v10107_v30, %v1942_v50 }
 0x344   :  { %v2088_v22 = vpop.f32.mrf.mxu1  ;;  %v2196_v35 = vpop.f32.mrf.mxu0 }
 0x345   :  { %v2089_v39 = vadd.f32 %v2088_v22, %v1932_v1  ;;  %v2197_v49 = vadd.f32 %v2196_v35, %v2065_v59 }
 0x348   :  { %v10132_v11 = vpop.f32.mrf.mxu0  ;;  %v10154_v37 = vpop.f32.mrf.mxu1 }
 0x349   :  { %v2218_v60 = vadd.f32 %v10132_v11, %v2083_v16  ;;  %v2321_v38 = vadd.f32 %v10154_v37, %v2190_v7 }
 0x34a   :  { %v2210_v40 = vpop.f32.mrf.mxu0  ;;  %v2312_v18 = vpop.f32.mrf.mxu1 }
 0x34b   :  { %v2313_v36 = vadd.f32 %v2312_v18, %v2183_v29  ;;  %v2211_v41 = vadd.f32 %v2210_v40, %v2077_v43 }
 0x34e   :  { %v10135_v44 = vpop.f32.mrf.mxu0  ;;  %v10157_v3 = vpop.f32.mrf.mxu1 }
 0x34f   :  { %v2337_v23 = vadd.f32 %v10157_v3, %v2204_v24  ;;  %v2232_v12 = vadd.f32 %v10135_v44, %v2095_v15 }
 0x350   :  { %v2224_v57 = vpop.f32.mrf.mxu0  ;;  %v2328_v61 = vpop.f32.mrf.mxu1 }
 0x351   :  { %v2225_v19 = vadd.f32 %v2224_v57, %v2089_v39  ;;  %v2329_v8 = vadd.f32 %v2328_v61, %v2197_v49 }
 0x354   :  { %v10160_v27 = vpop.f32.mrf.mxu1  ;;  %v10182_v5 = vpop.f32.mrf.mxu0 }
 0x355   :  { %v2353_v51 = vadd.f32 %v10160_v27, %v2218_v60  ;;  %v2470_v13 = vadd.f32 %v10182_v5, %v2321_v38 }
 0x356   :  { %v2344_v31 = vpop.f32.mrf.mxu1  ;;  %v2463_v55 = vpop.f32.mrf.mxu0 }
 0x357   :  { %v2464_v25 = vadd.f32 %v2463_v55, %v2313_v36  ;;  %v2345_v21 = vadd.f32 %v2344_v31, %v2211_v41 }
 0x358   :  { %v10185_v47 = vpop.f32.mrf.mxu0 }
 0x359   :  { %v10163_v45 = vpop.f32.mrf.mxu1  ;;  %v2482_v33 = vadd.f32 %v10185_v47, %v2337_v23 }
 0x35a   :  { %v2475_v20 = vpop.f32.mrf.mxu0  ;;  %v2369_v43 = vadd.f32 %v10163_v45, %v2232_v12 }
 0x35b   :  { %v2360_v6 = vpop.f32.mrf.mxu1  ;;  %v2476_v26 = vadd.f32 %v2475_v20, %v2329_v8 }
 0x35c   :  { %v10188_v9 = vpop.f32.mrf.mxu0  ;;  %v2361_v30 = vadd.f32 %v2360_v6, %v2225_v19 }
 0x35d   :  { %v10210_v56 = vpop.f32.mrf.mxu1  ;;  %v2494_v16 = vadd.f32 %v10188_v9, %v2353_v51 }
 0x35e   :  { %v2487_v46 = vpop.f32.mrf.mxu0  ;;  %v12374_v7 = vadd.f32 %v10210_v56, %v2470_v13 }
 0x35f   :  { %v2584_v52 = vpop.f32.mrf.mxu1  ;;  %v2488_v27 = vadd.f32 %v2487_v46, %v2345_v21 }
 0x360   :  { %v10191_v10 = vpop.f32.mrf.mxu0  ;;  %v12376_v54 = vadd.f32 %v2584_v52, %v2464_v25  ;;  %v2631_v31 = vmul.f32 %v12374_v7, %v12374_v7 }
 0x361   :  { %v10213_v48 = vpop.f32.mrf.mxu1  ;;  %v2506_v9 = vadd.f32 %v10191_v10, %v2369_v43 }
 0x362   :  { %v2603_v22 = vadd.f32 %v10213_v48, %v2482_v33  ;;  %v2499_v55 = vpop.f32.mrf.mxu0  ;;  %v2630_v47 = vmul.f32 %v12376_v54, %v12376_v54 }
 0x363   :  { %v2596_v53 = vpop.f32.mrf.mxu1  ;;  %v2500_v37 = vadd.f32 %v2499_v55, %v2361_v30 }
 0x364   :  { %v2597_v52 = vadd.f32 %v2596_v53, %v2476_v26  ;;  %v2633_v6 = vmul.f32 %v2603_v22, %v2603_v22 }
 0x365   :  { %v10216_v62 = vpop.f32.mrf.mxu1 }
 0x366   :  { %v2615_v5 = vadd.f32 %v10216_v62, %v2494_v16  ;;  %v2632_v57 = vmul.f32 %v2597_v52, %v2597_v52 }
 0x367   :  { %v2608_v35 = vpop.f32.mrf.mxu1 }
 0x368   :  { %v2635_v56 = vmul.f32 %v2615_v5, %v2615_v5  ;;  %v2609_v11 = vadd.f32 %v2608_v35, %v2488_v27 }
 0x369   :  { %v10219_v61 = vpop.f32.mrf.mxu1 }
 0x36a   :  { %v2639_v45 = vadd.f32 %v2635_v56, %v2631_v31  ;;  %v2634_v46 = vmul.f32 %v2609_v11, %v2609_v11  ;;  %v2627_v40 = vadd.f32 %v10219_v61, %v2506_v9 }
 0x36b   :  { %v2620_v20 = vpop.f32.mrf.mxu1 }
 0x36c   :  { %v2643_v48 = vadd.f32 1e-30, %v2639_v45  ;;  %v2638_v18 = vadd.f32 %v2634_v46, %v2630_v47  ;;  %v2637_v44 = vmul.f32 %v2627_v40, %v2627_v40  ;;  %v2621_v3 = vadd.f32 %v2620_v20, %v2500_v37 }
 0x36e   :  { %11412 = vrsqrt.f32 %v2643_v48  ;;  %v2642_v29 = vadd.f32 1e-30, %v2638_v18  ;;  %v2641_v50 = vadd.f32 %v2637_v44, %v2633_v6  ;;  %v2636_v60 = vmul.f32 %v2621_v3, %v2621_v3 }
 0x370   :  { %11414 = vrsqrt.f32 %v2642_v29  ;;  %v2645_v38 = vadd.f32 1e-30, %v2641_v50  ;;  %v2640_v1 = vadd.f32 %v2636_v60, %v2632_v57 }
 0x372   :  { %11416 = vrsqrt.f32 %v2645_v38  ;;  %v2644_v59 = vadd.f32 1e-30, %v2640_v1 }
 0x374   :  { %11418 = vrsqrt.f32 %v2644_v59 }
 0x37b   :  { %v11413_v24 = vpop.eup %11412 }
 0x37c   :  { %v2651_v36 = vmul.f32 %v11413_v24, %v14093_v34 }
 0x37d   :  { %v11415_v15 = vpop.eup %11414 }
 0x37e   :  { %v2655_v41 = vsub.f32 1.0, %v2651_v36  ;;  %v2650_v51 = vmul.f32 %v11415_v15, %v14093_v34 }
 0x37f   :  { %v11417_v13 = vpop.eup %11416 }
 0x380   :  { %v2659_v39 = vmax.f32 %v2655_v41, 0.0  ;;  %v2654_v49 = vsub.f32 1.0, %v2650_v51  ;;  %v2653_v23 = vmul.f32 %v11417_v13, %v14093_v34 }
 0x381   :  { %v11419_v25 = vpop.eup %11418 }
 0x382   :  { %v2667_v10 = vmul.f32 %v2659_v39, %v2615_v5  ;;  %v2658_v53 = vmax.f32 %v2654_v49, 0.0  ;;  %v2657_v12 = vsub.f32 1.0, %v2653_v23  ;;  %v2652_v21 = vmul.f32 %v11419_v25, %v14093_v34 }
 0x383   :  { %v2663_v9 = vmul.f32 %v2659_v39, %v12374_v7 }
 0x384   :  { %v12386_v16 = vand.u32 4294901760, %v2667_v10  ;;  %v2666_v19 = vmul.f32 %v2658_v53, %v2609_v11  ;;  %v2661_v8 = vmax.f32 %v2657_v12, 0.0  ;;  %v2656_v33 = vsub.f32 1.0, %v2652_v21  ;;  %v14124_v12 = vld [vmem:[#allocation37_spill] sm:$0xff] }
 0x385   :  { %v2662_v61 = vmul.f32 %v2658_v53, %v12376_v54  ;;  %v12419_v46 = vand.u32 4294901760, %v2663_v9  ;;  %v14123_v53 = vld [vmem:[#allocation15_spill] sm:$0xff]  ;;  %v14125_v21 = vld [vmem:[#allocation17_spill] sm:$0xff] }
 0x386   :  { %v12388_v62 = vand.u32 4294901760, %v2666_v19  ;;  %v2665_v43 = vmul.f32 %v2661_v8, %v2603_v22  ;;  %v2669_v27 = vmul.f32 %v2661_v8, %v2627_v40  ;;  %v2660_v30 = vmax.f32 %v2656_v33, 0.0  ;;  %v14127_v8 = vld [vmem:[#allocation18_spill] sm:$0xff]  ;;  %v14128_v33 = vld [vmem:[#allocation21_spill] sm:$0xff] }
 0x387   :  { %v12391_v26 = vsub.f32 %v2667_v10, %v12386_v16  ;;  %v12432_v48 = vand.u32 4294901760, %v2662_v61  ;;  %v12443_v29 = vsub.f32 %v2663_v9, %v12419_v46  ;;  %v14135_v9 = vld [vmem:[#allocation22_spill] sm:$0xff] }
 0x388   :  { %v12393_v55 = vand.u32 4294901760, %v2669_v27  ;;  %v12395_v5 = vand.u32 4294901760, %v2665_v43  ;;  %v2664_v35 = vmul.f32 %v2660_v30, %v2597_v52  ;;  %v2668_v31 = vmul.f32 %v2660_v30, %v2621_v3  ;;  %v14131_v30 = vld [vmem:[#allocation16_spill] sm:$0xff] }
 0x389   :  { %v12399_v56 = vsub.f32 %v2666_v19, %v12388_v62  ;;  %v12417_v45 = vand.u32 4294901760, %v12391_v26  ;;  %v12453_v1 = vsub.f32 %v2662_v61, %v12432_v48  ;;  %v12461_v36 = vand.u32 4294901760, %v12443_v29  ;;  %v14126_v19 = vld [vmem:[#allocation38_spill] sm:$0xff]  ;;  %v14138_v61 = vld [vmem:[#allocation27_spill] sm:$0xff] }
 0x38a   :  { %v2841_v11 = vsub.f32 %v2669_v27, %v12393_v55  ;;  %v12402_v47 = vand.u32 4294901760, %v2668_v31  ;;  %v12404_v22 = vand.u32 4294901760, %v2664_v35  ;;  %10220 = vmatprep.subr.mxu0 %v12393_v55  ;;  %v12410_v52 = vsub.f32 %v2665_v43, %v12395_v5  ;;  %v14129_v43 = vld [vmem:[#allocation5_spill] sm:$0xff]  ;;  %v14130_v27 = vld [vmem:[#allocation23_spill] sm:$0xff] }
 0x38b   :  { %10221 = vmatpush3.msra.mxu0 %v12393_v55  ;;  %v12430_v20 = vand.u32 4294901760, %v12399_v56  ;;  %v2857_v3 = vsub.f32 %v12391_v26, %v12417_v45  ;;  %v12468_v51 = vand.u32 4294901760, %v12453_v1  ;;  %v2885_v39 = vsub.f32 %v12443_v29, %v12461_v36 }
 0x38c   :  { %v2848_v7 = vsub.f32 %v2668_v31, %v12402_v47  ;;  %10222 = vmatprep.subr.mxu0 %v12402_v47  ;;  %v12414_v37 = vand.u32 4294901760, %v2841_v11  ;;  %v12423_v54 = vsub.f32 %v2664_v35, %v12404_v22  ;;  %v12440_v57 = vand.u32 4294901760, %v12410_v52  ;;  %v14133_v35 = vld [vmem:[#allocation20_spill] sm:$0xff]  ;;  %v14134_v31 = vld [vmem:[#allocation31_spill] sm:$0xff] }
 0x38d   :  { %10223 = vmatpush3.msra.mxu0 %v12402_v47  ;;  %v2864_v60 = vsub.f32 %v12399_v56, %v12430_v20  ;;  %v2858_v59 = vand.u32 4294901760, %v2857_v3  ;;  %v2892_v23 = vsub.f32 %v12453_v1, %v12468_v51  ;;  %v2886_v25 = vand.u32 4294901760, %v2885_v39 }
 0x38e   :  { %10224 = vmatprep.subr.mxu0 %v12386_v16  ;;  %v2843_v40 = vsub.f32 %v2841_v11, %v12414_v37  ;;  %v12427_v6 = vand.u32 4294901760, %v2848_v7  ;;  %v12450_v38 = vand.u32 4294901760, %v12423_v54  ;;  %v2871_v24 = vsub.f32 %v12410_v52, %v12440_v57 }
 0x38f   :  { %10225 = vmatpush3.msra.mxu0 %v12386_v16  ;;  %v2865_v15 = vand.u32 4294901760, %v2864_v60  ;;  %v2893_v10 = vand.u32 4294901760, %v2892_v23 }
 0x390   :  { %10226 = vmatprep.subr.mxu0 %v12388_v62  ;;  %v2844_v18 = vand.u32 4294901760, %v2843_v40  ;;  %v2850_v44 = vsub.f32 %v2848_v7, %v12427_v6  ;;  %v2878_v41 = vsub.f32 %v12423_v54, %v12450_v38  ;;  %v2872_v13 = vand.u32 4294901760, %v2871_v24  ;;  %v14146_v40 = vld [vmem:[#allocation32_spill] sm:$0xff] }
 0x391   :  { %10227 = vmatpush3.msra.mxu0 %v12388_v62 }
 0x392   :  { %10228 = vmatprep.subr.mxu0 %v12395_v5  ;;  %10248 = vmatprep.subr.mxu1 %v2844_v18  ;;  %v2851_v50 = vand.u32 4294901760, %v2850_v44  ;;  %v2879_v49 = vand.u32 4294901760, %v2878_v41 }
 0x393   :  { %10229 = vmatpush3.msra.mxu0 %v12395_v5  ;;  %10249 = vmatpush3.msra.mxu1 %v2844_v18 }
 0x394   :  { %10230 = vmatprep.subr.mxu0 %v12404_v22  ;;  %10250 = vmatprep.subr.mxu1 %v2851_v50 }
 0x395   :  { %10231 = vmatpush3.msra.mxu0 %v12404_v22  ;;  %10251 = vmatpush3.msra.mxu1 %v2851_v50 }
 0x396   :  { %10232 = vmatprep.subr.mxu0 %v12419_v46  ;;  %10252 = vmatprep.subr.mxu1 %v2858_v59 }
 0x397   :  { %10233 = vmatpush3.msra.mxu0 %v12419_v46  ;;  %10253 = vmatpush3.msra.mxu1 %v2858_v59 }
 0x398   :  { %10234 = vmatprep.subr.mxu0 %v12432_v48  ;;  %10254 = vmatprep.subr.mxu1 %v2865_v15 }
 0x399   :  { %10235 = vmatpush3.msra.mxu0 %v12432_v48  ;;  %10255 = vmatpush3.msra.mxu1 %v2865_v15 }
 0x39a   :  { %10237 = vmatmul.mubr.f32.vlgmr.msra.gmra.mxu0 %v14094_v4  ;;  %10256 = vmatprep.subr.mxu1 %v2872_v13 }
 0x39b   :  { %10276 = vmatprep.subr.mxu0 %v2841_v11  ;;  %10257 = vmatpush3.msra.mxu1 %v2872_v13 }
 0x39c   :  { %10277 = vmatpush3.msra.mxu0 %v2841_v11  ;;  %10258 = vmatprep.subr.mxu1 %v2879_v49  ;;  %v14137_v11 = vld [vmem:[#allocation6_spill] sm:$0xff] }
 0x39d   :  { %10278 = vmatprep.subr.mxu0 %v2848_v7  ;;  %10239 = vmatprep.mubr.f32.mxu0 %v12002_v58 }
 0x39e   :  { %10259 = vmatpush3.msra.mxu1 %v2879_v49  ;;  %10279 = vmatpush3.msra.mxu0 %v2848_v7  ;;  %v14140_v7 = vld [vmem:[#allocation33_spill] sm:$0xff] }
 0x39f   :  { %10240 = vmatmul.mubr.f32.gmra.mxu0 %v12014_v32  ;;  %10260 = vmatprep.subr.mxu1 %v2886_v25 }
 0x3a0   :  { %10280 = vmatprep.subr.mxu0 %v12391_v26  ;;  %10261 = vmatpush3.msra.mxu1 %v2886_v25 }
 0x3a1   :  { %10281 = vmatpush3.msra.mxu0 %v12391_v26  ;;  %10262 = vmatprep.subr.mxu1 %v2893_v10  ;;  %v14132_v26 = vld [vmem:[#allocation28_spill] sm:$0xff] }
 0x3a2   :  { %10282 = vmatprep.subr.mxu0 %v12399_v56  ;;  %10242 = vmatprep.mubr.f32.mxu0 %v12027_v42 }
 0x3a3   :  { %10263 = vmatpush3.msra.mxu1 %v2893_v10  ;;  %10283 = vmatpush3.msra.mxu0 %v12399_v56  ;;  %v14136_v56 = vld [vmem:[#allocation25_spill] sm:$0xff] }
 0x3a4   :  { %10243 = vmatmul.mubr.f32.gmra.mxu0 %v12034_v63  ;;  %10265 = vmatmul.mubr.f32.vlgmr.msra.gmra.mxu1 %v14123_v53 }
 0x3a5   :  { %10284 = vmatprep.subr.mxu0 %v12410_v52  ;;  %10304 = vmatprep.subr.mxu1 %v12393_v55 }
 0x3a6   :  { %10285 = vmatpush3.msra.mxu0 %v12410_v52  ;;  %10305 = vmatpush3.msra.mxu1 %v12393_v55  ;;  %v14139_v52 = vld [vmem:[#allocation19_spill] sm:$0xff] }
 0x3a7   :  { %10286 = vmatprep.subr.mxu0 %v12423_v54  ;;  %10306 = vmatprep.subr.mxu1 %v12402_v47 }
 0x3a8   :  { %10245 = vmatprep.mubr.f32.mxu0 %v14124_v12  ;;  %10267 = vmatprep.mubr.f32.mxu1 %v14125_v21 }
 0x3a9   :  { %10287 = vmatpush3.msra.mxu0 %v12423_v54  ;;  %10307 = vmatpush3.msra.mxu1 %v12402_v47  ;;  %v14143_v54 = vld [vmem:[#allocation26_spill] sm:$0xff] }
 0x3aa   :  { %10246 = vmatmul.mubr.f32.gmra.mxu0 %v14126_v19  ;;  %10268 = vmatmul.mubr.f32.gmra.mxu1 %v14127_v8 }
 0x3ab   :  { %10288 = vmatprep.subr.mxu0 %v12443_v29  ;;  %10308 = vmatprep.subr.mxu1 %v12386_v16 }
 0x3ac   :  { %10289 = vmatpush3.msra.mxu0 %v12443_v29  ;;  %10309 = vmatpush3.msra.mxu1 %v12386_v16 }
 0x3ad   :  { %10290 = vmatprep.subr.mxu0 %v12453_v1  ;;  %10310 = vmatprep.subr.mxu1 %v12388_v62 }
 0x3ae   :  { %10270 = vmatprep.mubr.f32.mxu1 %v14128_v33  ;;  %10291 = vmatpush3.msra.mxu0 %v12453_v1 }
 0x3af   :  { %10292 = vmatprep.mubr.f32.mxu0 %v14129_v43  ;;  %10311 = vmatpush3.msra.mxu1 %v12388_v62 }
 0x3b0   :  { %10271 = vmatmul.mubr.f32.gmra.mxu1 %v14130_v27  ;;  %10293 = vmatmul.mubr.f32.vlgmr.msra.gmra.mxu0 %v14131_v30 }
 0x3b1   :  { %10312 = vmatprep.subr.mxu1 %v12395_v5  ;;  %10332 = vmatprep.subr.mxu0 %v12414_v37 }
 0x3b2   :  { %10313 = vmatpush3.msra.mxu1 %v12395_v5  ;;  %10333 = vmatpush3.msra.mxu0 %v12414_v37  ;;  %v14141_v37 = vld [vmem:[#allocation24_spill] sm:$0xff] }
 0x3b3   :  { %10314 = vmatprep.subr.mxu1 %v12404_v22  ;;  %10334 = vmatprep.subr.mxu0 %v12427_v6 }
 0x3b4   :  { %10273 = vmatprep.mubr.f32.mxu1 %v14132_v26  ;;  %10295 = vmatprep.mubr.f32.mxu0 %v14133_v35 }
 0x3b5   :  { %10315 = vmatpush3.msra.mxu1 %v12404_v22  ;;  %10335 = vmatpush3.msra.mxu0 %v12427_v6  ;;  %v14147_v6 = vld [vmem:[#allocation35_spill] sm:$0xff] }
 0x3b6   :  { %10274 = vmatmul.mubr.f32.gmra.mxu1 %v14134_v31  ;;  %10296 = vmatmul.mubr.f32.gmra.mxu0 %v14135_v9 }
 0x3b7   :  { %10316 = vmatprep.subr.mxu1 %v12419_v46  ;;  %10336 = vmatprep.subr.mxu0 %v12417_v45 }
 0x3b8   :  { %10317 = vmatpush3.msra.mxu1 %v12419_v46  ;;  %10337 = vmatpush3.msra.mxu0 %v12417_v45  ;;  %v14142_v45 = vld [vmem:[#allocation34_spill] sm:$0xff] }
 0x3b9   :  { %10318 = vmatprep.subr.mxu1 %v12432_v48  ;;  %10338 = vmatprep.subr.mxu0 %v12430_v20 }
 0x3ba   :  { %10298 = vmatprep.mubr.f32.mxu0 %v14136_v56  ;;  %10319 = vmatpush3.msra.mxu1 %v12432_v48 }
 0x3bb   :  { %10320 = vmatprep.mubr.f32.mxu1 %v14137_v11  ;;  %10339 = vmatpush3.msra.mxu0 %v12430_v20 }
 0x3bc   :  { %10299 = vmatmul.mubr.f32.gmra.mxu0 %v14138_v61  ;;  %10321 = vmatmul.mubr.f32.vlgmr.msra.gmra.mxu1 %v14139_v52  ;;  %v14151_v61 = vld [vmem:[#allocation9_spill] sm:$0xff] }
 0x3bd   :  { %10340 = vmatprep.subr.mxu0 %v12440_v57  ;;  %10360 = vmatprep.subr.mxu1 %v12393_v55 }
 0x3be   :  { %10341 = vmatpush3.msra.mxu0 %v12440_v57  ;;  %10361 = vmatpush3.msra.mxu1 %v12393_v55  ;;  %v14144_v55 = vld [vmem:[#allocation30_spill] sm:$0xff] }
 0x3bf   :  { %10342 = vmatprep.subr.mxu0 %v12450_v38  ;;  %10362 = vmatprep.subr.mxu1 %v12402_v47 }
 0x3c0   :  { %10301 = vmatprep.mubr.f32.mxu0 %v14140_v7  ;;  %10323 = vmatprep.mubr.f32.mxu1 %v14141_v37  ;;  %v14150_v37 = vld [vmem:[#allocation8_spill] sm:$0xff] }
 0x3c1   :  { %10343 = vmatpush3.msra.mxu0 %v12450_v38  ;;  %10363 = vmatpush3.msra.mxu1 %v12402_v47  ;;  %v14145_v47 = vld [vmem:[#allocation4_spill] sm:$0xff] }
 0x3c2   :  { %10302 = vmatmul.mubr.f32.gmra.mxu0 %v14142_v45  ;;  %10324 = vmatmul.mubr.f32.gmra.mxu1 %v14143_v54 }
 0x3c3   :  { %10344 = vmatprep.subr.mxu0 %v12461_v36  ;;  %10364 = vmatprep.subr.mxu1 %v12386_v16 }
 0x3c4   :  { %10345 = vmatpush3.msra.mxu0 %v12461_v36  ;;  %10365 = vmatpush3.msra.mxu1 %v12386_v16  ;;  %v14148_v16 = vld [vmem:[#allocation36_spill] sm:$0xff] }
 0x3c5   :  { %10346 = vmatprep.subr.mxu0 %v12468_v51  ;;  %10366 = vmatprep.subr.mxu1 %v12388_v62 }
 0x3c6   :  { %10326 = vmatprep.mubr.f32.mxu1 %v14144_v55  ;;  %10347 = vmatpush3.msra.mxu0 %v12468_v51 }
 0x3c7   :  { %10348 = vmatprep.mubr.f32.mxu0 %v14145_v47  ;;  %10367 = vmatpush3.msra.mxu1 %v12388_v62  ;;  %v14149_v62 = vld [vmem:[#allocation7_spill] sm:$0xff] }
 0x3c8   :  { %10327 = vmatmul.mubr.f32.gmra.mxu1 %v14146_v40  ;;  %10349 = vmatmul.mubr.f32.vlgmr.msra.gmra.mxu0 %v14123_v53 }
 0x3c9   :  { %10368 = vmatprep.subr.mxu1 %v12395_v5  ;;  %10329 = vmatprep.mubr.f32.mxu1 %v14147_v6 }
 0x3ca   :  { %10369 = vmatpush3.msra.mxu1 %v12395_v5  ;;  %10351 = vmatprep.mubr.f32.mxu0 %v14125_v21 }
 0x3cb   :  { %10370 = vmatprep.subr.mxu1 %v12404_v22 }
 0x3cc   :  { %10371 = vmatpush3.msra.mxu1 %v12404_v22  ;;  %10352 = vmatmul.mubr.f32.gmra.mxu0 %v14127_v8 }
 0x3cd   :  { %10330 = vmatmul.mubr.f32.gmra.mxu1 %v14148_v16  ;;  %10372 = vmatprep.subr.mxu1 %v12419_v46 }
 0x3ce   :  { %10373 = vmatpush3.msra.mxu1 %v12419_v46  ;;  %10354 = vmatprep.mubr.f32.mxu0 %v14128_v33 }
 0x3cf   :  { %10374 = vmatprep.subr.mxu1 %v12432_v48  ;;  %10376 = vmatprep.mubr.f32.mxu1 %v14145_v47 }
 0x3d0   :  { %10375 = vmatpush3.msra.mxu1 %v12432_v48  ;;  %10355 = vmatmul.mubr.f32.gmra.mxu0 %v14130_v27 }
 0x3d1   :  { %10377 = vmatmul.mubr.f32.vlgmr.msra.gmra.mxu1 %v14123_v53  ;;  %10357 = vmatprep.mubr.f32.mxu0 %v14132_v26 }
 0x3d2   :  { %10379 = vmatprep.mubr.f32.mxu1 %v14125_v21 }
 0x3d4   :  { %10358 = vmatmul.mubr.f32.gmra.mxu0 %v14134_v31 }
 0x3d5   :  { %10380 = vmatmul.mubr.f32.gmra.mxu1 %v14127_v8  ;;  %10404 = vmatprep.mubr.f32.mxu0 %v14149_v62 }
 0x3d6   :  { %10382 = vmatprep.mubr.f32.mxu1 %v14128_v33 }
 0x3d9   :  { %10383 = vmatmul.mubr.f32.gmra.mxu1 %v14130_v27 }
 0x3da   :  { %10385 = vmatprep.mubr.f32.mxu1 %v14132_v26  ;;  %v14152_v26 = vld [vmem:[#allocation11_spill] sm:$0xff] }
 0x3dd   :  { %10386 = vmatmul.mubr.f32.gmra.mxu1 %v14134_v31 }
 0x3de   :  { %10432 = vmatprep.mubr.f32.mxu1 %v14145_v47 }
 0x45a   :  { %v10238_v5 = vpop.f32.mrf.mxu0 }
 0x45b   :  { %v2760_v7 = vadd.f32 %v10238_v5, %v14150_v37 }
 0x45c   :  { %v2749_v22 = vpop.f32.mrf.mxu0 }
 0x45d   :  { %v2750_v11 = vadd.f32 %v2749_v22, %v14151_v61 }
 0x45f   :  { %v10241_v46 = vpop.f32.mrf.mxu0 }
 0x460   :  { %v2780_v30 = vadd.f32 %v10241_v46, %v14152_v26 }
 0x461   :  { %v2769_v20 = vpop.f32.mrf.mxu0 }
 0x462   :  { %v2770_v21 = vadd.f32 %v2769_v20, %v11807_v2 }
 0x464   :  { %v10244_v48 = vpop.f32.mrf.mxu0  ;;  %v10266_v18 = vpop.f32.mrf.mxu1 }
 0x465   :  { %v2800_v9 = vadd.f32 %v10244_v48, %v14121_v17  ;;  %v2937_v31 = vadd.f32 %v10266_v18, %v2760_v7 }
 0x466   :  { %v2789_v44 = vpop.f32.mrf.mxu0  ;;  %v2930_v3 = vpop.f32.mrf.mxu1 }
 0x467   :  { %v2931_v27 = vadd.f32 %v2930_v3, %v2750_v11  ;;  %v2790_v33 = vadd.f32 %v2789_v44, %v11801_v0 }
 0x46a   :  { %v10247_v57 = vpop.f32.mrf.mxu0  ;;  %v10269_v29 = vpop.f32.mrf.mxu1 }
 0x46b   :  { %v2949_v12 = vadd.f32 %v10269_v29, %v2780_v30  ;;  %v2820_v22 = vadd.f32 %v10247_v57, %v14091_v28 }
 0x46c   :  { %v2809_v50 = vpop.f32.mrf.mxu0  ;;  %v2942_v60 = vpop.f32.mrf.mxu1 }
 0x46d   :  { %v2810_v18 = vadd.f32 %v2809_v50, %v14092_v14  ;;  %v2943_v46 = vadd.f32 %v2942_v60, %v2770_v21 }
 0x470   :  { %v10272_v38 = vpop.f32.mrf.mxu1  ;;  %v10294_v1 = vpop.f32.mrf.mxu0 }
 0x471   :  { %v2961_v8 = vadd.f32 %v10272_v38, %v2800_v9  ;;  %v3068_v19 = vadd.f32 %v10294_v1, %v2937_v31 }
 0x472   :  { %v2954_v59 = vpop.f32.mrf.mxu1  ;;  %v3060_v24 = vpop.f32.mrf.mxu0 }
 0x473   :  { %v3061_v5 = vadd.f32 %v3060_v24, %v2931_v27  ;;  %v2955_v61 = vadd.f32 %v2954_v59, %v2790_v33 }
 0x476   :  { %v10275_v36 = vpop.f32.mrf.mxu1  ;;  %v10297_v15 = vpop.f32.mrf.mxu0 }
 0x477   :  { %v3082_v11 = vadd.f32 %v10297_v15, %v2949_v12  ;;  %v2973_v44 = vadd.f32 %v10275_v36, %v2820_v22 }
 0x478   :  { %v2966_v41 = vpop.f32.mrf.mxu1  ;;  %v3074_v51 = vpop.f32.mrf.mxu0 }
 0x479   :  { %v2967_v20 = vadd.f32 %v2966_v41, %v2810_v18  ;;  %v3075_v30 = vadd.f32 %v3074_v51, %v2943_v46 }
 0x47c   :  { %v10300_v13 = vpop.f32.mrf.mxu0  ;;  %v10322_v39 = vpop.f32.mrf.mxu1 }
 0x47d   :  { %v3096_v48 = vadd.f32 %v10300_v13, %v2961_v8  ;;  %v3199_v7 = vadd.f32 %v10322_v39, %v3068_v19 }
 0x47e   :  { %v3088_v49 = vpop.f32.mrf.mxu0  ;;  %v3190_v23 = vpop.f32.mrf.mxu1 }
 0x47f   :  { %v3191_v3 = vadd.f32 %v3190_v23, %v3061_v5  ;;  %v3089_v9 = vadd.f32 %v3088_v49, %v2955_v61 }
 0x482   :  { %v10303_v25 = vpop.f32.mrf.mxu0  ;;  %v10325_v10 = vpop.f32.mrf.mxu1 }
 0x483   :  { %v3215_v27 = vadd.f32 %v10325_v10, %v3082_v11  ;;  %v3110_v57 = vadd.f32 %v10303_v25, %v2973_v44 }
 0x484   :  { %v3102_v62 = vpop.f32.mrf.mxu0  ;;  %v3206_v16 = vpop.f32.mrf.mxu1 }
 0x485   :  { %v3103_v50 = vadd.f32 %v3102_v62, %v2967_v20  ;;  %v3207_v21 = vadd.f32 %v3206_v16, %v3075_v30 }
 0x488   :  { %v10328_v6 = vpop.f32.mrf.mxu1  ;;  %v10350_v40 = vpop.f32.mrf.mxu0 }
 0x489   :  { %v3231_v31 = vadd.f32 %v10328_v6, %v3096_v48  ;;  %v3348_v38 = vadd.f32 %v10350_v40, %v3199_v7 }
 0x48a   :  { %v3222_v47 = vpop.f32.mrf.mxu1  ;;  %v3341_v55 = vpop.f32.mrf.mxu0 }
 0x48b   :  { %v3342_v29 = vadd.f32 %v3341_v55, %v3191_v3  ;;  %v3223_v33 = vadd.f32 %v3222_v47, %v3089_v9 }
 0x48c   :  { %v10353_v54 = vpop.f32.mrf.mxu0 }
 0x48d   :  { %v10331_v45 = vpop.f32.mrf.mxu1  ;;  %v3360_v12 = vadd.f32 %v10353_v54, %v3215_v27 }
 0x48e   :  { %v3353_v52 = vpop.f32.mrf.mxu0  ;;  %v3247_v61 = vadd.f32 %v10331_v45, %v3110_v57 }
 0x48f   :  { %v3238_v56 = vpop.f32.mrf.mxu1  ;;  %v3354_v15 = vadd.f32 %v3353_v52, %v3207_v21 }
 0x490   :  { %v10356_v35 = vpop.f32.mrf.mxu0  ;;  %v3239_v36 = vadd.f32 %v3238_v56, %v3103_v50 }
 0x491   :  { %v10378_v43 = vpop.f32.mrf.mxu1  ;;  %v3372_v8 = vadd.f32 %v10356_v35, %v3231_v31 }
 0x492   :  { %v3365_v37 = vpop.f32.mrf.mxu0  ;;  %v12592_v19 = vadd.f32 %v10378_v43, %v3348_v38 }
 0x493   :  { %v3462_v53 = vpop.f32.mrf.mxu1  ;;  %v3366_v6 = vadd.f32 %v3365_v37, %v3223_v33 }
 0x494   :  { %v10359_v1 = vpop.f32.mrf.mxu0  ;;  %v12594_v60 = vadd.f32 %v3462_v53, %v3342_v29  ;;  %v3509_v47 = vmul.f32 %v12592_v19, %v12592_v19 }
 0x495   :  { %v10381_v26 = vpop.f32.mrf.mxu1  ;;  %v3384_v35 = vadd.f32 %v10359_v1, %v3247_v61 }
 0x496   :  { %v3481_v41 = vadd.f32 %v10381_v26, %v3360_v12  ;;  %v3377_v55 = vpop.f32.mrf.mxu0  ;;  %v3508_v54 = vmul.f32 %v12594_v60, %v12594_v60 }
 0x497   :  { %v3474_v24 = vpop.f32.mrf.mxu1  ;;  %v3378_v62 = vadd.f32 %v3377_v55, %v3239_v36 }
 0x498   :  { %v3475_v53 = vadd.f32 %v3474_v24, %v3354_v15  ;;  %v3511_v56 = vmul.f32 %v3481_v41, %v3481_v41 }
 0x499   :  { %v10384_v59 = vpop.f32.mrf.mxu1 }
 0x49a   :  { %v3493_v40 = vadd.f32 %v10384_v59, %v3372_v8  ;;  %v3510_v10 = vmul.f32 %v3475_v53, %v3475_v53 }
 0x49b   :  { %v3486_v51 = vpop.f32.mrf.mxu1 }
 0x49c   :  { %v3513_v43 = vmul.f32 %v3493_v40, %v3493_v40  ;;  %v3487_v13 = vadd.f32 %v3486_v51, %v3366_v6 }
 0x49d   :  { %v10387_v16 = vpop.f32.mrf.mxu1 }
 0x49e   :  { %v3517_v45 = vadd.f32 %v3513_v43, %v3509_v47  ;;  %v3512_v37 = vmul.f32 %v3487_v13, %v3487_v13  ;;  %v3505_v39 = vadd.f32 %v10387_v16, %v3384_v35 }
 0x49f   :  { %v3498_v52 = vpop.f32.mrf.mxu1 }
 0x4a0   :  { %v3521_v26 = vadd.f32 1e-30, %v3517_v45  ;;  %v3516_v49 = vadd.f32 %v3512_v37, %v3508_v54  ;;  %v3515_v23 = vmul.f32 %v3505_v39, %v3505_v39  ;;  %v3499_v25 = vadd.f32 %v3498_v52, %v3378_v62 }
 0x4a2   :  { %11420 = vrsqrt.f32 %v3521_v26  ;;  %v3520_v5 = vadd.f32 1e-30, %v3516_v49  ;;  %v3519_v22 = vadd.f32 %v3515_v23, %v3511_v56  ;;  %v3514_v48 = vmul.f32 %v3499_v25, %v3499_v25 }
 0x4a4   :  { %11422 = vrsqrt.f32 %v3520_v5  ;;  %v3523_v7 = vadd.f32 1e-30, %v3519_v22  ;;  %v3518_v18 = vadd.f32 %v3514_v48, %v3510_v10 }
 0x4a6   :  { %11424 = vrsqrt.f32 %v3523_v7  ;;  %v3522_v46 = vadd.f32 1e-30, %v3518_v18 }
 0x4a8   :  { %11426 = vrsqrt.f32 %v3522_v46 }
 0x4af   :  { %v11421_v11 = vpop.eup %11420 }
 0x4b0   :  { %v3529_v3 = vmul.f32 %v11421_v11, %v14093_v34 }
 0x4b1   :  { %v11423_v44 = vpop.eup %11422 }
 0x4b2   :  { %v3533_v9 = vsub.f32 1.0, %v3529_v3  ;;  %v3528_v31 = vmul.f32 %v11423_v44, %v14093_v34 }
 0x4b3   :  { %v11425_v38 = vpop.eup %11424 }
 0x4b4   :  { %v3537_v20 = vmax.f32 %v3533_v9, 0.0  ;;  %v3532_v30 = vsub.f32 1.0, %v3528_v31  ;;  %v3531_v27 = vmul.f32 %v11425_v38, %v14093_v34 }
 0x4b5   :  { %v11427_v29 = vpop.eup %11426 }
 0x4b6   :  { %v3545_v1 = vmul.f32 %v3537_v20, %v3493_v40  ;;  %v3536_v24 = vmax.f32 %v3532_v30, 0.0  ;;  %v3535_v57 = vsub.f32 1.0, %v3531_v27  ;;  %v3530_v33 = vmul.f32 %v11427_v29, %v14093_v34 }
 0x4b7   :  { %v3541_v35 = vmul.f32 %v3537_v20, %v12592_v19 }
 0x4b8   :  { %v12604_v8 = vand.u32 4294901760, %v3545_v1  ;;  %v3544_v50 = vmul.f32 %v3536_v24, %v3487_v13  ;;  %v3539_v21 = vmax.f32 %v3535_v57, 0.0  ;;  %v3534_v12 = vsub.f32 1.0, %v3530_v33  ;;  %v14154_v57 = vld [vmem:[#allocation37_spill] sm:$0xff] }
 0x4b9   :  { %v3540_v16 = vmul.f32 %v3536_v24, %v12594_v60  ;;  %v12637_v37 = vand.u32 4294901760, %v3541_v35  ;;  %v14153_v24 = vld [vmem:[#allocation15_spill] sm:$0xff]  ;;  %v14155_v33 = vld [vmem:[#allocation17_spill] sm:$0xff] }
 0x4ba   :  { %v12606_v59 = vand.u32 4294901760, %v3544_v50  ;;  %v3543_v61 = vmul.f32 %v3539_v21, %v3481_v41  ;;  %v3547_v6 = vmul.f32 %v3539_v21, %v3505_v39  ;;  %v3538_v36 = vmax.f32 %v3534_v12, 0.0  ;;  %v14157_v21 = vld [vmem:[#allocation18_spill] sm:$0xff]  ;;  %v14158_v12 = vld [vmem:[#allocation21_spill] sm:$0xff] }
 0x4bb   :  { %v12609_v15 = vsub.f32 %v3545_v1, %v12604_v8  ;;  %v12650_v26 = vand.u32 4294901760, %v3540_v16  ;;  %v12661_v5 = vsub.f32 %v3541_v35, %v12637_v37  ;;  %v14165_v35 = vld [vmem:[#allocation22_spill] sm:$0xff] }
 0x4bc   :  { %v12611_v55 = vand.u32 4294901760, %v3547_v6  ;;  %v12613_v40 = vand.u32 4294901760, %v3543_v61  ;;  %v3542_v51 = vmul.f32 %v3538_v36, %v3475_v53  ;;  %v3546_v47 = vmul.f32 %v3538_v36, %v3499_v25  ;;  %v14161_v36 = vld [vmem:[#allocation16_spill] sm:$0xff] }
 0x4bd   :  { %v12617_v43 = vsub.f32 %v3544_v50, %v12606_v59  ;;  %v12635_v45 = vand.u32 4294901760, %v12609_v15  ;;  %v12671_v18 = vsub.f32 %v3540_v16, %v12650_v26  ;;  %v12679_v3 = vand.u32 4294901760, %v12661_v5  ;;  %v14156_v50 = vld [vmem:[#allocation38_spill] sm:$0xff]  ;;  %v14168_v16 = vld [vmem:[#allocation27_spill] sm:$0xff] }
 0x4be   :  { %v3719_v13 = vsub.f32 %v3547_v6, %v12611_v55  ;;  %v12620_v54 = vand.u32 4294901760, %v3546_v47  ;;  %v12622_v41 = vand.u32 4294901760, %v3542_v51  ;;  %10388 = vmatprep.subr.mxu0 %v12611_v55  ;;  %v12628_v53 = vsub.f32 %v3543_v61, %v12613_v40  ;;  %v14159_v61 = vld [vmem:[#allocation5_spill] sm:$0xff]  ;;  %v14160_v6 = vld [vmem:[#allocation23_spill] sm:$0xff] }
 0x4bf   :  { %10389 = vmatpush3.msra.mxu0 %v12611_v55  ;;  %v12648_v52 = vand.u32 4294901760, %v12617_v43  ;;  %v3735_v25 = vsub.f32 %v12609_v15, %v12635_v45  ;;  %v12686_v31 = vand.u32 4294901760, %v12671_v18  ;;  %v3763_v20 = vsub.f32 %v12661_v5, %v12679_v3 }
 0x4c0   :  { %v3726_v19 = vsub.f32 %v3546_v47, %v12620_v54  ;;  %10390 = vmatprep.subr.mxu0 %v12620_v54  ;;  %v12632_v62 = vand.u32 4294901760, %v3719_v13  ;;  %v12641_v60 = vsub.f32 %v3542_v51, %v12622_v41  ;;  %v12658_v10 = vand.u32 4294901760, %v12628_v53  ;;  %v14163_v51 = vld [vmem:[#allocation20_spill] sm:$0xff]  ;;  %v14164_v47 = vld [vmem:[#allocation31_spill] sm:$0xff] }
 0x4c1   :  { %10391 = vmatpush3.msra.mxu0 %v12620_v54  ;;  %v3742_v48 = vsub.f32 %v12617_v43, %v12648_v52  ;;  %v3736_v46 = vand.u32 4294901760, %v3735_v25  ;;  %v3770_v27 = vsub.f32 %v12671_v18, %v12686_v31  ;;  %v3764_v29 = vand.u32 4294901760, %v3763_v20 }
 0x4c2   :  { %10392 = vmatprep.subr.mxu0 %v12604_v8  ;;  %v3721_v39 = vsub.f32 %v3719_v13, %v12632_v62  ;;  %v12645_v56 = vand.u32 4294901760, %v3726_v19  ;;  %v12668_v7 = vand.u32 4294901760, %v12641_v60  ;;  %v3749_v11 = vsub.f32 %v12628_v53, %v12658_v10 }
 0x4c3   :  { %10393 = vmatpush3.msra.mxu0 %v12604_v8  ;;  %v3743_v44 = vand.u32 4294901760, %v3742_v48  ;;  %v3771_v1 = vand.u32 4294901760, %v3770_v27 }
 0x4c4   :  { %10394 = vmatprep.subr.mxu0 %v12606_v59  ;;  %v3722_v49 = vand.u32 4294901760, %v3721_v39  ;;  %v3728_v23 = vsub.f32 %v3726_v19, %v12645_v56  ;;  %v3756_v9 = vsub.f32 %v12641_v60, %v12668_v7  ;;  %v3750_v38 = vand.u32 4294901760, %v3749_v11  ;;  %v14176_v39 = vld [vmem:[#allocation32_spill] sm:$0xff] }
 0x4c5   :  { %10395 = vmatpush3.msra.mxu0 %v12606_v59 }
 0x4c6   :  { %10396 = vmatprep.subr.mxu0 %v12613_v40  ;;  %10416 = vmatprep.subr.mxu1 %v3722_v49  ;;  %v3729_v22 = vand.u32 4294901760, %v3728_v23  ;;  %v3757_v30 = vand.u32 4294901760, %v3756_v9 }
 0x4c7   :  { %10397 = vmatpush3.msra.mxu0 %v12613_v40  ;;  %10417 = vmatpush3.msra.mxu1 %v3722_v49 }
 0x4c8   :  { %10398 = vmatprep.subr.mxu0 %v12622_v41  ;;  %10418 = vmatprep.subr.mxu1 %v3729_v22 }
 0x4c9   :  { %10399 = vmatpush3.msra.mxu0 %v12622_v41  ;;  %10419 = vmatpush3.msra.mxu1 %v3729_v22 }
 0x4ca   :  { %10400 = vmatprep.subr.mxu0 %v12637_v37  ;;  %10420 = vmatprep.subr.mxu1 %v3736_v46 }
 0x4cb   :  { %10401 = vmatpush3.msra.mxu0 %v12637_v37  ;;  %10421 = vmatpush3.msra.mxu1 %v3736_v46 }
 0x4cc   :  { %10402 = vmatprep.subr.mxu0 %v12650_v26  ;;  %10422 = vmatprep.subr.mxu1 %v3743_v44 }
 0x4cd   :  { %10403 = vmatpush3.msra.mxu0 %v12650_v26  ;;  %10423 = vmatpush3.msra.mxu1 %v3743_v44 }
 0x4ce   :  { %10405 = vmatmul.mubr.f32.vlgmr.msra.gmra.mxu0 %v14094_v4  ;;  %10424 = vmatprep.subr.mxu1 %v3750_v38 }
 0x4cf   :  { %10444 = vmatprep.subr.mxu0 %v3719_v13  ;;  %10425 = vmatpush3.msra.mxu1 %v3750_v38 }
 0x4d0   :  { %10445 = vmatpush3.msra.mxu0 %v3719_v13  ;;  %10426 = vmatprep.subr.mxu1 %v3757_v30  ;;  %v14167_v13 = vld [vmem:[#allocation6_spill] sm:$0xff] }
 0x4d1   :  { %10446 = vmatprep.subr.mxu0 %v3726_v19  ;;  %10407 = vmatprep.mubr.f32.mxu0 %v12002_v58 }
 0x4d2   :  { %10427 = vmatpush3.msra.mxu1 %v3757_v30  ;;  %10447 = vmatpush3.msra.mxu0 %v3726_v19  ;;  %v14170_v19 = vld [vmem:[#allocation33_spill] sm:$0xff] }
 0x4d3   :  { %10408 = vmatmul.mubr.f32.gmra.mxu0 %v12014_v32  ;;  %10428 = vmatprep.subr.mxu1 %v3764_v29 }
 0x4d4   :  { %10448 = vmatprep.subr.mxu0 %v12609_v15  ;;  %10429 = vmatpush3.msra.mxu1 %v3764_v29 }
 0x4d5   :  { %10449 = vmatpush3.msra.mxu0 %v12609_v15  ;;  %10430 = vmatprep.subr.mxu1 %v3771_v1  ;;  %v14162_v15 = vld [vmem:[#allocation28_spill] sm:$0xff] }
 0x4d6   :  { %10450 = vmatprep.subr.mxu0 %v12617_v43  ;;  %10410 = vmatprep.mubr.f32.mxu0 %v12027_v42 }
 0x4d7   :  { %10431 = vmatpush3.msra.mxu1 %v3771_v1  ;;  %10451 = vmatpush3.msra.mxu0 %v12617_v43  ;;  %v14166_v43 = vld [vmem:[#allocation25_spill] sm:$0xff] }
 0x4d8   :  { %10411 = vmatmul.mubr.f32.gmra.mxu0 %v12034_v63  ;;  %10433 = vmatmul.mubr.f32.vlgmr.msra.gmra.mxu1 %v14153_v24 }
 0x4d9   :  { %10452 = vmatprep.subr.mxu0 %v12628_v53  ;;  %10472 = vmatprep.subr.mxu1 %v12611_v55 }
 0x4da   :  { %10453 = vmatpush3.msra.mxu0 %v12628_v53  ;;  %10473 = vmatpush3.msra.mxu1 %v12611_v55  ;;  %v14169_v53 = vld [vmem:[#allocation19_spill] sm:$0xff] }
 0x4db   :  { %10454 = vmatprep.subr.mxu0 %v12641_v60  ;;  %10474 = vmatprep.subr.mxu1 %v12620_v54 }
 0x4dc   :  { %10413 = vmatprep.mubr.f32.mxu0 %v14154_v57  ;;  %10435 = vmatprep.mubr.f32.mxu1 %v14155_v33 }
 0x4dd   :  { %10455 = vmatpush3.msra.mxu0 %v12641_v60  ;;  %10475 = vmatpush3.msra.mxu1 %v12620_v54  ;;  %v14173_v60 = vld [vmem:[#allocation26_spill] sm:$0xff] }
 0x4de   :  { %10414 = vmatmul.mubr.f32.gmra.mxu0 %v14156_v50  ;;  %10436 = vmatmul.mubr.f32.gmra.mxu1 %v14157_v21 }
 0x4df   :  { %10456 = vmatprep.subr.mxu0 %v12661_v5  ;;  %10476 = vmatprep.subr.mxu1 %v12604_v8 }
 0x4e0   :  { %10457 = vmatpush3.msra.mxu0 %v12661_v5  ;;  %10477 = vmatpush3.msra.mxu1 %v12604_v8 }
 0x4e1   :  { %10458 = vmatprep.subr.mxu0 %v12671_v18  ;;  %10478 = vmatprep.subr.mxu1 %v12606_v59 }
 0x4e2   :  { %10438 = vmatprep.mubr.f32.mxu1 %v14158_v12  ;;  %10459 = vmatpush3.msra.mxu0 %v12671_v18 }
 0x4e3   :  { %10460 = vmatprep.mubr.f32.mxu0 %v14159_v61  ;;  %10479 = vmatpush3.msra.mxu1 %v12606_v59 }
 0x4e4   :  { %10439 = vmatmul.mubr.f32.gmra.mxu1 %v14160_v6  ;;  %10461 = vmatmul.mubr.f32.vlgmr.msra.gmra.mxu0 %v14161_v36 }
 0x4e5   :  { %10480 = vmatprep.subr.mxu1 %v12613_v40  ;;  %10500 = vmatprep.subr.mxu0 %v12632_v62 }
 0x4e6   :  { %10481 = vmatpush3.msra.mxu1 %v12613_v40  ;;  %10501 = vmatpush3.msra.mxu0 %v12632_v62  ;;  %v14171_v62 = vld [vmem:[#allocation24_spill] sm:$0xff] }
 0x4e7   :  { %10482 = vmatprep.subr.mxu1 %v12622_v41  ;;  %10502 = vmatprep.subr.mxu0 %v12645_v56 }
 0x4e8   :  { %10441 = vmatprep.mubr.f32.mxu1 %v14162_v15  ;;  %10463 = vmatprep.mubr.f32.mxu0 %v14163_v51 }
 0x4e9   :  { %10483 = vmatpush3.msra.mxu1 %v12622_v41  ;;  %10503 = vmatpush3.msra.mxu0 %v12645_v56  ;;  %v14177_v56 = vld [vmem:[#allocation35_spill] sm:$0xff] }
 0x4ea   :  { %10442 = vmatmul.mubr.f32.gmra.mxu1 %v14164_v47  ;;  %10464 = vmatmul.mubr.f32.gmra.mxu0 %v14165_v35 }
 0x4eb   :  { %10484 = vmatprep.subr.mxu1 %v12637_v37  ;;  %10504 = vmatprep.subr.mxu0 %v12635_v45 }
 0x4ec   :  { %10485 = vmatpush3.msra.mxu1 %v12637_v37  ;;  %10505 = vmatpush3.msra.mxu0 %v12635_v45  ;;  %v14172_v45 = vld [vmem:[#allocation34_spill] sm:$0xff] }
 0x4ed   :  { %10486 = vmatprep.subr.mxu1 %v12650_v26  ;;  %10506 = vmatprep.subr.mxu0 %v12648_v52 }
 0x4ee   :  { %10466 = vmatprep.mubr.f32.mxu0 %v14166_v43  ;;  %10487 = vmatpush3.msra.mxu1 %v12650_v26 }
 0x4ef   :  { %10488 = vmatprep.mubr.f32.mxu1 %v14167_v13  ;;  %10507 = vmatpush3.msra.mxu0 %v12648_v52 }
 0x4f0   :  { %10467 = vmatmul.mubr.f32.gmra.mxu0 %v14168_v16  ;;  %10489 = vmatmul.mubr.f32.vlgmr.msra.gmra.mxu1 %v14169_v53  ;;  %v14181_v16 = vld [vmem:[#allocation9_spill] sm:$0xff] }
 0x4f1   :  { %10508 = vmatprep.subr.mxu0 %v12658_v10  ;;  %10528 = vmatprep.subr.mxu1 %v12611_v55 }
 0x4f2   :  { %10509 = vmatpush3.msra.mxu0 %v12658_v10  ;;  %10529 = vmatpush3.msra.mxu1 %v12611_v55  ;;  %v14174_v55 = vld [vmem:[#allocation30_spill] sm:$0xff] }
 0x4f3   :  { %10510 = vmatprep.subr.mxu0 %v12668_v7  ;;  %10530 = vmatprep.subr.mxu1 %v12620_v54 }
 0x4f4   :  { %10469 = vmatprep.mubr.f32.mxu0 %v14170_v19  ;;  %10491 = vmatprep.mubr.f32.mxu1 %v14171_v62  ;;  %v14180_v62 = vld [vmem:[#allocation8_spill] sm:$0xff] }
 0x4f5   :  { %10511 = vmatpush3.msra.mxu0 %v12668_v7  ;;  %10531 = vmatpush3.msra.mxu1 %v12620_v54  ;;  %v14175_v54 = vld [vmem:[#allocation4_spill] sm:$0xff] }
 0x4f6   :  { %10470 = vmatmul.mubr.f32.gmra.mxu0 %v14172_v45  ;;  %10492 = vmatmul.mubr.f32.gmra.mxu1 %v14173_v60 }
 0x4f7   :  { %10512 = vmatprep.subr.mxu0 %v12679_v3  ;;  %10532 = vmatprep.subr.mxu1 %v12604_v8 }
 0x4f8   :  { %10513 = vmatpush3.msra.mxu0 %v12679_v3  ;;  %10533 = vmatpush3.msra.mxu1 %v12604_v8  ;;  %v14178_v8 = vld [vmem:[#allocation36_spill] sm:$0xff] }
 0x4f9   :  { %10514 = vmatprep.subr.mxu0 %v12686_v31  ;;  %10534 = vmatprep.subr.mxu1 %v12606_v59 }
 0x4fa   :  { %10494 = vmatprep.mubr.f32.mxu1 %v14174_v55  ;;  %10515 = vmatpush3.msra.mxu0 %v12686_v31 }
 0x4fb   :  { %10516 = vmatprep.mubr.f32.mxu0 %v14175_v54  ;;  %10535 = vmatpush3.msra.mxu1 %v12606_v59  ;;  %v14179_v59 = vld [vmem:[#allocation7_spill] sm:$0xff] }
 0x4fc   :  { %10495 = vmatmul.mubr.f32.gmra.mxu1 %v14176_v39  ;;  %10517 = vmatmul.mubr.f32.vlgmr.msra.gmra.mxu0 %v14153_v24 }
 0x4fd   :  { %10536 = vmatprep.subr.mxu1 %v12613_v40  ;;  %10497 = vmatprep.mubr.f32.mxu1 %v14177_v56 }
 0x4fe   :  { %10537 = vmatpush3.msra.mxu1 %v12613_v40  ;;  %10519 = vmatprep.mubr.f32.mxu0 %v14155_v33 }
 0x4ff   :  { %10538 = vmatprep.subr.mxu1 %v12622_v41 }
 0x500   :  { %10539 = vmatpush3.msra.mxu1 %v12622_v41  ;;  %10520 = vmatmul.mubr.f32.gmra.mxu0 %v14157_v21 }
 0x501   :  { %10498 = vmatmul.mubr.f32.gmra.mxu1 %v14178_v8  ;;  %10540 = vmatprep.subr.mxu1 %v12637_v37 }
 0x502   :  { %10541 = vmatpush3.msra.mxu1 %v12637_v37  ;;  %10522 = vmatprep.mubr.f32.mxu0 %v14158_v12 }
 0x503   :  { %10542 = vmatprep.subr.mxu1 %v12650_v26  ;;  %10544 = vmatprep.mubr.f32.mxu1 %v14175_v54 }
 0x504   :  { %10543 = vmatpush3.msra.mxu1 %v12650_v26  ;;  %10523 = vmatmul.mubr.f32.gmra.mxu0 %v14160_v6 }
 0x505   :  { %10545 = vmatmul.mubr.f32.vlgmr.msra.gmra.mxu1 %v14153_v24  ;;  %10525 = vmatprep.mubr.f32.mxu0 %v14162_v15 }
 0x506   :  { %10547 = vmatprep.mubr.f32.mxu1 %v14155_v33 }
 0x508   :  { %10526 = vmatmul.mubr.f32.gmra.mxu0 %v14164_v47 }
 0x509   :  { %10548 = vmatmul.mubr.f32.gmra.mxu1 %v14157_v21  ;;  %10572 = vmatprep.mubr.f32.mxu0 %v14179_v59 }
 0x50a   :  { %10550 = vmatprep.mubr.f32.mxu1 %v14158_v12 }
 0x50d   :  { %10551 = vmatmul.mubr.f32.gmra.mxu1 %v14160_v6 }
 0x50e   :  { %10553 = vmatprep.mubr.f32.mxu1 %v14162_v15  ;;  %v14182_v15 = vld [vmem:[#allocation11_spill] sm:$0xff] }
 0x511   :  { %10554 = vmatmul.mubr.f32.gmra.mxu1 %v14164_v47 }
 0x512   :  { %10600 = vmatprep.mubr.f32.mxu1 %v14175_v54 }
 0x58e   :  { %v10406_v40 = vpop.f32.mrf.mxu0 }
 0x58f   :  { %v3638_v19 = vadd.f32 %v10406_v40, %v14180_v62 }
 0x590   :  { %v3627_v41 = vpop.f32.mrf.mxu0 }
 0x591   :  { %v3628_v13 = vadd.f32 %v3627_v41, %v14181_v16 }
 0x593   :  { %v10409_v37 = vpop.f32.mrf.mxu0 }
 0x594   :  { %v3658_v36 = vadd.f32 %v10409_v37, %v14182_v15 }
 0x595   :  { %v3647_v52 = vpop.f32.mrf.mxu0 }
 0x596   :  { %v3648_v33 = vadd.f32 %v3647_v52, %v11807_v2 }
 0x598   :  { %v10412_v26 = vpop.f32.mrf.mxu0  ;;  %v10434_v49 = vpop.f32.mrf.mxu1 }
 0x599   :  { %v3678_v35 = vadd.f32 %v10412_v26, %v14121_v17  ;;  %v3815_v47 = vadd.f32 %v10434_v49, %v3638_v19 }
 0x59a   :  { %v3667_v23 = vpop.f32.mrf.mxu0  ;;  %v3808_v25 = vpop.f32.mrf.mxu1 }
 0x59b   :  { %v3809_v6 = vadd.f32 %v3808_v25, %v3628_v13  ;;  %v3668_v12 = vadd.f32 %v3667_v23, %v11801_v0 }
 0x59e   :  { %v10415_v10 = vpop.f32.mrf.mxu0  ;;  %v10437_v5 = vpop.f32.mrf.mxu1 }
 0x59f   :  { %v3827_v57 = vadd.f32 %v10437_v5, %v3658_v36  ;;  %v3698_v41 = vadd.f32 %v10415_v10, %v14091_v28 }
 0x5a0   :  { %v3687_v22 = vpop.f32.mrf.mxu0  ;;  %v3820_v48 = vpop.f32.mrf.mxu1 }
 0x5a1   :  { %v3688_v49 = vadd.f32 %v3687_v22, %v14092_v14  ;;  %v3821_v37 = vadd.f32 %v3820_v48, %v3648_v33 }
 0x5a4   :  { %v10440_v7 = vpop.f32.mrf.mxu1  ;;  %v10462_v18 = vpop.f32.mrf.mxu0 }
 0x5a5   :  { %v3839_v21 = vadd.f32 %v10440_v7, %v3678_v35  ;;  %v3946_v50 = vadd.f32 %v10462_v18, %v3815_v47 }
 0x5a6   :  { %v3832_v46 = vpop.f32.mrf.mxu1  ;;  %v3938_v11 = vpop.f32.mrf.mxu0 }
 0x5a7   :  { %v3939_v40 = vadd.f32 %v3938_v11, %v3809_v6  ;;  %v3833_v16 = vadd.f32 %v3832_v46, %v3668_v12 }
 0x5aa   :  { %v10443_v3 = vpop.f32.mrf.mxu1  ;;  %v10465_v44 = vpop.f32.mrf.mxu0 }
 0x5ab   :  { %v3960_v13 = vadd.f32 %v10465_v44, %v3827_v57  ;;  %v3851_v23 = vadd.f32 %v10443_v3, %v3698_v41 }
 0x5ac   :  { %v3844_v9 = vpop.f32.mrf.mxu1  ;;  %v3952_v31 = vpop.f32.mrf.mxu0 }
 0x5ad   :  { %v3845_v52 = vadd.f32 %v3844_v9, %v3688_v49  ;;  %v3953_v36 = vadd.f32 %v3952_v31, %v3821_v37 }
 0x5b0   :  { %v10468_v38 = vpop.f32.mrf.mxu0  ;;  %v10490_v20 = vpop.f32.mrf.mxu1 }
 0x5b1   :  { %v3974_v26 = vadd.f32 %v10468_v38, %v3839_v21  ;;  %v4077_v19 = vadd.f32 %v10490_v20, %v3946_v50 }
 0x5b2   :  { %v3966_v30 = vpop.f32.mrf.mxu0  ;;  %v4068_v27 = vpop.f32.mrf.mxu1 }
 0x5b3   :  { %v4069_v25 = vadd.f32 %v4068_v27, %v3939_v40  ;;  %v3967_v35 = vadd.f32 %v3966_v30, %v3833_v16 }
 0x5b6   :  { %v10471_v29 = vpop.f32.mrf.mxu0  ;;  %v10493_v1 = vpop.f32.mrf.mxu1 }
 0x5b7   :  { %v4093_v6 = vadd.f32 %v10493_v1, %v3960_v13  ;;  %v3988_v10 = vadd.f32 %v10471_v29, %v3851_v23 }
 0x5b8   :  { %v3980_v59 = vpop.f32.mrf.mxu0  ;;  %v4084_v8 = vpop.f32.mrf.mxu1 }
 0x5b9   :  { %v3981_v22 = vadd.f32 %v3980_v59, %v3845_v52  ;;  %v4085_v33 = vadd.f32 %v4084_v8, %v3953_v36 }
 0x5bc   :  { %v10496_v56 = vpop.f32.mrf.mxu1  ;;  %v10518_v39 = vpop.f32.mrf.mxu0 }
 0x5bd   :  { %v4109_v47 = vadd.f32 %v10496_v56, %v3974_v26  ;;  %v4226_v7 = vadd.f32 %v10518_v39, %v4077_v19 }
 0x5be   :  { %v4100_v54 = vpop.f32.mrf.mxu1  ;;  %v4219_v55 = vpop.f32.mrf.mxu0 }
 0x5bf   :  { %v4220_v5 = vadd.f32 %v4219_v55, %v4069_v25  ;;  %v4101_v12 = vadd.f32 %v4100_v54, %v3967_v35 }
 0x5c0   :  { %v10521_v60 = vpop.f32.mrf.mxu0 }
 0x5c1   :  { %v10499_v45 = vpop.f32.mrf.mxu1  ;;  %v4238_v57 = vadd.f32 %v10521_v60, %v4093_v6 }
 0x5c2   :  { %v4231_v53 = vpop.f32.mrf.mxu0  ;;  %v4125_v16 = vadd.f32 %v10499_v45, %v3988_v10 }
 0x5c3   :  { %v4116_v43 = vpop.f32.mrf.mxu1  ;;  %v4232_v44 = vadd.f32 %v4231_v53, %v4085_v33 }
 0x5c4   :  { %v10524_v51 = vpop.f32.mrf.mxu0  ;;  %v4117_v3 = vadd.f32 %v4116_v43, %v3981_v22 }
 0x5c5   :  { %v10546_v61 = vpop.f32.mrf.mxu1  ;;  %v4250_v21 = vadd.f32 %v10524_v51, %v4109_v47 }
 0x5c6   :  { %v4243_v62 = vpop.f32.mrf.mxu0  ;;  %v12810_v50 = vadd.f32 %v10546_v61, %v4226_v7 }
 0x5c7   :  { %v4340_v24 = vpop.f32.mrf.mxu1  ;;  %v4244_v56 = vadd.f32 %v4243_v62, %v4101_v12 }
 0x5c8   :  { %v10527_v18 = vpop.f32.mrf.mxu0  ;;  %v12812_v48 = vadd.f32 %v4340_v24, %v4220_v5  ;;  %v4387_v54 = vmul.f32 %v12810_v50, %v12810_v50 }
 0x5c9   :  { %v10549_v15 = vpop.f32.mrf.mxu1  ;;  %v4262_v51 = vadd.f32 %v10527_v18, %v4125_v16 }
 0x5ca   :  { %v4359_v9 = vadd.f32 %v10549_v15, %v4238_v57  ;;  %v4255_v55 = vpop.f32.mrf.mxu0  ;;  %v4386_v60 = vmul.f32 %v12812_v48, %v12812_v48 }
 0x5cb   :  { %v4352_v11 = vpop.f32.mrf.mxu1  ;;  %v4256_v59 = vadd.f32 %v4255_v55, %v4117_v3 }
 0x5cc   :  { %v4353_v24 = vadd.f32 %v4352_v11, %v4232_v44  ;;  %v4389_v43 = vmul.f32 %v4359_v9, %v4359_v9 }
 0x5cd   :  { %v10552_v46 = vpop.f32.mrf.mxu1 }
 0x5ce   :  { %v4371_v39 = vadd.f32 %v10552_v46, %v4250_v21  ;;  %v4388_v1 = vmul.f32 %v4353_v24, %v4353_v24 }
 0x5cf   :  { %v4364_v31 = vpop.f32.mrf.mxu1 }
 0x5d0   :  { %v4391_v61 = vmul.f32 %v4371_v39, %v4371_v39  ;;  %v4365_v38 = vadd.f32 %v4364_v31, %v4244_v56 }
 0x5d1   :  { %v10555_v8 = vpop.f32.mrf.mxu1 }
 0x5d2   :  { %v4395_v45 = vadd.f32 %v4391_v61, %v4387_v54  ;;  %v4390_v62 = vmul.f32 %v4365_v38, %v4365_v38  ;;  %v4383_v20 = vadd.f32 %v10555_v8, %v4262_v51 }
 0x5d3   :  { %v4376_v53 = vpop.f32.mrf.mxu1 }
 0x5d4   :  { %v4399_v15 = vadd.f32 1e-30, %v4395_v45  ;;  %v4394_v30 = vadd.f32 %v4390_v62, %v4386_v60  ;;  %v4393_v27 = vmul.f32 %v4383_v20, %v4383_v20  ;;  %v4377_v29 = vadd.f32 %v4376_v53, %v4256_v59 }
 0x5d6   :  { %11428 = vrsqrt.f32 %v4399_v15  ;;  %v4398_v40 = vadd.f32 1e-30, %v4394_v30  ;;  %v4397_v41 = vadd.f32 %v4393_v27, %v4389_v43  ;;  %v4392_v26 = vmul.f32 %v4377_v29, %v4377_v29 }
 0x5d8   :  { %11430 = vrsqrt.f32 %v4398_v40  ;;  %v4401_v19 = vadd.f32 1e-30, %v4397_v41  ;;  %v4396_v49 = vadd.f32 %v4392_v26, %v4388_v1 }
 0x5da   :  { %11432 = vrsqrt.f32 %v4401_v19  ;;  %v4400_v37 = vadd.f32 1e-30, %v4396_v49 }
 0x5dc   :  { %11434 = vrsqrt.f32 %v4400_v37 }
 0x5e3   :  { %v11429_v13 = vpop.eup %11428 }
 0x5e4   :  { %v4407_v25 = vmul.f32 %v11429_v13, %v14093_v34 }
 0x5e5   :  { %v11431_v23 = vpop.eup %11430 }
 0x5e6   :  { %v4411_v35 = vsub.f32 1.0, %v4407_v25  ;;  %v4406_v47 = vmul.f32 %v11431_v23, %v14093_v34 }
 0x5e7   :  { %v11433_v7 = vpop.eup %11432 }
 0x5e8   :  { %v4415_v52 = vmax.f32 %v4411_v35, 0.0  ;;  %v4410_v36 = vsub.f32 1.0, %v4406_v47  ;;  %v4409_v6 = vmul.f32 %v11433_v7, %v14093_v34 }
 0x5e9   :  { %v11435_v5 = vpop.eup %11434 }
 0x5ea   :  { %v4423_v18 = vmul.f32 %v4415_v52, %v4371_v39  ;;  %v4414_v11 = vmax.f32 %v4410_v36, 0.0  ;;  %v4413_v10 = vsub.f32 1.0, %v4409_v6  ;;  %v4408_v12 = vmul.f32 %v11435_v5, %v14093_v34 }
 0x5eb   :  { %v4419_v51 = vmul.f32 %v4415_v52, %v12810_v50 }
 0x5ec   :  { %v12822_v21 = vand.u32 4294901760, %v4423_v18  ;;  %v4422_v22 = vmul.f32 %v4414_v11, %v4365_v38  ;;  %v4417_v33 = vmax.f32 %v4413_v10, 0.0  ;;  %v4412_v57 = vsub.f32 1.0, %v4408_v12  ;;  %v14184_v10 = vld [vmem:[#allocation37_spill] sm:$0xff] }
 0x5ed   :  { %v4418_v8 = vmul.f32 %v4414_v11, %v12812_v48  ;;  %v12855_v62 = vand.u32 4294901760, %v4419_v51  ;;  %v14183_v11 = vld [vmem:[#allocation15_spill] sm:$0xff]  ;;  %v14185_v12 = vld [vmem:[#allocation17_spill] sm:$0xff] }
 0x5ee   :  { %v12824_v46 = vand.u32 4294901760, %v4422_v22  ;;  %v4421_v16 = vmul.f32 %v4417_v33, %v4359_v9  ;;  %v4425_v56 = vmul.f32 %v4417_v33, %v4383_v20  ;;  %v4416_v3 = vmax.f32 %v4412_v57, 0.0  ;;  %v14187_v33 = vld [vmem:[#allocation18_spill] sm:$0xff]  ;;  %v14188_v57 = vld [vmem:[#allocation21_spill] sm:$0xff] }
 0x5ef   :  { %v12827_v44 = vsub.f32 %v4423_v18, %v12822_v21  ;;  %v12868_v15 = vand.u32 4294901760, %v4418_v8  ;;  %v12879_v40 = vsub.f32 %v4419_v51, %v12855_v62  ;;  %v14195_v51 = vld [vmem:[#allocation22_spill] sm:$0xff] }
 0x5f0   :  { %v12829_v55 = vand.u32 4294901760, %v4425_v56  ;;  %v12831_v39 = vand.u32 4294901760, %v4421_v16  ;;  %v4420_v31 = vmul.f32 %v4416_v3, %v4353_v24  ;;  %v4424_v54 = vmul.f32 %v4416_v3, %v4377_v29  ;;  %v14191_v3 = vld [vmem:[#allocation16_spill] sm:$0xff] }
 0x5f1   :  { %v12835_v61 = vsub.f32 %v4422_v22, %v12824_v46  ;;  %v12853_v45 = vand.u32 4294901760, %v12827_v44  ;;  %v12889_v49 = vsub.f32 %v4418_v8, %v12868_v15  ;;  %v12897_v25 = vand.u32 4294901760, %v12879_v40  ;;  %v14186_v22 = vld [vmem:[#allocation38_spill] sm:$0xff]  ;;  %v14198_v8 = vld [vmem:[#allocation27_spill] sm:$0xff] }
 0x5f2   :  { %v4597_v38 = vsub.f32 %v4425_v56, %v12829_v55  ;;  %v12838_v60 = vand.u32 4294901760, %v4424_v54  ;;  %v12840_v9 = vand.u32 4294901760, %v4420_v31  ;;  %10556 = vmatprep.subr.mxu0 %v12829_v55  ;;  %v12846_v24 = vsub.f32 %v4421_v16, %v12831_v39  ;;  %v14189_v16 = vld [vmem:[#allocation5_spill] sm:$0xff]  ;;  %v14190_v56 = vld [vmem:[#allocation23_spill] sm:$0xff] }
 0x5f3   :  { %10557 = vmatpush3.msra.mxu0 %v12829_v55  ;;  %v12866_v53 = vand.u32 4294901760, %v12835_v61  ;;  %v4613_v29 = vsub.f32 %v12827_v44, %v12853_v45  ;;  %v12904_v47 = vand.u32 4294901760, %v12889_v49  ;;  %v4641_v52 = vsub.f32 %v12879_v40, %v12897_v25 }
 0x5f4   :  { %v4604_v50 = vsub.f32 %v4424_v54, %v12838_v60  ;;  %10558 = vmatprep.subr.mxu0 %v12838_v60  ;;  %v12850_v59 = vand.u32 4294901760, %v4597_v38  ;;  %v12859_v48 = vsub.f32 %v4420_v31, %v12840_v9  ;;  %v12876_v1 = vand.u32 4294901760, %v12846_v24  ;;  %v14193_v31 = vld [vmem:[#allocation20_spill] sm:$0xff]  ;;  %v14194_v54 = vld [vmem:[#allocation31_spill] sm:$0xff] }
 0x5f5   :  { %10559 = vmatpush3.msra.mxu0 %v12838_v60  ;;  %v4620_v26 = vsub.f32 %v12835_v61, %v12866_v53  ;;  %v4614_v37 = vand.u32 4294901760, %v4613_v29  ;;  %v4648_v6 = vsub.f32 %v12889_v49, %v12904_v47  ;;  %v4642_v5 = vand.u32 4294901760, %v4641_v52 }
 0x5f6   :  { %10560 = vmatprep.subr.mxu0 %v12822_v21  ;;  %v4599_v20 = vsub.f32 %v4597_v38, %v12850_v59  ;;  %v12863_v43 = vand.u32 4294901760, %v4604_v50  ;;  %v12886_v19 = vand.u32 4294901760, %v12859_v48  ;;  %v4627_v13 = vsub.f32 %v12846_v24, %v12876_v1 }
 0x5f7   :  { %10561 = vmatpush3.msra.mxu0 %v12822_v21  ;;  %v4621_v23 = vand.u32 4294901760, %v4620_v26  ;;  %v4649_v18 = vand.u32 4294901760, %v4648_v6 }
 0x5f8   :  { %10562 = vmatprep.subr.mxu0 %v12824_v46  ;;  %v4600_v30 = vand.u32 4294901760, %v4599_v20  ;;  %v4606_v27 = vsub.f32 %v4604_v50, %v12863_v43  ;;  %v4634_v35 = vsub.f32 %v12859_v48, %v12886_v19  ;;  %v4628_v7 = vand.u32 4294901760, %v4627_v13  ;;  %v14206_v20 = vld [vmem:[#allocation32_spill] sm:$0xff] }
 0x5f9   :  { %10563 = vmatpush3.msra.mxu0 %v12824_v46 }
 0x5fa   :  { %10564 = vmatprep.subr.mxu0 %v12831_v39  ;;  %10584 = vmatprep.subr.mxu1 %v4600_v30  ;;  %v4607_v41 = vand.u32 4294901760, %v4606_v27  ;;  %v4635_v36 = vand.u32 4294901760, %v4634_v35 }
 0x5fb   :  { %10565 = vmatpush3.msra.mxu0 %v12831_v39  ;;  %10585 = vmatpush3.msra.mxu1 %v4600_v30 }
 0x5fc   :  { %10566 = vmatprep.subr.mxu0 %v12840_v9  ;;  %10586 = vmatprep.subr.mxu1 %v4607_v41 }
 0x5fd   :  { %10567 = vmatpush3.msra.mxu0 %v12840_v9  ;;  %10587 = vmatpush3.msra.mxu1 %v4607_v41 }
 0x5fe   :  { %10568 = vmatprep.subr.mxu0 %v12855_v62  ;;  %10588 = vmatprep.subr.mxu1 %v4614_v37 }
 0x5ff   :  { %10569 = vmatpush3.msra.mxu0 %v12855_v62  ;;  %10589 = vmatpush3.msra.mxu1 %v4614_v37 }
 0x600   :  { %10570 = vmatprep.subr.mxu0 %v12868_v15  ;;  %10590 = vmatprep.subr.mxu1 %v4621_v23 }
 0x601   :  { %10571 = vmatpush3.msra.mxu0 %v12868_v15  ;;  %10591 = vmatpush3.msra.mxu1 %v4621_v23 }
 0x602   :  { %10573 = vmatmul.mubr.f32.vlgmr.msra.gmra.mxu0 %v14094_v4  ;;  %10592 = vmatprep.subr.mxu1 %v4628_v7 }
 0x603   :  { %10612 = vmatprep.subr.mxu0 %v4597_v38  ;;  %10593 = vmatpush3.msra.mxu1 %v4628_v7 }
 0x604   :  { %10613 = vmatpush3.msra.mxu0 %v4597_v38  ;;  %10594 = vmatprep.subr.mxu1 %v4635_v36  ;;  %v14197_v38 = vld [vmem:[#allocation6_spill] sm:$0xff] }
 0x605   :  { %10614 = vmatprep.subr.mxu0 %v4604_v50  ;;  %10575 = vmatprep.mubr.f32.mxu0 %v12002_v58 }
 0x606   :  { %10595 = vmatpush3.msra.mxu1 %v4635_v36  ;;  %10615 = vmatpush3.msra.mxu0 %v4604_v50  ;;  %v14200_v50 = vld [vmem:[#allocation33_spill] sm:$0xff] }
 0x607   :  { %10576 = vmatmul.mubr.f32.gmra.mxu0 %v12014_v32  ;;  %10596 = vmatprep.subr.mxu1 %v4642_v5 }
 0x608   :  { %10616 = vmatprep.subr.mxu0 %v12827_v44  ;;  %10597 = vmatpush3.msra.mxu1 %v4642_v5 }
 0x609   :  { %10617 = vmatpush3.msra.mxu0 %v12827_v44  ;;  %10598 = vmatprep.subr.mxu1 %v4649_v18  ;;  %v14192_v44 = vld [vmem:[#allocation28_spill] sm:$0xff] }
 0x60a   :  { %10618 = vmatprep.subr.mxu0 %v12835_v61  ;;  %10578 = vmatprep.mubr.f32.mxu0 %v12027_v42 }
 0x60b   :  { %10599 = vmatpush3.msra.mxu1 %v4649_v18  ;;  %10619 = vmatpush3.msra.mxu0 %v12835_v61  ;;  %v14196_v61 = vld [vmem:[#allocation25_spill] sm:$0xff] }
 0x60c   :  { %10579 = vmatmul.mubr.f32.gmra.mxu0 %v12034_v63  ;;  %10601 = vmatmul.mubr.f32.vlgmr.msra.gmra.mxu1 %v14183_v11 }
 0x60d   :  { %10620 = vmatprep.subr.mxu0 %v12846_v24  ;;  %10640 = vmatprep.subr.mxu1 %v12829_v55 }
 0x60e   :  { %10621 = vmatpush3.msra.mxu0 %v12846_v24  ;;  %10641 = vmatpush3.msra.mxu1 %v12829_v55  ;;  %v14199_v24 = vld [vmem:[#allocation19_spill] sm:$0xff] }
 0x60f   :  { %10622 = vmatprep.subr.mxu0 %v12859_v48  ;;  %10642 = vmatprep.subr.mxu1 %v12838_v60 }
 0x610   :  { %10581 = vmatprep.mubr.f32.mxu0 %v14184_v10  ;;  %10603 = vmatprep.mubr.f32.mxu1 %v14185_v12 }
 0x611   :  { %10623 = vmatpush3.msra.mxu0 %v12859_v48  ;;  %10643 = vmatpush3.msra.mxu1 %v12838_v60  ;;  %v14203_v48 = vld [vmem:[#allocation26_spill] sm:$0xff] }
 0x612   :  { %10582 = vmatmul.mubr.f32.gmra.mxu0 %v14186_v22  ;;  %10604 = vmatmul.mubr.f32.gmra.mxu1 %v14187_v33 }
 0x613   :  { %10624 = vmatprep.subr.mxu0 %v12879_v40  ;;  %10644 = vmatprep.subr.mxu1 %v12822_v21 }
 0x614   :  { %10625 = vmatpush3.msra.mxu0 %v12879_v40  ;;  %10645 = vmatpush3.msra.mxu1 %v12822_v21 }
 0x615   :  { %10626 = vmatprep.subr.mxu0 %v12889_v49  ;;  %10646 = vmatprep.subr.mxu1 %v12824_v46 }
 0x616   :  { %10606 = vmatprep.mubr.f32.mxu1 %v14188_v57  ;;  %10627 = vmatpush3.msra.mxu0 %v12889_v49 }
 0x617   :  { %10628 = vmatprep.mubr.f32.mxu0 %v14189_v16  ;;  %10647 = vmatpush3.msra.mxu1 %v12824_v46 }
 0x618   :  { %10607 = vmatmul.mubr.f32.gmra.mxu1 %v14190_v56  ;;  %10629 = vmatmul.mubr.f32.vlgmr.msra.gmra.mxu0 %v14191_v3 }
 0x619   :  { %10648 = vmatprep.subr.mxu1 %v12831_v39  ;;  %10668 = vmatprep.subr.mxu0 %v12850_v59 }
 0x61a   :  { %10649 = vmatpush3.msra.mxu1 %v12831_v39  ;;  %10669 = vmatpush3.msra.mxu0 %v12850_v59  ;;  %v14201_v59 = vld [vmem:[#allocation24_spill] sm:$0xff] }
 0x61b   :  { %10650 = vmatprep.subr.mxu1 %v12840_v9  ;;  %10670 = vmatprep.subr.mxu0 %v12863_v43 }
 0x61c   :  { %10609 = vmatprep.mubr.f32.mxu1 %v14192_v44  ;;  %10631 = vmatprep.mubr.f32.mxu0 %v14193_v31 }
 0x61d   :  { %10651 = vmatpush3.msra.mxu1 %v12840_v9  ;;  %10671 = vmatpush3.msra.mxu0 %v12863_v43  ;;  %v14207_v43 = vld [vmem:[#allocation35_spill] sm:$0xff] }
 0x61e   :  { %10610 = vmatmul.mubr.f32.gmra.mxu1 %v14194_v54  ;;  %10632 = vmatmul.mubr.f32.gmra.mxu0 %v14195_v51 }
 0x61f   :  { %10652 = vmatprep.subr.mxu1 %v12855_v62  ;;  %10672 = vmatprep.subr.mxu0 %v12853_v45 }
 0x620   :  { %10653 = vmatpush3.msra.mxu1 %v12855_v62  ;;  %10673 = vmatpush3.msra.mxu0 %v12853_v45  ;;  %v14202_v45 = vld [vmem:[#allocation34_spill] sm:$0xff] }
 0x621   :  { %10654 = vmatprep.subr.mxu1 %v12868_v15  ;;  %10674 = vmatprep.subr.mxu0 %v12866_v53 }
 0x622   :  { %10634 = vmatprep.mubr.f32.mxu0 %v14196_v61  ;;  %10655 = vmatpush3.msra.mxu1 %v12868_v15 }
 0x623   :  { %10656 = vmatprep.mubr.f32.mxu1 %v14197_v38  ;;  %10675 = vmatpush3.msra.mxu0 %v12866_v53 }
 0x624   :  { %10635 = vmatmul.mubr.f32.gmra.mxu0 %v14198_v8  ;;  %10657 = vmatmul.mubr.f32.vlgmr.msra.gmra.mxu1 %v14199_v24  ;;  %v14211_v8 = vld [vmem:[#allocation9_spill] sm:$0xff] }
 0x625   :  { %10676 = vmatprep.subr.mxu0 %v12876_v1  ;;  %10696 = vmatprep.subr.mxu1 %v12829_v55 }
 0x626   :  { %10677 = vmatpush3.msra.mxu0 %v12876_v1  ;;  %10697 = vmatpush3.msra.mxu1 %v12829_v55  ;;  %v14204_v55 = vld [vmem:[#allocation30_spill] sm:$0xff] }
 0x627   :  { %10678 = vmatprep.subr.mxu0 %v12886_v19  ;;  %10698 = vmatprep.subr.mxu1 %v12838_v60 }
 0x628   :  { %10637 = vmatprep.mubr.f32.mxu0 %v14200_v50  ;;  %10659 = vmatprep.mubr.f32.mxu1 %v14201_v59  ;;  %v14210_v59 = vld [vmem:[#allocation8_spill] sm:$0xff] }
 0x629   :  { %10679 = vmatpush3.msra.mxu0 %v12886_v19  ;;  %10699 = vmatpush3.msra.mxu1 %v12838_v60  ;;  %v14205_v60 = vld [vmem:[#allocation4_spill] sm:$0xff] }
 0x62a   :  { %10638 = vmatmul.mubr.f32.gmra.mxu0 %v14202_v45  ;;  %10660 = vmatmul.mubr.f32.gmra.mxu1 %v14203_v48 }
 0x62b   :  { %10680 = vmatprep.subr.mxu0 %v12897_v25  ;;  %10700 = vmatprep.subr.mxu1 %v12822_v21 }
 0x62c   :  { %10681 = vmatpush3.msra.mxu0 %v12897_v25  ;;  %10701 = vmatpush3.msra.mxu1 %v12822_v21  ;;  %v14208_v21 = vld [vmem:[#allocation36_spill] sm:$0xff] }
 0x62d   :  { %10682 = vmatprep.subr.mxu0 %v12904_v47  ;;  %10702 = vmatprep.subr.mxu1 %v12824_v46 }
 0x62e   :  { %10662 = vmatprep.mubr.f32.mxu1 %v14204_v55  ;;  %10683 = vmatpush3.msra.mxu0 %v12904_v47 }
 0x62f   :  { %10684 = vmatprep.mubr.f32.mxu0 %v14205_v60  ;;  %10703 = vmatpush3.msra.mxu1 %v12824_v46  ;;  %v14209_v46 = vld [vmem:[#allocation7_spill] sm:$0xff] }
 0x630   :  { %10663 = vmatmul.mubr.f32.gmra.mxu1 %v14206_v20  ;;  %10685 = vmatmul.mubr.f32.vlgmr.msra.gmra.mxu0 %v14183_v11 }
 0x631   :  { %10704 = vmatprep.subr.mxu1 %v12831_v39  ;;  %10665 = vmatprep.mubr.f32.mxu1 %v14207_v43 }
 0x632   :  { %10705 = vmatpush3.msra.mxu1 %v12831_v39  ;;  %10687 = vmatprep.mubr.f32.mxu0 %v14185_v12 }
 0x633   :  { %10706 = vmatprep.subr.mxu1 %v12840_v9 }
 0x634   :  { %10707 = vmatpush3.msra.mxu1 %v12840_v9  ;;  %10688 = vmatmul.mubr.f32.gmra.mxu0 %v14187_v33 }
 0x635   :  { %10666 = vmatmul.mubr.f32.gmra.mxu1 %v14208_v21  ;;  %10708 = vmatprep.subr.mxu1 %v12855_v62 }
 0x636   :  { %10709 = vmatpush3.msra.mxu1 %v12855_v62  ;;  %10690 = vmatprep.mubr.f32.mxu0 %v14188_v57 }
 0x637   :  { %10710 = vmatprep.subr.mxu1 %v12868_v15  ;;  %10712 = vmatprep.mubr.f32.mxu1 %v14205_v60 }
 0x638   :  { %10711 = vmatpush3.msra.mxu1 %v12868_v15  ;;  %10691 = vmatmul.mubr.f32.gmra.mxu0 %v14190_v56 }
 0x639   :  { %10713 = vmatmul.mubr.f32.vlgmr.msra.gmra.mxu1 %v14183_v11  ;;  %10693 = vmatprep.mubr.f32.mxu0 %v14192_v44 }
 0x63a   :  { %10715 = vmatprep.mubr.f32.mxu1 %v14185_v12 }
 0x63c   :  { %10694 = vmatmul.mubr.f32.gmra.mxu0 %v14194_v54 }
 0x63d   :  { %10716 = vmatmul.mubr.f32.gmra.mxu1 %v14187_v33  ;;  %10740 = vmatprep.mubr.f32.mxu0 %v14209_v46 }
 0x63e   :  { %10718 = vmatprep.mubr.f32.mxu1 %v14188_v57 }
 0x641   :  { %10719 = vmatmul.mubr.f32.gmra.mxu1 %v14190_v56 }
 0x642   :  { %10721 = vmatprep.mubr.f32.mxu1 %v14192_v44  ;;  %v14212_v44 = vld [vmem:[#allocation11_spill] sm:$0xff] }
 0x645   :  { %10722 = vmatmul.mubr.f32.gmra.mxu1 %v14194_v54 }
 0x646   :  { %10768 = vmatprep.mubr.f32.mxu1 %v14205_v60 }
 0x6c2   :  { %v10574_v39 = vpop.f32.mrf.mxu0 }
 0x6c3   :  { %v4516_v50 = vadd.f32 %v10574_v39, %v14210_v59 }
 0x6c4   :  { %v4505_v9 = vpop.f32.mrf.mxu0 }
 0x6c5   :  { %v4506_v38 = vadd.f32 %v4505_v9, %v14211_v8 }
 0x6c7   :  { %v10577_v62 = vpop.f32.mrf.mxu0 }
 0x6c8   :  { %v4536_v3 = vadd.f32 %v10577_v62, %v14212_v44 }
 0x6c9   :  { %v4525_v53 = vpop.f32.mrf.mxu0 }
 0x6ca   :  { %v4526_v12 = vadd.f32 %v4525_v53, %v11807_v2 }
 0x6cc   :  { %v10580_v15 = vpop.f32.mrf.mxu0  ;;  %v10602_v30 = vpop.f32.mrf.mxu1 }
 0x6cd   :  { %v4556_v51 = vadd.f32 %v10580_v15, %v14121_v17  ;;  %v4693_v54 = vadd.f32 %v10602_v30, %v4516_v50 }
 0x6ce   :  { %v4545_v27 = vpop.f32.mrf.mxu0  ;;  %v4686_v29 = vpop.f32.mrf.mxu1 }
 0x6cf   :  { %v4687_v56 = vadd.f32 %v4686_v29, %v4506_v38  ;;  %v4546_v57 = vadd.f32 %v4545_v27, %v11801_v0 }
 0x6d2   :  { %v10583_v1 = vpop.f32.mrf.mxu0  ;;  %v10605_v40 = vpop.f32.mrf.mxu1 }
 0x6d3   :  { %v4705_v10 = vadd.f32 %v10605_v40, %v4536_v3  ;;  %v4576_v9 = vadd.f32 %v10583_v1, %v14091_v28 }
 0x6d4   :  { %v4565_v41 = vpop.f32.mrf.mxu0  ;;  %v4698_v26 = vpop.f32.mrf.mxu1 }
 0x6d5   :  { %v4566_v30 = vadd.f32 %v4565_v41, %v14092_v14  ;;  %v4699_v62 = vadd.f32 %v4698_v26, %v4526_v12 }
 0x6d8   :  { %v10608_v19 = vpop.f32.mrf.mxu1  ;;  %v10630_v49 = vpop.f32.mrf.mxu0 }
 0x6d9   :  { %v4717_v33 = vadd.f32 %v10608_v19, %v4556_v51  ;;  %v4824_v22 = vadd.f32 %v10630_v49, %v4693_v54 }
 0x6da   :  { %v4710_v37 = vpop.f32.mrf.mxu1  ;;  %v4816_v13 = vpop.f32.mrf.mxu0 }
 0x6db   :  { %v4817_v39 = vadd.f32 %v4816_v13, %v4687_v56  ;;  %v4711_v8 = vadd.f32 %v4710_v37, %v4546_v57 }
 0x6de   :  { %v10611_v25 = vpop.f32.mrf.mxu1  ;;  %v10633_v23 = vpop.f32.mrf.mxu0 }
 0x6df   :  { %v4838_v38 = vadd.f32 %v10633_v23, %v4705_v10  ;;  %v4729_v27 = vadd.f32 %v10611_v25, %v4576_v9 }
 0x6e0   :  { %v4722_v35 = vpop.f32.mrf.mxu1  ;;  %v4830_v47 = vpop.f32.mrf.mxu0 }
 0x6e1   :  { %v4723_v53 = vadd.f32 %v4722_v35, %v4566_v30  ;;  %v4831_v3 = vadd.f32 %v4830_v47, %v4699_v62 }
 0x6e4   :  { %v10636_v7 = vpop.f32.mrf.mxu0  ;;  %v10658_v52 = vpop.f32.mrf.mxu1 }
 0x6e5   :  { %v4852_v15 = vadd.f32 %v10636_v7, %v4717_v33  ;;  %v4955_v50 = vadd.f32 %v10658_v52, %v4824_v22 }
 0x6e6   :  { %v4844_v36 = vpop.f32.mrf.mxu0  ;;  %v4946_v6 = vpop.f32.mrf.mxu1 }
 0x6e7   :  { %v4947_v29 = vadd.f32 %v4946_v6, %v4817_v39  ;;  %v4845_v51 = vadd.f32 %v4844_v36, %v4711_v8 }
 0x6ea   :  { %v10639_v5 = vpop.f32.mrf.mxu0  ;;  %v10661_v18 = vpop.f32.mrf.mxu1 }
 0x6eb   :  { %v4971_v56 = vadd.f32 %v10661_v18, %v4838_v38  ;;  %v4866_v1 = vadd.f32 %v10639_v5, %v4729_v27 }
 0x6ec   :  { %v4858_v46 = vpop.f32.mrf.mxu0  ;;  %v4962_v21 = vpop.f32.mrf.mxu1 }
 0x6ed   :  { %v4859_v41 = vadd.f32 %v4858_v46, %v4723_v53  ;;  %v4963_v12 = vadd.f32 %v4962_v21, %v4831_v3 }
 0x6f0   :  { %v10664_v43 = vpop.f32.mrf.mxu1  ;;  %v10686_v20 = vpop.f32.mrf.mxu0 }
 0x6f1   :  { %v4987_v54 = vadd.f32 %v10664_v43, %v4852_v15  ;;  %v5104_v19 = vadd.f32 %v10686_v20, %v4955_v50 }
 0x6f2   :  { %v4978_v60 = vpop.f32.mrf.mxu1  ;;  %v5097_v55 = vpop.f32.mrf.mxu0 }
 0x6f3   :  { %v5098_v40 = vadd.f32 %v5097_v55, %v4947_v29  ;;  %v4979_v57 = vadd.f32 %v4978_v60, %v4845_v51 }
 0x6f4   :  { %v10689_v48 = vpop.f32.mrf.mxu0 }
 0x6f5   :  { %v10667_v45 = vpop.f32.mrf.mxu1  ;;  %v5116_v10 = vadd.f32 %v10689_v48, %v4971_v56 }
 0x6f6   :  { %v5109_v24 = vpop.f32.mrf.mxu0  ;;  %v5003_v8 = vadd.f32 %v10667_v45, %v4866_v1 }
 0x6f7   :  { %v4994_v61 = vpop.f32.mrf.mxu1  ;;  %v5110_v23 = vadd.f32 %v5109_v24, %v4963_v12 }
 0x6f8   :  { %v10692_v31 = vpop.f32.mrf.mxu0  ;;  %v4995_v25 = vadd.f32 %v4994_v61, %v4859_v41 }
 0x6f9   :  { %v10714_v16 = vpop.f32.mrf.mxu1  ;;  %v5128_v33 = vadd.f32 %v10692_v31, %v4987_v54 }
 0x6fa   :  { %v5121_v59 = vpop.f32.mrf.mxu0  ;;  %v13028_v22 = vadd.f32 %v10714_v16, %v5104_v19 }
 0x6fb   :  { %v5218_v11 = vpop.f32.mrf.mxu1  ;;  %v5122_v43 = vadd.f32 %v5121_v59, %v4979_v57 }
 0x6fc   :  { %v10695_v49 = vpop.f32.mrf.mxu0  ;;  %v13030_v26 = vadd.f32 %v5218_v11, %v5098_v40  ;;  %v5265_v60 = vmul.f32 %v13028_v22, %v13028_v22 }
 0x6fd   :  { %v10717_v44 = vpop.f32.mrf.mxu1  ;;  %v5140_v31 = vadd.f32 %v10695_v49, %v5003_v8 }
 0x6fe   :  { %v5237_v35 = vadd.f32 %v10717_v44, %v5116_v10  ;;  %v5133_v55 = vpop.f32.mrf.mxu0  ;;  %v5264_v48 = vmul.f32 %v13030_v26, %v13030_v26 }
 0x6ff   :  { %v5230_v13 = vpop.f32.mrf.mxu1  ;;  %v5134_v46 = vadd.f32 %v5133_v55, %v4995_v25 }
 0x700   :  { %v5231_v11 = vadd.f32 %v5230_v13, %v5110_v23  ;;  %v5267_v61 = vmul.f32 %v5237_v35, %v5237_v35 }
 0x701   :  { %v10720_v37 = vpop.f32.mrf.mxu1 }
 0x702   :  { %v5249_v20 = vadd.f32 %v10720_v37, %v5128_v33  ;;  %v5266_v18 = vmul.f32 %v5231_v11, %v5231_v11 }
 0x703   :  { %v5242_v47 = vpop.f32.mrf.mxu1 }
 0x704   :  { %v5269_v16 = vmul.f32 %v5249_v20, %v5249_v20  ;;  %v5243_v7 = vadd.f32 %v5242_v47, %v5122_v43 }
 0x705   :  { %v10723_v21 = vpop.f32.mrf.mxu1 }
 0x706   :  { %v5273_v45 = vadd.f32 %v5269_v16, %v5265_v60  ;;  %v5268_v59 = vmul.f32 %v5243_v7, %v5243_v7  ;;  %v5261_v52 = vadd.f32 %v10723_v21, %v5140_v31 }
 0x707   :  { %v5254_v24 = vpop.f32.mrf.mxu1 }
 0x708   :  { %v5277_v44 = vadd.f32 1e-30, %v5273_v45  ;;  %v5272_v36 = vadd.f32 %v5268_v59, %v5264_v48  ;;  %v5271_v6 = vmul.f32 %v5261_v52, %v5261_v52  ;;  %v5255_v5 = vadd.f32 %v5254_v24, %v5134_v46 }
 0x70a   :  { %11436 = vrsqrt.f32 %v5277_v44  ;;  %v5276_v39 = vadd.f32 1e-30, %v5272_v36  ;;  %v5275_v9 = vadd.f32 %v5271_v6, %v5267_v61  ;;  %v5270_v15 = vmul.f32 %v5255_v5, %v5255_v5 }
 0x70c   :  { %11438 = vrsqrt.f32 %v5276_v39  ;;  %v5279_v50 = vadd.f32 1e-30, %v5275_v9  ;;  %v5274_v30 = vadd.f32 %v5270_v15, %v5266_v18 }
 0x70e   :  { %11440 = vrsqrt.f32 %v5279_v50  ;;  %v5278_v62 = vadd.f32 1e-30, %v5274_v30 }
 0x710   :  { %11442 = vrsqrt.f32 %v5278_v62 }
 0x717   :  { %v11437_v38 = vpop.eup %11436 }
 0x718   :  { %v5285_v29 = vmul.f32 %v11437_v38, %v14093_v34 }
 0x719   :  { %v11439_v27 = vpop.eup %11438 }
 0x71a   :  { %v5289_v51 = vsub.f32 1.0, %v5285_v29  ;;  %v5284_v54 = vmul.f32 %v11439_v27, %v14093_v34 }
 0x71b   :  { %v11441_v19 = vpop.eup %11440 }
 0x71c   :  { %v5293_v53 = vmax.f32 %v5289_v51, 0.0  ;;  %v5288_v3 = vsub.f32 1.0, %v5284_v54  ;;  %v5287_v56 = vmul.f32 %v11441_v19, %v14093_v34 }
 0x71d   :  { %v11443_v40 = vpop.eup %11442 }
 0x71e   :  { %v5301_v49 = vmul.f32 %v5293_v53, %v5249_v20  ;;  %v5292_v13 = vmax.f32 %v5288_v3, 0.0  ;;  %v5291_v1 = vsub.f32 1.0, %v5287_v56  ;;  %v5286_v57 = vmul.f32 %v11443_v40, %v14093_v34 }
 0x71f   :  { %v5297_v31 = vmul.f32 %v5293_v53, %v13028_v22 }
 0x720   :  { %v13040_v33 = vand.u32 4294901760, %v5301_v49  ;;  %v5300_v41 = vmul.f32 %v5292_v13, %v5243_v7  ;;  %v5295_v12 = vmax.f32 %v5291_v1, 0.0  ;;  %v5290_v10 = vsub.f32 1.0, %v5286_v57  ;;  %v14214_v1 = vld [vmem:[#allocation37_spill] sm:$0xff] }
 0x721   :  { %v5296_v21 = vmul.f32 %v5292_v13, %v13030_v26  ;;  %v13073_v59 = vand.u32 4294901760, %v5297_v31  ;;  %v14213_v13 = vld [vmem:[#allocation15_spill] sm:$0xff]  ;;  %v14215_v57 = vld [vmem:[#allocation17_spill] sm:$0xff] }
 0x722   :  { %v13042_v37 = vand.u32 4294901760, %v5300_v41  ;;  %v5299_v8 = vmul.f32 %v5295_v12, %v5237_v35  ;;  %v5303_v43 = vmul.f32 %v5295_v12, %v5261_v52  ;;  %v5294_v25 = vmax.f32 %v5290_v10, 0.0  ;;  %v14217_v12 = vld [vmem:[#allocation18_spill] sm:$0xff]  ;;  %v14218_v10 = vld [vmem:[#allocation21_spill] sm:$0xff] }
 0x723   :  { %v13045_v23 = vsub.f32 %v5301_v49, %v13040_v33  ;;  %v13086_v44 = vand.u32 4294901760, %v5296_v21  ;;  %v13097_v39 = vsub.f32 %v5297_v31, %v13073_v59  ;;  %v14225_v31 = vld [vmem:[#allocation22_spill] sm:$0xff] }
 0x724   :  { %v13047_v55 = vand.u32 4294901760, %v5303_v43  ;;  %v13049_v20 = vand.u32 4294901760, %v5299_v8  ;;  %v5298_v47 = vmul.f32 %v5294_v25, %v5231_v11  ;;  %v5302_v60 = vmul.f32 %v5294_v25, %v5255_v5  ;;  %v14221_v25 = vld [vmem:[#allocation16_spill] sm:$0xff] }
 0x725   :  { %v13053_v16 = vsub.f32 %v5300_v41, %v13042_v37  ;;  %v13071_v45 = vand.u32 4294901760, %v13045_v23  ;;  %v13107_v30 = vsub.f32 %v5296_v21, %v13086_v44  ;;  %v13115_v29 = vand.u32 4294901760, %v13097_v39  ;;  %v14216_v41 = vld [vmem:[#allocation38_spill] sm:$0xff]  ;;  %v14228_v21 = vld [vmem:[#allocation27_spill] sm:$0xff] }
 0x726   :  { %v5475_v7 = vsub.f32 %v5303_v43, %v13047_v55  ;;  %v13056_v48 = vand.u32 4294901760, %v5302_v60  ;;  %v13058_v35 = vand.u32 4294901760, %v5298_v47  ;;  %10724 = vmatprep.subr.mxu0 %v13047_v55  ;;  %v13064_v11 = vsub.f32 %v5299_v8, %v13049_v20  ;;  %v14219_v8 = vld [vmem:[#allocation5_spill] sm:$0xff]  ;;  %v14220_v43 = vld [vmem:[#allocation23_spill] sm:$0xff] }
 0x727   :  { %10725 = vmatpush3.msra.mxu0 %v13047_v55  ;;  %v13084_v24 = vand.u32 4294901760, %v13053_v16  ;;  %v5491_v5 = vsub.f32 %v13045_v23, %v13071_v45  ;;  %v13122_v54 = vand.u32 4294901760, %v13107_v30  ;;  %v5519_v53 = vsub.f32 %v13097_v39, %v13115_v29 }
 0x728   :  { %v5482_v22 = vsub.f32 %v5302_v60, %v13056_v48  ;;  %10726 = vmatprep.subr.mxu0 %v13056_v48  ;;  %v13068_v46 = vand.u32 4294901760, %v5475_v7  ;;  %v13077_v26 = vsub.f32 %v5298_v47, %v13058_v35  ;;  %v13094_v18 = vand.u32 4294901760, %v13064_v11  ;;  %v14223_v47 = vld [vmem:[#allocation20_spill] sm:$0xff]  ;;  %v14224_v60 = vld [vmem:[#allocation31_spill] sm:$0xff] }
 0x729   :  { %10727 = vmatpush3.msra.mxu0 %v13056_v48  ;;  %v5498_v15 = vsub.f32 %v13053_v16, %v13084_v24  ;;  %v5492_v62 = vand.u32 4294901760, %v5491_v5  ;;  %v5526_v56 = vsub.f32 %v13107_v30, %v13122_v54  ;;  %v5520_v40 = vand.u32 4294901760, %v5519_v53 }
 0x72a   :  { %10728 = vmatprep.subr.mxu0 %v13040_v33  ;;  %v5477_v52 = vsub.f32 %v5475_v7, %v13068_v46  ;;  %v13081_v61 = vand.u32 4294901760, %v5482_v22  ;;  %v13104_v50 = vand.u32 4294901760, %v13077_v26  ;;  %v5505_v38 = vsub.f32 %v13064_v11, %v13094_v18 }
 0x72b   :  { %10729 = vmatpush3.msra.mxu0 %v13040_v33  ;;  %v5499_v27 = vand.u32 4294901760, %v5498_v15  ;;  %v5527_v49 = vand.u32 4294901760, %v5526_v56 }
 0x72c   :  { %10730 = vmatprep.subr.mxu0 %v13042_v37  ;;  %v5478_v36 = vand.u32 4294901760, %v5477_v52  ;;  %v5484_v6 = vsub.f32 %v5482_v22, %v13081_v61  ;;  %v5512_v51 = vsub.f32 %v13077_v26, %v13104_v50  ;;  %v5506_v19 = vand.u32 4294901760, %v5505_v38  ;;  %v14236_v52 = vld [vmem:[#allocation32_spill] sm:$0xff] }
 0x72d   :  { %10731 = vmatpush3.msra.mxu0 %v13042_v37 }
 0x72e   :  { %10732 = vmatprep.subr.mxu0 %v13049_v20  ;;  %10752 = vmatprep.subr.mxu1 %v5478_v36  ;;  %v5485_v9 = vand.u32 4294901760, %v5484_v6  ;;  %v5513_v3 = vand.u32 4294901760, %v5512_v51 }
 0x72f   :  { %10733 = vmatpush3.msra.mxu0 %v13049_v20  ;;  %10753 = vmatpush3.msra.mxu1 %v5478_v36 }
 0x730   :  { %10734 = vmatprep.subr.mxu0 %v13058_v35  ;;  %10754 = vmatprep.subr.mxu1 %v5485_v9 }
 0x731   :  { %10735 = vmatpush3.msra.mxu0 %v13058_v35  ;;  %10755 = vmatpush3.msra.mxu1 %v5485_v9 }
 0x732   :  { %10736 = vmatprep.subr.mxu0 %v13073_v59  ;;  %10756 = vmatprep.subr.mxu1 %v5492_v62 }
 0x733   :  { %10737 = vmatpush3.msra.mxu0 %v13073_v59  ;;  %10757 = vmatpush3.msra.mxu1 %v5492_v62 }
 0x734   :  { %10738 = vmatprep.subr.mxu0 %v13086_v44  ;;  %10758 = vmatprep.subr.mxu1 %v5499_v27 }
 0x735   :  { %10739 = vmatpush3.msra.mxu0 %v13086_v44  ;;  %10759 = vmatpush3.msra.mxu1 %v5499_v27 }
 0x736   :  { %10741 = vmatmul.mubr.f32.vlgmr.msra.gmra.mxu0 %v14094_v4  ;;  %10760 = vmatprep.subr.mxu1 %v5506_v19 }
 0x737   :  { %10780 = vmatprep.subr.mxu0 %v5475_v7  ;;  %10761 = vmatpush3.msra.mxu1 %v5506_v19 }
 0x738   :  { %10781 = vmatpush3.msra.mxu0 %v5475_v7  ;;  %10762 = vmatprep.subr.mxu1 %v5513_v3  ;;  %v14227_v7 = vld [vmem:[#allocation6_spill] sm:$0xff] }
 0x739   :  { %10782 = vmatprep.subr.mxu0 %v5482_v22  ;;  %10743 = vmatprep.mubr.f32.mxu0 %v12002_v58 }
 0x73a   :  { %10763 = vmatpush3.msra.mxu1 %v5513_v3  ;;  %10783 = vmatpush3.msra.mxu0 %v5482_v22  ;;  %v14230_v22 = vld [vmem:[#allocation33_spill] sm:$0xff] }
 0x73b   :  { %10744 = vmatmul.mubr.f32.gmra.mxu0 %v12014_v32  ;;  %10764 = vmatprep.subr.mxu1 %v5520_v40 }
 0x73c   :  { %10784 = vmatprep.subr.mxu0 %v13045_v23  ;;  %10765 = vmatpush3.msra.mxu1 %v5520_v40 }
 0x73d   :  { %10785 = vmatpush3.msra.mxu0 %v13045_v23  ;;  %10766 = vmatprep.subr.mxu1 %v5527_v49  ;;  %v14222_v23 = vld [vmem:[#allocation28_spill] sm:$0xff] }
 0x73e   :  { %10786 = vmatprep.subr.mxu0 %v13053_v16  ;;  %10746 = vmatprep.mubr.f32.mxu0 %v12027_v42 }
 0x73f   :  { %10767 = vmatpush3.msra.mxu1 %v5527_v49  ;;  %10787 = vmatpush3.msra.mxu0 %v13053_v16  ;;  %v14226_v16 = vld [vmem:[#allocation25_spill] sm:$0xff] }
 0x740   :  { %10747 = vmatmul.mubr.f32.gmra.mxu0 %v12034_v63  ;;  %10769 = vmatmul.mubr.f32.vlgmr.msra.gmra.mxu1 %v14213_v13 }
 0x741   :  { %10788 = vmatprep.subr.mxu0 %v13064_v11  ;;  %10808 = vmatprep.subr.mxu1 %v13047_v55 }
 0x742   :  { %10789 = vmatpush3.msra.mxu0 %v13064_v11  ;;  %10809 = vmatpush3.msra.mxu1 %v13047_v55  ;;  %v14229_v11 = vld [vmem:[#allocation19_spill] sm:$0xff] }
 0x743   :  { %10790 = vmatprep.subr.mxu0 %v13077_v26  ;;  %10810 = vmatprep.subr.mxu1 %v13056_v48 }
 0x744   :  { %10749 = vmatprep.mubr.f32.mxu0 %v14214_v1  ;;  %10771 = vmatprep.mubr.f32.mxu1 %v14215_v57 }
 0x745   :  { %10791 = vmatpush3.msra.mxu0 %v13077_v26  ;;  %10811 = vmatpush3.msra.mxu1 %v13056_v48  ;;  %v14233_v26 = vld [vmem:[#allocation26_spill] sm:$0xff] }
 0x746   :  { %10750 = vmatmul.mubr.f32.gmra.mxu0 %v14216_v41  ;;  %10772 = vmatmul.mubr.f32.gmra.mxu1 %v14217_v12 }
 0x747   :  { %10792 = vmatprep.subr.mxu0 %v13097_v39  ;;  %10812 = vmatprep.subr.mxu1 %v13040_v33 }
 0x748   :  { %10793 = vmatpush3.msra.mxu0 %v13097_v39  ;;  %10813 = vmatpush3.msra.mxu1 %v13040_v33 }
 0x749   :  { %10794 = vmatprep.subr.mxu0 %v13107_v30  ;;  %10814 = vmatprep.subr.mxu1 %v13042_v37 }
 0x74a   :  { %10774 = vmatprep.mubr.f32.mxu1 %v14218_v10  ;;  %10795 = vmatpush3.msra.mxu0 %v13107_v30 }
 0x74b   :  { %10796 = vmatprep.mubr.f32.mxu0 %v14219_v8  ;;  %10815 = vmatpush3.msra.mxu1 %v13042_v37 }
 0x74c   :  { %10775 = vmatmul.mubr.f32.gmra.mxu1 %v14220_v43  ;;  %10797 = vmatmul.mubr.f32.vlgmr.msra.gmra.mxu0 %v14221_v25 }
 0x74d   :  { %10816 = vmatprep.subr.mxu1 %v13049_v20  ;;  %10836 = vmatprep.subr.mxu0 %v13068_v46 }
 0x74e   :  { %10817 = vmatpush3.msra.mxu1 %v13049_v20  ;;  %10837 = vmatpush3.msra.mxu0 %v13068_v46  ;;  %v14231_v46 = vld [vmem:[#allocation24_spill] sm:$0xff] }
 0x74f   :  { %10818 = vmatprep.subr.mxu1 %v13058_v35  ;;  %10838 = vmatprep.subr.mxu0 %v13081_v61 }
 0x750   :  { %10777 = vmatprep.mubr.f32.mxu1 %v14222_v23  ;;  %10799 = vmatprep.mubr.f32.mxu0 %v14223_v47 }
 0x751   :  { %10819 = vmatpush3.msra.mxu1 %v13058_v35  ;;  %10839 = vmatpush3.msra.mxu0 %v13081_v61  ;;  %v14237_v61 = vld [vmem:[#allocation35_spill] sm:$0xff] }
 0x752   :  { %10778 = vmatmul.mubr.f32.gmra.mxu1 %v14224_v60  ;;  %10800 = vmatmul.mubr.f32.gmra.mxu0 %v14225_v31 }
 0x753   :  { %10820 = vmatprep.subr.mxu1 %v13073_v59  ;;  %10840 = vmatprep.subr.mxu0 %v13071_v45 }
 0x754   :  { %10821 = vmatpush3.msra.mxu1 %v13073_v59  ;;  %10841 = vmatpush3.msra.mxu0 %v13071_v45  ;;  %v14232_v45 = vld [vmem:[#allocation34_spill] sm:$0xff] }
 0x755   :  { %10822 = vmatprep.subr.mxu1 %v13086_v44  ;;  %10842 = vmatprep.subr.mxu0 %v13084_v24 }
 0x756   :  { %10802 = vmatprep.mubr.f32.mxu0 %v14226_v16  ;;  %10823 = vmatpush3.msra.mxu1 %v13086_v44 }
 0x757   :  { %10824 = vmatprep.mubr.f32.mxu1 %v14227_v7  ;;  %10843 = vmatpush3.msra.mxu0 %v13084_v24 }
 0x758   :  { %10803 = vmatmul.mubr.f32.gmra.mxu0 %v14228_v21  ;;  %10825 = vmatmul.mubr.f32.vlgmr.msra.gmra.mxu1 %v14229_v11  ;;  %v14241_v21 = vld [vmem:[#allocation9_spill] sm:$0xff] }
 0x759   :  { %10844 = vmatprep.subr.mxu0 %v13094_v18  ;;  %10864 = vmatprep.subr.mxu1 %v13047_v55 }
 0x75a   :  { %10845 = vmatpush3.msra.mxu0 %v13094_v18  ;;  %10865 = vmatpush3.msra.mxu1 %v13047_v55  ;;  %v14234_v55 = vld [vmem:[#allocation30_spill] sm:$0xff] }
 0x75b   :  { %10846 = vmatprep.subr.mxu0 %v13104_v50  ;;  %10866 = vmatprep.subr.mxu1 %v13056_v48 }
 0x75c   :  { %10805 = vmatprep.mubr.f32.mxu0 %v14230_v22  ;;  %10827 = vmatprep.mubr.f32.mxu1 %v14231_v46  ;;  %v14240_v46 = vld [vmem:[#allocation8_spill] sm:$0xff] }
 0x75d   :  { %10847 = vmatpush3.msra.mxu0 %v13104_v50  ;;  %10867 = vmatpush3.msra.mxu1 %v13056_v48  ;;  %v14235_v48 = vld [vmem:[#allocation4_spill] sm:$0xff] }
 0x75e   :  { %10806 = vmatmul.mubr.f32.gmra.mxu0 %v14232_v45  ;;  %10828 = vmatmul.mubr.f32.gmra.mxu1 %v14233_v26 }
 0x75f   :  { %10848 = vmatprep.subr.mxu0 %v13115_v29  ;;  %10868 = vmatprep.subr.mxu1 %v13040_v33 }
 0x760   :  { %10849 = vmatpush3.msra.mxu0 %v13115_v29  ;;  %10869 = vmatpush3.msra.mxu1 %v13040_v33  ;;  %v14238_v33 = vld [vmem:[#allocation36_spill] sm:$0xff] }
 0x761   :  { %10850 = vmatprep.subr.mxu0 %v13122_v54  ;;  %10870 = vmatprep.subr.mxu1 %v13042_v37 }
 0x762   :  { %10830 = vmatprep.mubr.f32.mxu1 %v14234_v55  ;;  %10851 = vmatpush3.msra.mxu0 %v13122_v54 }
 0x763   :  { %10852 = vmatprep.mubr.f32.mxu0 %v14235_v48  ;;  %10871 = vmatpush3.msra.mxu1 %v13042_v37  ;;  %v14239_v37 = vld [vmem:[#allocation7_spill] sm:$0xff] }
 0x764   :  { %10831 = vmatmul.mubr.f32.gmra.mxu1 %v14236_v52  ;;  %10853 = vmatmul.mubr.f32.vlgmr.msra.gmra.mxu0 %v14213_v13 }
 0x765   :  { %10872 = vmatprep.subr.mxu1 %v13049_v20  ;;  %10833 = vmatprep.mubr.f32.mxu1 %v14237_v61 }
 0x766   :  { %10873 = vmatpush3.msra.mxu1 %v13049_v20  ;;  %10855 = vmatprep.mubr.f32.mxu0 %v14215_v57 }
 0x767   :  { %10874 = vmatprep.subr.mxu1 %v13058_v35 }
 0x768   :  { %10875 = vmatpush3.msra.mxu1 %v13058_v35  ;;  %10856 = vmatmul.mubr.f32.gmra.mxu0 %v14217_v12 }
 0x769   :  { %10834 = vmatmul.mubr.f32.gmra.mxu1 %v14238_v33  ;;  %10876 = vmatprep.subr.mxu1 %v13073_v59 }
 0x76a   :  { %10877 = vmatpush3.msra.mxu1 %v13073_v59  ;;  %10858 = vmatprep.mubr.f32.mxu0 %v14218_v10 }
 0x76b   :  { %10878 = vmatprep.subr.mxu1 %v13086_v44  ;;  %10880 = vmatprep.mubr.f32.mxu1 %v14235_v48 }
 0x76c   :  { %10879 = vmatpush3.msra.mxu1 %v13086_v44  ;;  %10859 = vmatmul.mubr.f32.gmra.mxu0 %v14220_v43 }
 0x76d   :  { %10881 = vmatmul.mubr.f32.vlgmr.msra.gmra.mxu1 %v14213_v13  ;;  %10861 = vmatprep.mubr.f32.mxu0 %v14222_v23 }
 0x76e   :  { %10883 = vmatprep.mubr.f32.mxu1 %v14215_v57 }
 0x770   :  { %10862 = vmatmul.mubr.f32.gmra.mxu0 %v14224_v60 }
 0x771   :  { %10884 = vmatmul.mubr.f32.gmra.mxu1 %v14217_v12  ;;  %10908 = vmatprep.mubr.f32.mxu0 %v14239_v37 }
 0x772   :  { %10886 = vmatprep.mubr.f32.mxu1 %v14218_v10 }
 0x775   :  { %10887 = vmatmul.mubr.f32.gmra.mxu1 %v14220_v43 }
 0x776   :  { %10889 = vmatprep.mubr.f32.mxu1 %v14222_v23  ;;  %v14242_v23 = vld [vmem:[#allocation11_spill] sm:$0xff] }
 0x779   :  { %10890 = vmatmul.mubr.f32.gmra.mxu1 %v14224_v60 }
 0x77a   :  { %10936 = vmatprep.mubr.f32.mxu1 %v14235_v48 }
 0x7f6   :  { %v10742_v20 = vpop.f32.mrf.mxu0 }
 0x7f7   :  { %v5394_v22 = vadd.f32 %v10742_v20, %v14240_v46 }
 0x7f8   :  { %v5383_v35 = vpop.f32.mrf.mxu0 }
 0x7f9   :  { %v5384_v7 = vadd.f32 %v5383_v35, %v14241_v21 }
 0x7fb   :  { %v10745_v59 = vpop.f32.mrf.mxu0 }
 0x7fc   :  { %v5414_v25 = vadd.f32 %v10745_v59, %v14242_v23 }
 0x7fd   :  { %v5403_v24 = vpop.f32.mrf.mxu0 }
 0x7fe   :  { %v5404_v57 = vadd.f32 %v5403_v24, %v11807_v2 }
 0x800   :  { %v10748_v44 = vpop.f32.mrf.mxu0  ;;  %v10770_v36 = vpop.f32.mrf.mxu1 }
 0x801   :  { %v5434_v31 = vadd.f32 %v10748_v44, %v14121_v17  ;;  %v5571_v60 = vadd.f32 %v10770_v36, %v5394_v22 }
 0x802   :  { %v5423_v6 = vpop.f32.mrf.mxu0  ;;  %v5564_v5 = vpop.f32.mrf.mxu1 }
 0x803   :  { %v5565_v43 = vadd.f32 %v5564_v5, %v5384_v7  ;;  %v5424_v10 = vadd.f32 %v5423_v6, %v11801_v0 }
 0x806   :  { %v10751_v18 = vpop.f32.mrf.mxu0  ;;  %v10773_v39 = vpop.f32.mrf.mxu1 }
 0x807   :  { %v5583_v1 = vadd.f32 %v10773_v39, %v5414_v25  ;;  %v5454_v35 = vadd.f32 %v10751_v18, %v14091_v28 }
 0x808   :  { %v5443_v9 = vpop.f32.mrf.mxu0  ;;  %v5576_v15 = vpop.f32.mrf.mxu1 }
 0x809   :  { %v5444_v36 = vadd.f32 %v5443_v9, %v14092_v14  ;;  %v5577_v59 = vadd.f32 %v5576_v15, %v5404_v57 }
 0x80c   :  { %v10776_v50 = vpop.f32.mrf.mxu1  ;;  %v10798_v30 = vpop.f32.mrf.mxu0 }
 0x80d   :  { %v5595_v12 = vadd.f32 %v10776_v50, %v5434_v31  ;;  %v5702_v41 = vadd.f32 %v10798_v30, %v5571_v60 }
 0x80e   :  { %v5588_v62 = vpop.f32.mrf.mxu1  ;;  %v5694_v38 = vpop.f32.mrf.mxu0 }
 0x80f   :  { %v5695_v20 = vadd.f32 %v5694_v38, %v5565_v43  ;;  %v5589_v21 = vadd.f32 %v5588_v62, %v5424_v10 }
 0x812   :  { %v10779_v29 = vpop.f32.mrf.mxu1  ;;  %v10801_v27 = vpop.f32.mrf.mxu0 }
 0x813   :  { %v5716_v7 = vadd.f32 %v10801_v27, %v5583_v1  ;;  %v5607_v6 = vadd.f32 %v10779_v29, %v5454_v35 }
 0x814   :  { %v5600_v51 = vpop.f32.mrf.mxu1  ;;  %v5708_v54 = vpop.f32.mrf.mxu0 }
 0x815   :  { %v5601_v24 = vadd.f32 %v5600_v51, %v5444_v36  ;;  %v5709_v25 = vadd.f32 %v5708_v54, %v5577_v59 }
 0x818   :  { %v10804_v19 = vpop.f32.mrf.mxu0  ;;  %v10826_v53 = vpop.f32.mrf.mxu1 }
 0x819   :  { %v5730_v44 = vadd.f32 %v10804_v19, %v5595_v12  ;;  %v5833_v22 = vadd.f32 %v10826_v53, %v5702_v41 }
 0x81a   :  { %v5722_v3 = vpop.f32.mrf.mxu0  ;;  %v5824_v56 = vpop.f32.mrf.mxu1 }
 0x81b   :  { %v5825_v5 = vadd.f32 %v5824_v56, %v5695_v20  ;;  %v5723_v31 = vadd.f32 %v5722_v3, %v5589_v21 }
 0x81e   :  { %v10807_v40 = vpop.f32.mrf.mxu0  ;;  %v10829_v49 = vpop.f32.mrf.mxu1 }
 0x81f   :  { %v5849_v43 = vadd.f32 %v10829_v49, %v5716_v7  ;;  %v5744_v18 = vadd.f32 %v10807_v40, %v5607_v6 }
 0x820   :  { %v5736_v37 = vpop.f32.mrf.mxu0  ;;  %v5840_v33 = vpop.f32.mrf.mxu1 }
 0x821   :  { %v5737_v9 = vadd.f32 %v5736_v37, %v5601_v24  ;;  %v5841_v57 = vadd.f32 %v5840_v33, %v5709_v25 }
 0x824   :  { %v10832_v61 = vpop.f32.mrf.mxu1  ;;  %v10854_v52 = vpop.f32.mrf.mxu0 }
 0x825   :  { %v5865_v60 = vadd.f32 %v10832_v61, %v5730_v44  ;;  %v5982_v50 = vadd.f32 %v10854_v52, %v5833_v22 }
 0x826   :  { %v5856_v48 = vpop.f32.mrf.mxu1  ;;  %v5975_v55 = vpop.f32.mrf.mxu0 }
 0x827   :  { %v5976_v39 = vadd.f32 %v5975_v55, %v5825_v5  ;;  %v5857_v10 = vadd.f32 %v5856_v48, %v5723_v31 }
 0x828   :  { %v10857_v26 = vpop.f32.mrf.mxu0 }
 0x829   :  { %v10835_v45 = vpop.f32.mrf.mxu1  ;;  %v5994_v1 = vadd.f32 %v10857_v26, %v5849_v43 }
 0x82a   :  { %v5987_v11 = vpop.f32.mrf.mxu0  ;;  %v5881_v21 = vadd.f32 %v10835_v45, %v5744_v18 }
 0x82b   :  { %v5872_v16 = vpop.f32.mrf.mxu1  ;;  %v5988_v27 = vadd.f32 %v5987_v11, %v5841_v57 }
 0x82c   :  { %v10860_v47 = vpop.f32.mrf.mxu0  ;;  %v5873_v29 = vadd.f32 %v5872_v16, %v5737_v9 }
 0x82d   :  { %v10882_v8 = vpop.f32.mrf.mxu1  ;;  %v6006_v12 = vadd.f32 %v10860_v47, %v5865_v60 }
 0x82e   :  { %v5999_v46 = vpop.f32.mrf.mxu0  ;;  %v13246_v41 = vadd.f32 %v10882_v8, %v5982_v50 }
 0x82f   :  { %v6096_v13 = vpop.f32.mrf.mxu1  ;;  %v6000_v61 = vadd.f32 %v5999_v46, %v5857_v10 }
 0x830   :  { %v10863_v30 = vpop.f32.mrf.mxu0  ;;  %v13248_v15 = vadd.f32 %v6096_v13, %v5976_v39  ;;  %v6143_v48 = vmul.f32 %v13246_v41, %v13246_v41 }
 0x831   :  { %v10885_v23 = vpop.f32.mrf.mxu1  ;;  %v6018_v47 = vadd.f32 %v10863_v30, %v5881_v21 }
 0x832   :  { %v6115_v51 = vadd.f32 %v10885_v23, %v5994_v1  ;;  %v6011_v55 = vpop.f32.mrf.mxu0  ;;  %v6142_v26 = vmul.f32 %v13248_v15, %v13248_v15 }
 0x833   :  { %v6108_v38 = vpop.f32.mrf.mxu1  ;;  %v6012_v37 = vadd.f32 %v6011_v55, %v5873_v29 }
 0x834   :  { %v6109_v13 = vadd.f32 %v6108_v38, %v5988_v27  ;;  %v6145_v16 = vmul.f32 %v6115_v51, %v6115_v51 }
 0x835   :  { %v10888_v62 = vpop.f32.mrf.mxu1 }
 0x836   :  { %v6127_v52 = vadd.f32 %v10888_v62, %v6006_v12  ;;  %v6144_v49 = vmul.f32 %v6109_v13, %v6109_v13 }
 0x837   :  { %v6120_v54 = vpop.f32.mrf.mxu1 }
 0x838   :  { %v6147_v8 = vmul.f32 %v6127_v52, %v6127_v52  ;;  %v6121_v19 = vadd.f32 %v6120_v54, %v6000_v61 }
 0x839   :  { %v10891_v33 = vpop.f32.mrf.mxu1 }
 0x83a   :  { %v6151_v45 = vadd.f32 %v6147_v8, %v6143_v48  ;;  %v6146_v46 = vmul.f32 %v6121_v19, %v6121_v19  ;;  %v6139_v53 = vadd.f32 %v10891_v33, %v6018_v47 }
 0x83b   :  { %v6132_v11 = vpop.f32.mrf.mxu1 }
 0x83c   :  { %v6155_v23 = vadd.f32 1e-30, %v6151_v45  ;;  %v6150_v3 = vadd.f32 %v6146_v46, %v6142_v26  ;;  %v6149_v56 = vmul.f32 %v6139_v53, %v6139_v53  ;;  %v6133_v40 = vadd.f32 %v6132_v11, %v6012_v37 }
 0x83e   :  { %11444 = vrsqrt.f32 %v6155_v23  ;;  %v6154_v20 = vadd.f32 1e-30, %v6150_v3  ;;  %v6153_v35 = vadd.f32 %v6149_v56, %v6145_v16  ;;  %v6148_v44 = vmul.f32 %v6133_v40, %v6133_v40 }
 0x840   :  { %11446 = vrsqrt.f32 %v6154_v20  ;;  %v6157_v22 = vadd.f32 1e-30, %v6153_v35  ;;  %v6152_v36 = vadd.f32 %v6148_v44, %v6144_v49 }
 0x842   :  { %11448 = vrsqrt.f32 %v6157_v22  ;;  %v6156_v59 = vadd.f32 1e-30, %v6152_v36 }
 0x844   :  { %11450 = vrsqrt.f32 %v6156_v59 }
 0x84b   :  { %v11445_v7 = vpop.eup %11444 }
 0x84c   :  { %v6163_v5 = vmul.f32 %v11445_v7, %v14093_v34 }
 0x84d   :  { %v11447_v6 = vpop.eup %11446 }
 0x84e   :  { %v6167_v31 = vsub.f32 1.0, %v6163_v5  ;;  %v6162_v60 = vmul.f32 %v11447_v6, %v14093_v34 }
 0x84f   :  { %v11449_v50 = vpop.eup %11448 }
 0x850   :  { %v6171_v24 = vmax.f32 %v6167_v31, 0.0  ;;  %v6166_v25 = vsub.f32 1.0, %v6162_v60  ;;  %v6165_v43 = vmul.f32 %v11449_v50, %v14093_v34 }
 0x851   :  { %v11451_v39 = vpop.eup %11450 }
 0x852   :  { %v6179_v30 = vmul.f32 %v6171_v24, %v6127_v52  ;;  %v6170_v38 = vmax.f32 %v6166_v25, 0.0  ;;  %v6169_v18 = vsub.f32 1.0, %v6165_v43  ;;  %v6164_v10 = vmul.f32 %v11451_v39, %v14093_v34 }
 0x853   :  { %v6175_v47 = vmul.f32 %v6171_v24, %v13246_v41 }
 0x854   :  { %v13258_v12 = vand.u32 4294901760, %v6179_v30  ;;  %v6178_v9 = vmul.f32 %v6170_v38, %v6121_v19  ;;  %v6173_v57 = vmax.f32 %v6169_v18, 0.0  ;;  %v6168_v1 = vsub.f32 1.0, %v6164_v10  ;;  %v14244_v18 = vld [vmem:[#allocation37_spill] sm:$0xff] }
 0x855   :  { %v6174_v33 = vmul.f32 %v6170_v38, %v13248_v15  ;;  %v13291_v46 = vand.u32 4294901760, %v6175_v47  ;;  %v14243_v38 = vld [vmem:[#allocation15_spill] sm:$0xff]  ;;  %v14245_v10 = vld [vmem:[#allocation17_spill] sm:$0xff] }
 0x856   :  { %v13260_v62 = vand.u32 4294901760, %v6178_v9  ;;  %v6177_v21 = vmul.f32 %v6173_v57, %v6115_v51  ;;  %v6181_v61 = vmul.f32 %v6173_v57, %v6139_v53  ;;  %v6172_v29 = vmax.f32 %v6168_v1, 0.0  ;;  %v14247_v57 = vld [vmem:[#allocation18_spill] sm:$0xff]  ;;  %v14248_v1 = vld [vmem:[#allocation21_spill] sm:$0xff] }
 0x857   :  { %v13263_v27 = vsub.f32 %v6179_v30, %v13258_v12  ;;  %v13304_v23 = vand.u32 4294901760, %v6174_v33  ;;  %v13315_v20 = vsub.f32 %v6175_v47, %v13291_v46  ;;  %v14255_v47 = vld [vmem:[#allocation22_spill] sm:$0xff] }
 0x858   :  { %v13265_v55 = vand.u32 4294901760, %v6181_v61  ;;  %v13267_v52 = vand.u32 4294901760, %v6177_v21  ;;  %v6176_v54 = vmul.f32 %v6172_v29, %v6109_v13  ;;  %v6180_v48 = vmul.f32 %v6172_v29, %v6133_v40  ;;  %v14251_v29 = vld [vmem:[#allocation16_spill] sm:$0xff] }
 0x859   :  { %v13271_v8 = vsub.f32 %v6178_v9, %v13260_v62  ;;  %v13289_v45 = vand.u32 4294901760, %v13263_v27  ;;  %v13325_v36 = vsub.f32 %v6174_v33, %v13304_v23  ;;  %v13333_v5 = vand.u32 4294901760, %v13315_v20  ;;  %v14246_v9 = vld [vmem:[#allocation38_spill] sm:$0xff]  ;;  %v14258_v33 = vld [vmem:[#allocation27_spill] sm:$0xff] }
 0x85a   :  { %v6353_v19 = vsub.f32 %v6181_v61, %v13265_v55  ;;  %v13274_v26 = vand.u32 4294901760, %v6180_v48  ;;  %v13276_v51 = vand.u32 4294901760, %v6176_v54  ;;  %10892 = vmatprep.subr.mxu0 %v13265_v55  ;;  %v13282_v13 = vsub.f32 %v6177_v21, %v13267_v52  ;;  %v14249_v21 = vld [vmem:[#allocation5_spill] sm:$0xff]  ;;  %v14250_v61 = vld [vmem:[#allocation23_spill] sm:$0xff] }
 0x85b   :  { %10893 = vmatpush3.msra.mxu0 %v13265_v55  ;;  %v13302_v11 = vand.u32 4294901760, %v13271_v8  ;;  %v6369_v40 = vsub.f32 %v13263_v27, %v13289_v45  ;;  %v13340_v60 = vand.u32 4294901760, %v13325_v36  ;;  %v6397_v24 = vsub.f32 %v13315_v20, %v13333_v5 }
 0x85c   :  { %v6360_v41 = vsub.f32 %v6180_v48, %v13274_v26  ;;  %10894 = vmatprep.subr.mxu0 %v13274_v26  ;;  %v13286_v37 = vand.u32 4294901760, %v6353_v19  ;;  %v13295_v15 = vsub.f32 %v6176_v54, %v13276_v51  ;;  %v13312_v49 = vand.u32 4294901760, %v13282_v13  ;;  %v14253_v54 = vld [vmem:[#allocation20_spill] sm:$0xff]  ;;  %v14254_v48 = vld [vmem:[#allocation31_spill] sm:$0xff] }
 0x85d   :  { %10895 = vmatpush3.msra.mxu0 %v13274_v26  ;;  %v6376_v44 = vsub.f32 %v13271_v8, %v13302_v11  ;;  %v6370_v59 = vand.u32 4294901760, %v6369_v40  ;;  %v6404_v43 = vsub.f32 %v13325_v36, %v13340_v60  ;;  %v6398_v39 = vand.u32 4294901760, %v6397_v24 }
 0x85e   :  { %10896 = vmatprep.subr.mxu0 %v13258_v12  ;;  %v6355_v53 = vsub.f32 %v6353_v19, %v13286_v37  ;;  %v13299_v16 = vand.u32 4294901760, %v6360_v41  ;;  %v13322_v22 = vand.u32 4294901760, %v13295_v15  ;;  %v6383_v7 = vsub.f32 %v13282_v13, %v13312_v49 }
 0x85f   :  { %10897 = vmatpush3.msra.mxu0 %v13258_v12  ;;  %v6377_v6 = vand.u32 4294901760, %v6376_v44  ;;  %v6405_v30 = vand.u32 4294901760, %v6404_v43 }
 0x860   :  { %10898 = vmatprep.subr.mxu0 %v13260_v62  ;;  %v6356_v3 = vand.u32 4294901760, %v6355_v53  ;;  %v6362_v56 = vsub.f32 %v6360_v41, %v13299_v16  ;;  %v6390_v31 = vsub.f32 %v13295_v15, %v13322_v22  ;;  %v6384_v50 = vand.u32 4294901760, %v6383_v7  ;;  %v14266_v53 = vld [vmem:[#allocation32_spill] sm:$0xff] }
 0x861   :  { %10899 = vmatpush3.msra.mxu0 %v13260_v62 }
 0x862   :  { %10900 = vmatprep.subr.mxu0 %v13267_v52  ;;  %10920 = vmatprep.subr.mxu1 %v6356_v3  ;;  %v6363_v35 = vand.u32 4294901760, %v6362_v56  ;;  %v6391_v25 = vand.u32 4294901760, %v6390_v31 }
 0x863   :  { %10901 = vmatpush3.msra.mxu0 %v13267_v52  ;;  %10921 = vmatpush3.msra.mxu1 %v6356_v3 }
 0x864   :  { %10902 = vmatprep.subr.mxu0 %v13276_v51  ;;  %10922 = vmatprep.subr.mxu1 %v6363_v35 }
 0x865   :  { %10903 = vmatpush3.msra.mxu0 %v13276_v51  ;;  %10923 = vmatpush3.msra.mxu1 %v6363_v35 }
 0x866   :  { %10904 = vmatprep.subr.mxu0 %v13291_v46  ;;  %10924 = vmatprep.subr.mxu1 %v6370_v59 }
 0x867   :  { %10905 = vmatpush3.msra.mxu0 %v13291_v46  ;;  %10925 = vmatpush3.msra.mxu1 %v6370_v59 }
 0x868   :  { %10906 = vmatprep.subr.mxu0 %v13304_v23  ;;  %10926 = vmatprep.subr.mxu1 %v6377_v6 }
 0x869   :  { %10907 = vmatpush3.msra.mxu0 %v13304_v23  ;;  %10927 = vmatpush3.msra.mxu1 %v6377_v6 }
 0x86a   :  { %10909 = vmatmul.mubr.f32.vlgmr.msra.gmra.mxu0 %v14094_v4  ;;  %10928 = vmatprep.subr.mxu1 %v6384_v50 }
 0x86b   :  { %10948 = vmatprep.subr.mxu0 %v6353_v19  ;;  %10929 = vmatpush3.msra.mxu1 %v6384_v50 }
 0x86c   :  { %10949 = vmatpush3.msra.mxu0 %v6353_v19  ;;  %10930 = vmatprep.subr.mxu1 %v6391_v25  ;;  %v14257_v19 = vld [vmem:[#allocation6_spill] sm:$0xff] }
 0x86d   :  { %10950 = vmatprep.subr.mxu0 %v6360_v41  ;;  %10911 = vmatprep.mubr.f32.mxu0 %v12002_v58 }
 0x86e   :  { %10931 = vmatpush3.msra.mxu1 %v6391_v25  ;;  %10951 = vmatpush3.msra.mxu0 %v6360_v41  ;;  %v14260_v41 = vld [vmem:[#allocation33_spill] sm:$0xff] }
 0x86f   :  { %10912 = vmatmul.mubr.f32.gmra.mxu0 %v12014_v32  ;;  %10932 = vmatprep.subr.mxu1 %v6398_v39 }
 0x870   :  { %10952 = vmatprep.subr.mxu0 %v13263_v27  ;;  %10933 = vmatpush3.msra.mxu1 %v6398_v39 }
 0x871   :  { %10953 = vmatpush3.msra.mxu0 %v13263_v27  ;;  %10934 = vmatprep.subr.mxu1 %v6405_v30  ;;  %v14252_v27 = vld [vmem:[#allocation28_spill] sm:$0xff] }
 0x872   :  { %10954 = vmatprep.subr.mxu0 %v13271_v8  ;;  %10914 = vmatprep.mubr.f32.mxu0 %v12027_v42 }
 0x873   :  { %10935 = vmatpush3.msra.mxu1 %v6405_v30  ;;  %10955 = vmatpush3.msra.mxu0 %v13271_v8  ;;  %v14256_v8 = vld [vmem:[#allocation25_spill] sm:$0xff] }
 0x874   :  { %10915 = vmatmul.mubr.f32.gmra.mxu0 %v12034_v63  ;;  %10937 = vmatmul.mubr.f32.vlgmr.msra.gmra.mxu1 %v14243_v38 }
 0x875   :  { %10956 = vmatprep.subr.mxu0 %v13282_v13  ;;  %10976 = vmatprep.subr.mxu1 %v13265_v55 }
 0x876   :  { %10957 = vmatpush3.msra.mxu0 %v13282_v13  ;;  %10977 = vmatpush3.msra.mxu1 %v13265_v55  ;;  %v14259_v13 = vld [vmem:[#allocation19_spill] sm:$0xff] }
 0x877   :  { %10958 = vmatprep.subr.mxu0 %v13295_v15  ;;  %10978 = vmatprep.subr.mxu1 %v13274_v26 }
 0x878   :  { %10917 = vmatprep.mubr.f32.mxu0 %v14244_v18  ;;  %10939 = vmatprep.mubr.f32.mxu1 %v14245_v10 }
 0x879   :  { %10959 = vmatpush3.msra.mxu0 %v13295_v15  ;;  %10979 = vmatpush3.msra.mxu1 %v13274_v26  ;;  %v14263_v15 = vld [vmem:[#allocation26_spill] sm:$0xff] }
 0x87a   :  { %10918 = vmatmul.mubr.f32.gmra.mxu0 %v14246_v9  ;;  %10940 = vmatmul.mubr.f32.gmra.mxu1 %v14247_v57 }
 0x87b   :  { %10960 = vmatprep.subr.mxu0 %v13315_v20  ;;  %10980 = vmatprep.subr.mxu1 %v13258_v12 }
 0x87c   :  { %10961 = vmatpush3.msra.mxu0 %v13315_v20  ;;  %10981 = vmatpush3.msra.mxu1 %v13258_v12 }
 0x87d   :  { %10962 = vmatprep.subr.mxu0 %v13325_v36  ;;  %10982 = vmatprep.subr.mxu1 %v13260_v62 }
 0x87e   :  { %10942 = vmatprep.mubr.f32.mxu1 %v14248_v1  ;;  %10963 = vmatpush3.msra.mxu0 %v13325_v36 }
 0x87f   :  { %10964 = vmatprep.mubr.f32.mxu0 %v14249_v21  ;;  %10983 = vmatpush3.msra.mxu1 %v13260_v62 }
 0x880   :  { %10943 = vmatmul.mubr.f32.gmra.mxu1 %v14250_v61  ;;  %10965 = vmatmul.mubr.f32.vlgmr.msra.gmra.mxu0 %v14251_v29 }
 0x881   :  { %10984 = vmatprep.subr.mxu1 %v13267_v52  ;;  %11004 = vmatprep.subr.mxu0 %v13286_v37 }
 0x882   :  { %10985 = vmatpush3.msra.mxu1 %v13267_v52  ;;  %11005 = vmatpush3.msra.mxu0 %v13286_v37  ;;  %v14261_v37 = vld [vmem:[#allocation24_spill] sm:$0xff] }
 0x883   :  { %10986 = vmatprep.subr.mxu1 %v13276_v51  ;;  %11006 = vmatprep.subr.mxu0 %v13299_v16 }
 0x884   :  { %10945 = vmatprep.mubr.f32.mxu1 %v14252_v27  ;;  %10967 = vmatprep.mubr.f32.mxu0 %v14253_v54 }
 0x885   :  { %10987 = vmatpush3.msra.mxu1 %v13276_v51  ;;  %11007 = vmatpush3.msra.mxu0 %v13299_v16  ;;  %v14267_v16 = vld [vmem:[#allocation35_spill] sm:$0xff] }
 0x886   :  { %10946 = vmatmul.mubr.f32.gmra.mxu1 %v14254_v48  ;;  %10968 = vmatmul.mubr.f32.gmra.mxu0 %v14255_v47 }
 0x887   :  { %10988 = vmatprep.subr.mxu1 %v13291_v46  ;;  %11008 = vmatprep.subr.mxu0 %v13289_v45 }
 0x888   :  { %10989 = vmatpush3.msra.mxu1 %v13291_v46  ;;  %11009 = vmatpush3.msra.mxu0 %v13289_v45  ;;  %v14262_v45 = vld [vmem:[#allocation34_spill] sm:$0xff] }
 0x889   :  { %10990 = vmatprep.subr.mxu1 %v13304_v23  ;;  %11010 = vmatprep.subr.mxu0 %v13302_v11 }
 0x88a   :  { %10970 = vmatprep.mubr.f32.mxu0 %v14256_v8  ;;  %10991 = vmatpush3.msra.mxu1 %v13304_v23 }
 0x88b   :  { %10992 = vmatprep.mubr.f32.mxu1 %v14257_v19  ;;  %11011 = vmatpush3.msra.mxu0 %v13302_v11 }
 0x88c   :  { %10971 = vmatmul.mubr.f32.gmra.mxu0 %v14258_v33  ;;  %10993 = vmatmul.mubr.f32.vlgmr.msra.gmra.mxu1 %v14259_v13  ;;  %v14271_v33 = vld [vmem:[#allocation9_spill] sm:$0xff] }
 0x88d   :  { %11012 = vmatprep.subr.mxu0 %v13312_v49  ;;  %11032 = vmatprep.subr.mxu1 %v13265_v55 }
 0x88e   :  { %11013 = vmatpush3.msra.mxu0 %v13312_v49  ;;  %11033 = vmatpush3.msra.mxu1 %v13265_v55  ;;  %v14264_v55 = vld [vmem:[#allocation30_spill] sm:$0xff] }
 0x88f   :  { %11014 = vmatprep.subr.mxu0 %v13322_v22  ;;  %11034 = vmatprep.subr.mxu1 %v13274_v26 }
 0x890   :  { %10973 = vmatprep.mubr.f32.mxu0 %v14260_v41  ;;  %10995 = vmatprep.mubr.f32.mxu1 %v14261_v37  ;;  %v14270_v37 = vld [vmem:[#allocation8_spill] sm:$0xff] }
 0x891   :  { %11015 = vmatpush3.msra.mxu0 %v13322_v22  ;;  %11035 = vmatpush3.msra.mxu1 %v13274_v26  ;;  %v14265_v26 = vld [vmem:[#allocation4_spill] sm:$0xff] }
 0x892   :  { %10974 = vmatmul.mubr.f32.gmra.mxu0 %v14262_v45  ;;  %10996 = vmatmul.mubr.f32.gmra.mxu1 %v14263_v15 }
 0x893   :  { %11016 = vmatprep.subr.mxu0 %v13333_v5  ;;  %11036 = vmatprep.subr.mxu1 %v13258_v12 }
 0x894   :  { %11017 = vmatpush3.msra.mxu0 %v13333_v5  ;;  %11037 = vmatpush3.msra.mxu1 %v13258_v12  ;;  %v14268_v12 = vld [vmem:[#allocation36_spill] sm:$0xff] }
 0x895   :  { %11018 = vmatprep.subr.mxu0 %v13340_v60  ;;  %11038 = vmatprep.subr.mxu1 %v13260_v62 }
 0x896   :  { %10998 = vmatprep.mubr.f32.mxu1 %v14264_v55  ;;  %11019 = vmatpush3.msra.mxu0 %v13340_v60 }
 0x897   :  { %11020 = vmatprep.mubr.f32.mxu0 %v14265_v26  ;;  %11039 = vmatpush3.msra.mxu1 %v13260_v62  ;;  %v14269_v62 = vld [vmem:[#allocation7_spill] sm:$0xff] }
 0x898   :  { %10999 = vmatmul.mubr.f32.gmra.mxu1 %v14266_v53  ;;  %11021 = vmatmul.mubr.f32.vlgmr.msra.gmra.mxu0 %v14243_v38 }
 0x899   :  { %11040 = vmatprep.subr.mxu1 %v13267_v52  ;;  %11001 = vmatprep.mubr.f32.mxu1 %v14267_v16 }
 0x89a   :  { %11041 = vmatpush3.msra.mxu1 %v13267_v52  ;;  %11023 = vmatprep.mubr.f32.mxu0 %v14245_v10 }
 0x89b   :  { %11042 = vmatprep.subr.mxu1 %v13276_v51 }
 0x89c   :  { %11043 = vmatpush3.msra.mxu1 %v13276_v51  ;;  %11024 = vmatmul.mubr.f32.gmra.mxu0 %v14247_v57 }
 0x89d   :  { %11002 = vmatmul.mubr.f32.gmra.mxu1 %v14268_v12  ;;  %11044 = vmatprep.subr.mxu1 %v13291_v46 }
 0x89e   :  { %11045 = vmatpush3.msra.mxu1 %v13291_v46  ;;  %11026 = vmatprep.mubr.f32.mxu0 %v14248_v1 }
 0x89f   :  { %11046 = vmatprep.subr.mxu1 %v13304_v23  ;;  %11048 = vmatprep.mubr.f32.mxu1 %v14265_v26 }
 0x8a0   :  { %11047 = vmatpush3.msra.mxu1 %v13304_v23  ;;  %11027 = vmatmul.mubr.f32.gmra.mxu0 %v14250_v61 }
 0x8a1   :  { %11049 = vmatmul.mubr.f32.vlgmr.msra.gmra.mxu1 %v14243_v38  ;;  %11029 = vmatprep.mubr.f32.mxu0 %v14252_v27 }
 0x8a2   :  { %11051 = vmatprep.mubr.f32.mxu1 %v14245_v10 }
 0x8a4   :  { %11030 = vmatmul.mubr.f32.gmra.mxu0 %v14254_v48 }
 0x8a5   :  { %11052 = vmatmul.mubr.f32.gmra.mxu1 %v14247_v57  ;;  %11076 = vmatprep.mubr.f32.mxu0 %v14269_v62 }
 0x8a6   :  { %11054 = vmatprep.mubr.f32.mxu1 %v14248_v1 }
 0x8a9   :  { %11055 = vmatmul.mubr.f32.gmra.mxu1 %v14250_v61 }
 0x8aa   :  { %11057 = vmatprep.mubr.f32.mxu1 %v14252_v27  ;;  %v14272_v27 = vld [vmem:[#allocation11_spill] sm:$0xff] }
 0x8ad   :  { %11058 = vmatmul.mubr.f32.gmra.mxu1 %v14254_v48 }
 0x8ae   :  { %11104 = vmatprep.mubr.f32.mxu1 %v14265_v26 }
 0x92a   :  { %v10910_v52 = vpop.f32.mrf.mxu0 }
 0x92b   :  { %v6272_v41 = vadd.f32 %v10910_v52, %v14270_v37 }
 0x92c   :  { %v6261_v51 = vpop.f32.mrf.mxu0 }
 0x92d   :  { %v6262_v19 = vadd.f32 %v6261_v51, %v14271_v33 }
 0x92f   :  { %v10913_v46 = vpop.f32.mrf.mxu0 }
 0x930   :  { %v6292_v29 = vadd.f32 %v10913_v46, %v14272_v27 }
 0x931   :  { %v6281_v11 = vpop.f32.mrf.mxu0 }
 0x932   :  { %v6282_v10 = vadd.f32 %v6281_v11, %v11807_v2 }
 0x934   :  { %v10916_v23 = vpop.f32.mrf.mxu0  ;;  %v10938_v3 = vpop.f32.mrf.mxu1 }
 0x935   :  { %v6312_v47 = vadd.f32 %v10916_v23, %v14121_v17  ;;  %v6449_v48 = vadd.f32 %v10938_v3, %v6272_v41 }
 0x936   :  { %v6301_v56 = vpop.f32.mrf.mxu0  ;;  %v6442_v40 = vpop.f32.mrf.mxu1 }
 0x937   :  { %v6443_v61 = vadd.f32 %v6442_v40, %v6262_v19  ;;  %v6302_v1 = vadd.f32 %v6301_v56, %v11801_v0 }
 0x93a   :  { %v10919_v49 = vpop.f32.mrf.mxu0  ;;  %v10941_v20 = vpop.f32.mrf.mxu1 }
 0x93b   :  { %v6461_v18 = vadd.f32 %v10941_v20, %v6292_v29  ;;  %v6332_v51 = vadd.f32 %v10919_v49, %v14091_v28 }
 0x93c   :  { %v6321_v35 = vpop.f32.mrf.mxu0  ;;  %v6454_v44 = vpop.f32.mrf.mxu1 }
 0x93d   :  { %v6322_v3 = vadd.f32 %v6321_v35, %v14092_v14  ;;  %v6455_v46 = vadd.f32 %v6454_v44, %v6282_v10 }
 0x940   :  { %v10944_v22 = vpop.f32.mrf.mxu1  ;;  %v10966_v36 = vpop.f32.mrf.mxu0 }
 0x941   :  { %v6473_v57 = vadd.f32 %v10944_v22, %v6312_v47  ;;  %v6580_v9 = vadd.f32 %v10966_v36, %v6449_v48 }
 0x942   :  { %v6466_v59 = vpop.f32.mrf.mxu1  ;;  %v6572_v7 = vpop.f32.mrf.mxu0 }
 0x943   :  { %v6573_v52 = vadd.f32 %v6572_v7, %v6443_v61  ;;  %v6467_v33 = vadd.f32 %v6466_v59, %v6302_v1 }
 0x946   :  { %v10947_v5 = vpop.f32.mrf.mxu1  ;;  %v10969_v6 = vpop.f32.mrf.mxu0 }
 0x947   :  { %v6594_v19 = vadd.f32 %v10969_v6, %v6461_v18  ;;  %v6485_v56 = vadd.f32 %v10947_v5, %v6332_v51 }
 0x948   :  { %v6478_v31 = vpop.f32.mrf.mxu1  ;;  %v6586_v60 = vpop.f32.mrf.mxu0 }
 0x949   :  { %v6479_v11 = vadd.f32 %v6478_v31, %v6322_v3  ;;  %v6587_v29 = vadd.f32 %v6586_v60, %v6455_v46 }
 0x94c   :  { %v10972_v50 = vpop.f32.mrf.mxu0  ;;  %v10994_v24 = vpop.f32.mrf.mxu1 }
 0x94d   :  { %v6608_v23 = vadd.f32 %v10972_v50, %v6473_v57  ;;  %v6711_v41 = vadd.f32 %v10994_v24, %v6580_v9 }
 0x94e   :  { %v6600_v25 = vpop.f32.mrf.mxu0  ;;  %v6702_v43 = vpop.f32.mrf.mxu1 }
 0x94f   :  { %v6703_v40 = vadd.f32 %v6702_v43, %v6573_v52  ;;  %v6601_v47 = vadd.f32 %v6600_v25, %v6467_v33 }
 0x952   :  { %v10975_v39 = vpop.f32.mrf.mxu0  ;;  %v10997_v30 = vpop.f32.mrf.mxu1 }
 0x953   :  { %v6727_v61 = vadd.f32 %v10997_v30, %v6594_v19  ;;  %v6622_v49 = vadd.f32 %v10975_v39, %v6485_v56 }
 0x954   :  { %v6614_v62 = vpop.f32.mrf.mxu0  ;;  %v6718_v12 = vpop.f32.mrf.mxu1 }
 0x955   :  { %v6615_v35 = vadd.f32 %v6614_v62, %v6479_v11  ;;  %v6719_v10 = vadd.f32 %v6718_v12, %v6587_v29 }
 0x958   :  { %v11000_v16 = vpop.f32.mrf.mxu1  ;;  %v11022_v53 = vpop.f32.mrf.mxu0 }
 0x959   :  { %v6743_v48 = vadd.f32 %v11000_v16, %v6608_v23  ;;  %v6860_v22 = vadd.f32 %v11022_v53, %v6711_v41 }
 0x95a   :  { %v6734_v26 = vpop.f32.mrf.mxu1  ;;  %v6853_v55 = vpop.f32.mrf.mxu0 }
 0x95b   :  { %v6854_v20 = vadd.f32 %v6853_v55, %v6703_v40  ;;  %v6735_v1 = vadd.f32 %v6734_v26, %v6601_v47 }
 0x95c   :  { %v11025_v15 = vpop.f32.mrf.mxu0 }
 0x95d   :  { %v11003_v45 = vpop.f32.mrf.mxu1  ;;  %v6872_v18 = vadd.f32 %v11025_v15, %v6727_v61 }
 0x95e   :  { %v6865_v13 = vpop.f32.mrf.mxu0  ;;  %v6759_v33 = vadd.f32 %v11003_v45, %v6622_v49 }
 0x95f   :  { %v6750_v8 = vpop.f32.mrf.mxu1  ;;  %v6866_v6 = vadd.f32 %v6865_v13, %v6719_v10 }
 0x960   :  { %v11028_v54 = vpop.f32.mrf.mxu0  ;;  %v6751_v5 = vadd.f32 %v6750_v8, %v6615_v35 }
 0x961   :  { %v11050_v21 = vpop.f32.mrf.mxu1  ;;  %v6884_v57 = vadd.f32 %v11028_v54, %v6743_v48 }
 0x962   :  { %v6877_v37 = vpop.f32.mrf.mxu0  ;;  %v13464_v9 = vadd.f32 %v11050_v21, %v6860_v22 }
 0x963   :  { %v6974_v38 = vpop.f32.mrf.mxu1  ;;  %v6878_v16 = vadd.f32 %v6877_v37, %v6735_v1 }
 0x964   :  { %v11031_v36 = vpop.f32.mrf.mxu0  ;;  %v13466_v44 = vadd.f32 %v6974_v38, %v6854_v20  ;;  %v7021_v26 = vmul.f32 %v13464_v9, %v13464_v9 }
 0x965   :  { %v11053_v27 = vpop.f32.mrf.mxu1  ;;  %v6896_v54 = vadd.f32 %v11031_v36, %v6759_v33 }
 0x966   :  { %v6993_v31 = vadd.f32 %v11053_v27, %v6872_v18  ;;  %v6889_v55 = vpop.f32.mrf.mxu0  ;;  %v7020_v15 = vmul.f32 %v13466_v44, %v13466_v44 }
 0x967   :  { %v6986_v7 = vpop.f32.mrf.mxu1  ;;  %v6890_v62 = vadd.f32 %v6889_v55, %v6751_v5 }
 0x968   :  { %v6987_v38 = vadd.f32 %v6986_v7, %v6866_v6  ;;  %v7023_v8 = vmul.f32 %v6993_v31, %v6993_v31 }
 0x969   :  { %v11056_v59 = vpop.f32.mrf.mxu1 }
 0x96a   :  { %v7005_v53 = vadd.f32 %v11056_v59, %v6884_v57  ;;  %v7022_v30 = vmul.f32 %v6987_v38, %v6987_v38 }
 0x96b   :  { %v6998_v60 = vpop.f32.mrf.mxu1 }
 0x96c   :  { %v7025_v21 = vmul.f32 %v7005_v53, %v7005_v53  ;;  %v6999_v50 = vadd.f32 %v6998_v60, %v6878_v16 }
 0x96d   :  { %v11059_v12 = vpop.f32.mrf.mxu1 }
 0x96e   :  { %v7029_v45 = vadd.f32 %v7025_v21, %v7021_v26  ;;  %v7024_v37 = vmul.f32 %v6999_v50, %v6999_v50  ;;  %v7017_v24 = vadd.f32 %v11059_v12, %v6896_v54 }
 0x96f   :  { %v7010_v13 = vpop.f32.mrf.mxu1 }
 0x970   :  { %v7033_v27 = vadd.f32 1e-30, %v7029_v45  ;;  %v7028_v25 = vadd.f32 %v7024_v37, %v7020_v15  ;;  %v7027_v43 = vmul.f32 %v7017_v24, %v7017_v24  ;;  %v7011_v39 = vadd.f32 %v7010_v13, %v6890_v62 }
 0x972   :  { %11452 = vrsqrt.f32 %v7033_v27  ;;  %v7032_v52 = vadd.f32 1e-30, %v7028_v25  ;;  %v7031_v51 = vadd.f32 %v7027_v43, %v7023_v8  ;;  %v7026_v23 = vmul.f32 %v7011_v39, %v7011_v39 }
 0x974   :  { %11454 = vrsqrt.f32 %v7032_v52  ;;  %v7035_v41 = vadd.f32 1e-30, %v7031_v51  ;;  %v7030_v3 = vadd.f32 %v7026_v23, %v7022_v30 }
 0x976   :  { %11456 = vrsqrt.f32 %v7035_v41  ;;  %v7034_v46 = vadd.f32 1e-30, %v7030_v3 }
 0x978   :  { %11458 = vrsqrt.f32 %v7034_v46 }
 0x97f   :  { %v11453_v19 = vpop.eup %11452 }
 0x980   :  { %v7041_v40 = vmul.f32 %v11453_v19, %v14093_v34 }
 0x981   :  { %v11455_v56 = vpop.eup %11454 }
 0x982   :  { %v7045_v47 = vsub.f32 1.0, %v7041_v40  ;;  %v7040_v48 = vmul.f32 %v11455_v56, %v14093_v34 }
 0x983   :  { %v11457_v22 = vpop.eup %11456 }
 0x984   :  { %v7049_v11 = vmax.f32 %v7045_v47, 0.0  ;;  %v7044_v29 = vsub.f32 1.0, %v7040_v48  ;;  %v7043_v61 = vmul.f32 %v11457_v22, %v14093_v34 }
 0x985   :  { %v11459_v20 = vpop.eup %11458 }
 0x986   :  { %v7057_v36 = vmul.f32 %v7049_v11, %v7005_v53  ;;  %v7048_v7 = vmax.f32 %v7044_v29, 0.0  ;;  %v7047_v49 = vsub.f32 1.0, %v7043_v61  ;;  %v7042_v1 = vmul.f32 %v11459_v20, %v14093_v34 }
 0x987   :  { %v7053_v54 = vmul.f32 %v7049_v11, %v13464_v9 }
 0x988   :  { %v13476_v57 = vand.u32 4294901760, %v7057_v36  ;;  %v7056_v35 = vmul.f32 %v7048_v7, %v6999_v50  ;;  %v7051_v10 = vmax.f32 %v7047_v49, 0.0  ;;  %v7046_v18 = vsub.f32 1.0, %v7042_v1  ;;  %v14274_v49 = vld [vmem:[#allocation37_spill] sm:$0xff] }
 0x989   :  { %v7052_v12 = vmul.f32 %v7048_v7, %v13466_v44  ;;  %v13509_v37 = vand.u32 4294901760, %v7053_v54  ;;  %v14273_v7 = vld [vmem:[#allocation15_spill] sm:$0xff]  ;;  %v14275_v1 = vld [vmem:[#allocation17_spill] sm:$0xff] }
 0x98a   :  { %v13478_v59 = vand.u32 4294901760, %v7056_v35  ;;  %v7055_v33 = vmul.f32 %v7051_v10, %v6993_v31  ;;  %v7059_v16 = vmul.f32 %v7051_v10, %v7017_v24  ;;  %v7050_v5 = vmax.f32 %v7046_v18, 0.0  ;;  %v14277_v10 = vld [vmem:[#allocation18_spill] sm:$0xff]  ;;  %v14278_v18 = vld [vmem:[#allocation21_spill] sm:$0xff] }
 0x98b   :  { %v13481_v6 = vsub.f32 %v7057_v36, %v13476_v57  ;;  %v13522_v27 = vand.u32 4294901760, %v7052_v12  ;;  %v13533_v52 = vsub.f32 %v7053_v54, %v13509_v37  ;;  %v14285_v54 = vld [vmem:[#allocation22_spill] sm:$0xff] }
 0x98c   :  { %v13483_v55 = vand.u32 4294901760, %v7059_v16  ;;  %v13485_v53 = vand.u32 4294901760, %v7055_v33  ;;  %v7054_v60 = vmul.f32 %v7050_v5, %v6987_v38  ;;  %v7058_v26 = vmul.f32 %v7050_v5, %v7011_v39  ;;  %v14281_v5 = vld [vmem:[#allocation16_spill] sm:$0xff] }
 0x98d   :  { %v13489_v21 = vsub.f32 %v7056_v35, %v13478_v59  ;;  %v13507_v45 = vand.u32 4294901760, %v13481_v6  ;;  %v13543_v3 = vsub.f32 %v7052_v12, %v13522_v27  ;;  %v13551_v40 = vand.u32 4294901760, %v13533_v52  ;;  %v14276_v35 = vld [vmem:[#allocation38_spill] sm:$0xff]  ;;  %v14288_v12 = vld [vmem:[#allocation27_spill] sm:$0xff] }
 0x98e   :  { %v7231_v50 = vsub.f32 %v7059_v16, %v13483_v55  ;;  %v13492_v15 = vand.u32 4294901760, %v7058_v26  ;;  %v13494_v31 = vand.u32 4294901760, %v7054_v60  ;;  %11060 = vmatprep.subr.mxu0 %v13483_v55  ;;  %v13500_v38 = vsub.f32 %v7055_v33, %v13485_v53  ;;  %v14279_v33 = vld [vmem:[#allocation5_spill] sm:$0xff]  ;;  %v14280_v16 = vld [vmem:[#allocation23_spill] sm:$0xff] }
 0x98f   :  { %11061 = vmatpush3.msra.mxu0 %v13483_v55  ;;  %v13520_v13 = vand.u32 4294901760, %v13489_v21  ;;  %v7247_v39 = vsub.f32 %v13481_v6, %v13507_v45  ;;  %v13558_v48 = vand.u32 4294901760, %v13543_v3  ;;  %v7275_v11 = vsub.f32 %v13533_v52, %v13551_v40 }
 0x990   :  { %v7238_v9 = vsub.f32 %v7058_v26, %v13492_v15  ;;  %11062 = vmatprep.subr.mxu0 %v13492_v15  ;;  %v13504_v62 = vand.u32 4294901760, %v7231_v50  ;;  %v13513_v44 = vsub.f32 %v7054_v60, %v13494_v31  ;;  %v13530_v30 = vand.u32 4294901760, %v13500_v38  ;;  %v14283_v60 = vld [vmem:[#allocation20_spill] sm:$0xff]  ;;  %v14284_v26 = vld [vmem:[#allocation31_spill] sm:$0xff] }
 0x991   :  { %11063 = vmatpush3.msra.mxu0 %v13492_v15  ;;  %v7254_v23 = vsub.f32 %v13489_v21, %v13520_v13  ;;  %v7248_v46 = vand.u32 4294901760, %v7247_v39  ;;  %v7282_v61 = vsub.f32 %v13543_v3, %v13558_v48  ;;  %v7276_v20 = vand.u32 4294901760, %v7275_v11 }
 0x992   :  { %11064 = vmatprep.subr.mxu0 %v13476_v57  ;;  %v7233_v24 = vsub.f32 %v7231_v50, %v13504_v62  ;;  %v13517_v8 = vand.u32 4294901760, %v7238_v9  ;;  %v13540_v41 = vand.u32 4294901760, %v13513_v44  ;;  %v7261_v19 = vsub.f32 %v13500_v38, %v13530_v30 }
 0x993   :  { %11065 = vmatpush3.msra.mxu0 %v13476_v57  ;;  %v7255_v56 = vand.u32 4294901760, %v7254_v23  ;;  %v7283_v36 = vand.u32 4294901760, %v7282_v61 }
 0x994   :  { %11066 = vmatprep.subr.mxu0 %v13478_v59  ;;  %v7234_v25 = vand.u32 4294901760, %v7233_v24  ;;  %v7240_v43 = vsub.f32 %v7238_v9, %v13517_v8  ;;  %v7268_v47 = vsub.f32 %v13513_v44, %v13540_v41  ;;  %v7262_v22 = vand.u32 4294901760, %v7261_v19  ;;  %v14296_v24 = vld [vmem:[#allocation32_spill] sm:$0xff] }
 0x995   :  { %11067 = vmatpush3.msra.mxu0 %v13478_v59 }
 0x996   :  { %11068 = vmatprep.subr.mxu0 %v13485_v53  ;;  %11088 = vmatprep.subr.mxu1 %v7234_v25  ;;  %v7241_v51 = vand.u32 4294901760, %v7240_v43  ;;  %v7269_v29 = vand.u32 4294901760, %v7268_v47 }
 0x997   :  { %11069 = vmatpush3.msra.mxu0 %v13485_v53  ;;  %11089 = vmatpush3.msra.mxu1 %v7234_v25 }
 0x998   :  { %11070 = vmatprep.subr.mxu0 %v13494_v31  ;;  %11090 = vmatprep.subr.mxu1 %v7241_v51 }
 0x999   :  { %11071 = vmatpush3.msra.mxu0 %v13494_v31  ;;  %11091 = vmatpush3.msra.mxu1 %v7241_v51 }
 0x99a   :  { %11072 = vmatprep.subr.mxu0 %v13509_v37  ;;  %11092 = vmatprep.subr.mxu1 %v7248_v46 }
 0x99b   :  { %11073 = vmatpush3.msra.mxu0 %v13509_v37  ;;  %11093 = vmatpush3.msra.mxu1 %v7248_v46 }
 0x99c   :  { %11074 = vmatprep.subr.mxu0 %v13522_v27  ;;  %11094 = vmatprep.subr.mxu1 %v7255_v56 }
 0x99d   :  { %11075 = vmatpush3.msra.mxu0 %v13522_v27  ;;  %11095 = vmatpush3.msra.mxu1 %v7255_v56 }
 0x99e   :  { %11077 = vmatmul.mubr.f32.vlgmr.msra.gmra.mxu0 %v14094_v4  ;;  %11096 = vmatprep.subr.mxu1 %v7262_v22 }
 0x99f   :  { %11116 = vmatprep.subr.mxu0 %v7231_v50  ;;  %11097 = vmatpush3.msra.mxu1 %v7262_v22 }
 0x9a0   :  { %11117 = vmatpush3.msra.mxu0 %v7231_v50  ;;  %11098 = vmatprep.subr.mxu1 %v7269_v29  ;;  %v14287_v50 = vld [vmem:[#allocation6_spill] sm:$0xff] }
 0x9a1   :  { %11118 = vmatprep.subr.mxu0 %v7238_v9  ;;  %11079 = vmatprep.mubr.f32.mxu0 %v12002_v58 }
 0x9a2   :  { %11099 = vmatpush3.msra.mxu1 %v7269_v29  ;;  %11119 = vmatpush3.msra.mxu0 %v7238_v9  ;;  %v14290_v9 = vld [vmem:[#allocation33_spill] sm:$0xff] }
 0x9a3   :  { %11080 = vmatmul.mubr.f32.gmra.mxu0 %v12014_v32  ;;  %11100 = vmatprep.subr.mxu1 %v7276_v20 }
 0x9a4   :  { %11120 = vmatprep.subr.mxu0 %v13481_v6  ;;  %11101 = vmatpush3.msra.mxu1 %v7276_v20 }
 0x9a5   :  { %11121 = vmatpush3.msra.mxu0 %v13481_v6  ;;  %11102 = vmatprep.subr.mxu1 %v7283_v36  ;;  %v14282_v6 = vld [vmem:[#allocation28_spill] sm:$0xff] }
 0x9a6   :  { %11122 = vmatprep.subr.mxu0 %v13489_v21  ;;  %11082 = vmatprep.mubr.f32.mxu0 %v12027_v42 }
 0x9a7   :  { %11103 = vmatpush3.msra.mxu1 %v7283_v36  ;;  %11123 = vmatpush3.msra.mxu0 %v13489_v21  ;;  %v14286_v21 = vld [vmem:[#allocation25_spill] sm:$0xff] }
 0x9a8   :  { %11083 = vmatmul.mubr.f32.gmra.mxu0 %v12034_v63  ;;  %11105 = vmatmul.mubr.f32.vlgmr.msra.gmra.mxu1 %v14273_v7 }
 0x9a9   :  { %11124 = vmatprep.subr.mxu0 %v13500_v38  ;;  %11144 = vmatprep.subr.mxu1 %v13483_v55 }
 0x9aa   :  { %11125 = vmatpush3.msra.mxu0 %v13500_v38  ;;  %11145 = vmatpush3.msra.mxu1 %v13483_v55  ;;  %v14289_v38 = vld [vmem:[#allocation19_spill] sm:$0xff] }
 0x9ab   :  { %11126 = vmatprep.subr.mxu0 %v13513_v44  ;;  %11146 = vmatprep.subr.mxu1 %v13492_v15 }
 0x9ac   :  { %11085 = vmatprep.mubr.f32.mxu0 %v14274_v49  ;;  %11107 = vmatprep.mubr.f32.mxu1 %v14275_v1 }
 0x9ad   :  { %11127 = vmatpush3.msra.mxu0 %v13513_v44  ;;  %11147 = vmatpush3.msra.mxu1 %v13492_v15  ;;  %v14293_v44 = vld [vmem:[#allocation26_spill] sm:$0xff] }
 0x9ae   :  { %11086 = vmatmul.mubr.f32.gmra.mxu0 %v14276_v35  ;;  %11108 = vmatmul.mubr.f32.gmra.mxu1 %v14277_v10 }
 0x9af   :  { %11128 = vmatprep.subr.mxu0 %v13533_v52  ;;  %11148 = vmatprep.subr.mxu1 %v13476_v57 }
 0x9b0   :  { %11129 = vmatpush3.msra.mxu0 %v13533_v52  ;;  %11149 = vmatpush3.msra.mxu1 %v13476_v57 }
 0x9b1   :  { %11130 = vmatprep.subr.mxu0 %v13543_v3  ;;  %11150 = vmatprep.subr.mxu1 %v13478_v59 }
 0x9b2   :  { %11110 = vmatprep.mubr.f32.mxu1 %v14278_v18  ;;  %11131 = vmatpush3.msra.mxu0 %v13543_v3 }
 0x9b3   :  { %11132 = vmatprep.mubr.f32.mxu0 %v14279_v33  ;;  %11151 = vmatpush3.msra.mxu1 %v13478_v59 }
 0x9b4   :  { %11111 = vmatmul.mubr.f32.gmra.mxu1 %v14280_v16  ;;  %11133 = vmatmul.mubr.f32.vlgmr.msra.gmra.mxu0 %v14281_v5 }
 0x9b5   :  { %11152 = vmatprep.subr.mxu1 %v13485_v53  ;;  %11172 = vmatprep.subr.mxu0 %v13504_v62 }
 0x9b6   :  { %11153 = vmatpush3.msra.mxu1 %v13485_v53  ;;  %11173 = vmatpush3.msra.mxu0 %v13504_v62  ;;  %v14291_v62 = vld [vmem:[#allocation24_spill] sm:$0xff] }
 0x9b7   :  { %11154 = vmatprep.subr.mxu1 %v13494_v31  ;;  %11174 = vmatprep.subr.mxu0 %v13517_v8 }
 0x9b8   :  { %11113 = vmatprep.mubr.f32.mxu1 %v14282_v6  ;;  %11135 = vmatprep.mubr.f32.mxu0 %v14283_v60 }
 0x9b9   :  { %11155 = vmatpush3.msra.mxu1 %v13494_v31  ;;  %11175 = vmatpush3.msra.mxu0 %v13517_v8  ;;  %v14297_v8 = vld [vmem:[#allocation35_spill] sm:$0xff] }
 0x9ba   :  { %11114 = vmatmul.mubr.f32.gmra.mxu1 %v14284_v26  ;;  %11136 = vmatmul.mubr.f32.gmra.mxu0 %v14285_v54 }
 0x9bb   :  { %11156 = vmatprep.subr.mxu1 %v13509_v37  ;;  %11176 = vmatprep.subr.mxu0 %v13507_v45 }
 0x9bc   :  { %11157 = vmatpush3.msra.mxu1 %v13509_v37  ;;  %11177 = vmatpush3.msra.mxu0 %v13507_v45  ;;  %v14292_v45 = vld [vmem:[#allocation34_spill] sm:$0xff] }
 0x9bd   :  { %11158 = vmatprep.subr.mxu1 %v13522_v27  ;;  %11178 = vmatprep.subr.mxu0 %v13520_v13 }
 0x9be   :  { %11138 = vmatprep.mubr.f32.mxu0 %v14286_v21  ;;  %11159 = vmatpush3.msra.mxu1 %v13522_v27 }
 0x9bf   :  { %11160 = vmatprep.mubr.f32.mxu1 %v14287_v50  ;;  %11179 = vmatpush3.msra.mxu0 %v13520_v13 }
 0x9c0   :  { %11139 = vmatmul.mubr.f32.gmra.mxu0 %v14288_v12  ;;  %11161 = vmatmul.mubr.f32.vlgmr.msra.gmra.mxu1 %v14289_v38  ;;  %v14301_v12 = vld [vmem:[#allocation9_spill] sm:$0xff] }
 0x9c1   :  { %11180 = vmatprep.subr.mxu0 %v13530_v30  ;;  %11200 = vmatprep.subr.mxu1 %v13483_v55 }
 0x9c2   :  { %11181 = vmatpush3.msra.mxu0 %v13530_v30  ;;  %11201 = vmatpush3.msra.mxu1 %v13483_v55  ;;  %v14294_v55 = vld [vmem:[#allocation30_spill] sm:$0xff] }
 0x9c3   :  { %11182 = vmatprep.subr.mxu0 %v13540_v41  ;;  %11202 = vmatprep.subr.mxu1 %v13492_v15 }
 0x9c4   :  { %11141 = vmatprep.mubr.f32.mxu0 %v14290_v9  ;;  %11163 = vmatprep.mubr.f32.mxu1 %v14291_v62  ;;  %v14300_v62 = vld [vmem:[#allocation8_spill] sm:$0xff] }
 0x9c5   :  { %11183 = vmatpush3.msra.mxu0 %v13540_v41  ;;  %11203 = vmatpush3.msra.mxu1 %v13492_v15  ;;  %v14295_v15 = vld [vmem:[#allocation4_spill] sm:$0xff] }
 0x9c6   :  { %11142 = vmatmul.mubr.f32.gmra.mxu0 %v14292_v45  ;;  %11164 = vmatmul.mubr.f32.gmra.mxu1 %v14293_v44 }
 0x9c7   :  { %11184 = vmatprep.subr.mxu0 %v13551_v40  ;;  %11204 = vmatprep.subr.mxu1 %v13476_v57 }
 0x9c8   :  { %11185 = vmatpush3.msra.mxu0 %v13551_v40  ;;  %11205 = vmatpush3.msra.mxu1 %v13476_v57  ;;  %v14298_v57 = vld [vmem:[#allocation36_spill] sm:$0xff] }
 0x9c9   :  { %11186 = vmatprep.subr.mxu0 %v13558_v48  ;;  %11206 = vmatprep.subr.mxu1 %v13478_v59 }
 0x9ca   :  { %11166 = vmatprep.mubr.f32.mxu1 %v14294_v55  ;;  %11187 = vmatpush3.msra.mxu0 %v13558_v48 }
 0x9cb   :  { %11188 = vmatprep.mubr.f32.mxu0 %v14295_v15  ;;  %11207 = vmatpush3.msra.mxu1 %v13478_v59  ;;  %v14299_v59 = vld [vmem:[#allocation7_spill] sm:$0xff] }
 0x9cc   :  { %11167 = vmatmul.mubr.f32.gmra.mxu1 %v14296_v24  ;;  %11189 = vmatmul.mubr.f32.vlgmr.msra.gmra.mxu0 %v14273_v7 }
 0x9cd   :  { %11208 = vmatprep.subr.mxu1 %v13485_v53  ;;  %11169 = vmatprep.mubr.f32.mxu1 %v14297_v8 }
 0x9ce   :  { %11209 = vmatpush3.msra.mxu1 %v13485_v53  ;;  %11191 = vmatprep.mubr.f32.mxu0 %v14275_v1 }
 0x9cf   :  { %11210 = vmatprep.subr.mxu1 %v13494_v31 }
 0x9d0   :  { %11211 = vmatpush3.msra.mxu1 %v13494_v31  ;;  %11192 = vmatmul.mubr.f32.gmra.mxu0 %v14277_v10 }
 0x9d1   :  { %11170 = vmatmul.mubr.f32.gmra.mxu1 %v14298_v57  ;;  %11212 = vmatprep.subr.mxu1 %v13509_v37 }
 0x9d2   :  { %11213 = vmatpush3.msra.mxu1 %v13509_v37  ;;  %11194 = vmatprep.mubr.f32.mxu0 %v14278_v18 }
 0x9d3   :  { %11214 = vmatprep.subr.mxu1 %v13522_v27  ;;  %11216 = vmatprep.mubr.f32.mxu1 %v14295_v15 }
 0x9d4   :  { %11215 = vmatpush3.msra.mxu1 %v13522_v27  ;;  %11195 = vmatmul.mubr.f32.gmra.mxu0 %v14280_v16 }
 0x9d5   :  { %11217 = vmatmul.mubr.f32.vlgmr.msra.gmra.mxu1 %v14273_v7  ;;  %11197 = vmatprep.mubr.f32.mxu0 %v14282_v6 }
 0x9d6   :  { %11219 = vmatprep.mubr.f32.mxu1 %v14275_v1 }
 0x9d8   :  { %11198 = vmatmul.mubr.f32.gmra.mxu0 %v14284_v26 }
 0x9d9   :  { %11220 = vmatmul.mubr.f32.gmra.mxu1 %v14277_v10  ;;  %11244 = vmatprep.mubr.f32.mxu0 %v14299_v59 }
 0x9da   :  { %11222 = vmatprep.mubr.f32.mxu1 %v14278_v18 }
 0x9dd   :  { %11223 = vmatmul.mubr.f32.gmra.mxu1 %v14280_v16 }
 0x9de   :  { %11225 = vmatprep.mubr.f32.mxu1 %v14282_v6  ;;  %v14302_v6 = vld [vmem:[#allocation11_spill] sm:$0xff] }
 0x9e1   :  { %11226 = vmatmul.mubr.f32.gmra.mxu1 %v14284_v26 }
 0x9e2   :  { %11272 = vmatprep.mubr.f32.mxu1 %v14295_v15 }
 0xa5e   :  { %v11078_v53 = vpop.f32.mrf.mxu0 }
 0xa5f   :  { %v7150_v9 = vadd.f32 %v11078_v53, %v14300_v62 }
 0xa60   :  { %v7139_v31 = vpop.f32.mrf.mxu0 }
 0xa61   :  { %v7140_v50 = vadd.f32 %v7139_v31, %v14301_v12 }
 0xa63   :  { %v11081_v37 = vpop.f32.mrf.mxu0 }
 0xa64   :  { %v7170_v5 = vadd.f32 %v11081_v37, %v14302_v6 }
 0xa65   :  { %v7159_v13 = vpop.f32.mrf.mxu0 }
 0xa66   :  { %v7160_v1 = vadd.f32 %v7159_v13, %v11807_v2 }
 0xa68   :  { %v11084_v27 = vpop.f32.mrf.mxu0  ;;  %v11106_v25 = vpop.f32.mrf.mxu1 }
 0xa69   :  { %v7190_v54 = vadd.f32 %v11084_v27, %v14121_v17  ;;  %v7327_v26 = vadd.f32 %v11106_v25, %v7150_v9 }
 0xa6a   :  { %v7179_v43 = vpop.f32.mrf.mxu0  ;;  %v7320_v39 = vpop.f32.mrf.mxu1 }
 0xa6b   :  { %v7321_v16 = vadd.f32 %v7320_v39, %v7140_v50  ;;  %v7180_v18 = vadd.f32 %v7179_v43, %v11801_v0 }
 0xa6e   :  { %v11087_v30 = vpop.f32.mrf.mxu0  ;;  %v11109_v52 = vpop.f32.mrf.mxu1 }
 0xa6f   :  { %v7339_v49 = vadd.f32 %v11109_v52, %v7170_v5  ;;  %v7210_v31 = vadd.f32 %v11087_v30, %v14091_v28 }
 0xa70   :  { %v7199_v51 = vpop.f32.mrf.mxu0  ;;  %v7332_v23 = vpop.f32.mrf.mxu1 }
 0xa71   :  { %v7200_v25 = vadd.f32 %v7199_v51, %v14092_v14  ;;  %v7333_v37 = vadd.f32 %v7332_v23, %v7160_v1 }
 0xa74   :  { %v11112_v41 = vpop.f32.mrf.mxu1  ;;  %v11134_v3 = vpop.f32.mrf.mxu0 }
 0xa75   :  { %v7351_v10 = vadd.f32 %v11112_v41, %v7190_v54  ;;  %v7458_v35 = vadd.f32 %v11134_v3, %v7327_v26 }
 0xa76   :  { %v7344_v46 = vpop.f32.mrf.mxu1  ;;  %v7450_v19 = vpop.f32.mrf.mxu0 }
 0xa77   :  { %v7451_v53 = vadd.f32 %v7450_v19, %v7321_v16  ;;  %v7345_v12 = vadd.f32 %v7344_v46, %v7180_v18 }
 0xa7a   :  { %v11115_v40 = vpop.f32.mrf.mxu1  ;;  %v11137_v56 = vpop.f32.mrf.mxu0 }
 0xa7b   :  { %v7472_v50 = vadd.f32 %v11137_v56, %v7339_v49  ;;  %v7363_v43 = vadd.f32 %v11115_v40, %v7210_v31 }
 0xa7c   :  { %v7356_v47 = vpop.f32.mrf.mxu1  ;;  %v7464_v48 = vpop.f32.mrf.mxu0 }
 0xa7d   :  { %v7357_v13 = vadd.f32 %v7356_v47, %v7200_v25  ;;  %v7465_v5 = vadd.f32 %v7464_v48, %v7333_v37 }
 0xa80   :  { %v11140_v22 = vpop.f32.mrf.mxu0  ;;  %v11162_v11 = vpop.f32.mrf.mxu1 }
 0xa81   :  { %v7486_v27 = vadd.f32 %v11140_v22, %v7351_v10  ;;  %v7589_v9 = vadd.f32 %v11162_v11, %v7458_v35 }
 0xa82   :  { %v7478_v29 = vpop.f32.mrf.mxu0  ;;  %v7580_v61 = vpop.f32.mrf.mxu1 }
 0xa83   :  { %v7581_v39 = vadd.f32 %v7580_v61, %v7451_v53  ;;  %v7479_v54 = vadd.f32 %v7478_v29, %v7345_v12 }
 0xa86   :  { %v11143_v20 = vpop.f32.mrf.mxu0  ;;  %v11165_v36 = vpop.f32.mrf.mxu1 }
 0xa87   :  { %v7605_v16 = vadd.f32 %v11165_v36, %v7472_v50  ;;  %v7500_v30 = vadd.f32 %v11143_v20, %v7363_v43 }
 0xa88   :  { %v7492_v59 = vpop.f32.mrf.mxu0  ;;  %v7596_v57 = vpop.f32.mrf.mxu1 }
 0xa89   :  { %v7493_v51 = vadd.f32 %v7492_v59, %v7357_v13  ;;  %v7597_v1 = vadd.f32 %v7596_v57, %v7465_v5 }
 0xa8c   :  { %v11168_v8 = vpop.f32.mrf.mxu1  ;;  %v11190_v24 = vpop.f32.mrf.mxu0 }
 0xa8d   :  { %v7621_v26 = vadd.f32 %v11168_v8, %v7486_v27  ;;  %v7738_v41 = vadd.f32 %v11190_v24, %v7589_v9 }
 0xa8e   :  { %v7612_v15 = vpop.f32.mrf.mxu1  ;;  %v7731_v55 = vpop.f32.mrf.mxu0 }
 0xa8f   :  { %v7732_v52 = vadd.f32 %v7731_v55, %v7581_v39  ;;  %v7613_v18 = vadd.f32 %v7612_v15, %v7479_v54 }
 0xa90   :  { %v11193_v44 = vpop.f32.mrf.mxu0 }
 0xa91   :  { %v11171_v45 = vpop.f32.mrf.mxu1  ;;  %v7750_v49 = vadd.f32 %v11193_v44, %v7605_v16 }
 0xa92   :  { %v7743_v38 = vpop.f32.mrf.mxu0  ;;  %v7637_v12 = vadd.f32 %v11171_v45, %v7500_v30 }
 0xa93   :  { %v7628_v21 = vpop.f32.mrf.mxu1  ;;  %v7744_v56 = vadd.f32 %v7743_v38, %v7597_v1 }
 0xa94   :  { %v11196_v60 = vpop.f32.mrf.mxu0  ;;  %v7629_v40 = vadd.f32 %v7628_v21, %v7493_v51 }
 0xa95   :  { %v11218_v33 = vpop.f32.mrf.mxu1  ;;  %v7762_v10 = vadd.f32 %v11196_v60, %v7621_v26 }
 0xa96   :  { %v7755_v62 = vpop.f32.mrf.mxu0  ;;  %v13682_v35 = vadd.f32 %v11218_v33, %v7738_v41 }
 0xa97   :  { %v7852_v7 = vpop.f32.mrf.mxu1  ;;  %v7756_v8 = vadd.f32 %v7755_v62, %v7613_v18 }
 0xa98   :  { %v11199_v3 = vpop.f32.mrf.mxu0  ;;  %v13684_v23 = vadd.f32 %v7852_v7, %v7732_v52  ;;  %v7899_v15 = vmul.f32 %v13682_v35, %v13682_v35 }
 0xa99   :  { %v11221_v6 = vpop.f32.mrf.mxu1  ;;  %v7774_v60 = vadd.f32 %v11199_v3, %v7637_v12 }
 0xa9a   :  { %v7871_v47 = vadd.f32 %v11221_v6, %v7750_v49  ;;  %v7767_v55 = vpop.f32.mrf.mxu0  ;;  %v7898_v44 = vmul.f32 %v13684_v23, %v13684_v23 }
 0xa9b   :  { %v7864_v19 = vpop.f32.mrf.mxu1  ;;  %v7768_v11 = vadd.f32 %v7767_v55, %v7629_v40 }
 0xa9c   :  { %v7865_v7 = vadd.f32 %v7864_v19, %v7744_v56  ;;  %v7901_v21 = vmul.f32 %v7871_v47, %v7871_v47 }
 0xa9d   :  { %v11224_v46 = vpop.f32.mrf.mxu1 }
 0xa9e   :  { %v7883_v24 = vadd.f32 %v11224_v46, %v7762_v10  ;;  %v7900_v59 = vmul.f32 %v7865_v7, %v7865_v7 }
 0xa9f   :  { %v7876_v48 = vpop.f32.mrf.mxu1 }
 0xaa0   :  { %v7903_v33 = vmul.f32 %v7883_v24, %v7883_v24  ;;  %v7877_v22 = vadd.f32 %v7876_v48, %v7756_v8 }
 0xaa1   :  { %v11227_v57 = vpop.f32.mrf.mxu1 }
 0xaa2   :  { %v7907_v45 = vadd.f32 %v7903_v33, %v7899_v15  ;;  %v7902_v62 = vmul.f32 %v7877_v22, %v7877_v22  ;;  %v7895_v29 = vadd.f32 %v11227_v57, %v7774_v60 }
 0xaa3   :  { %v7888_v38 = vpop.f32.mrf.mxu1 }
 0xaa4   :  { %v7911_v6 = vadd.f32 1e-30, %v7907_v45  ;;  %v7906_v61 = vadd.f32 %v7902_v62, %v7898_v44  ;;  %v7905_v20 = vmul.f32 %v7895_v29, %v7895_v29  ;;  %v7889_v36 = vadd.f32 %v7888_v38, %v7768_v11 }
 0xaa6   :  { %11460 = vrsqrt.f32 %v7911_v6  ;;  %v7910_v53 = vadd.f32 1e-30, %v7906_v61  ;;  %v7909_v31 = vadd.f32 %v7905_v20, %v7901_v21  ;;  %v7904_v27 = vmul.f32 %v7889_v36, %v7889_v36 }
 0xaa8   :  { %11462 = vrsqrt.f32 %v7910_v53  ;;  %v7913_v9 = vadd.f32 1e-30, %v7909_v31  ;;  %v7908_v25 = vadd.f32 %v7904_v27, %v7900_v59 }
 0xaaa   :  { %11464 = vrsqrt.f32 %v7913_v9  ;;  %v7912_v37 = vadd.f32 1e-30, %v7908_v25 }
 0xaac   :  { %11466 = vrsqrt.f32 %v7912_v37 }
 0xab3   :  { %v11461_v50 = vpop.eup %11460 }
 0xab4   :  { %v7919_v39 = vmul.f32 %v11461_v50, %v14093_v34 }
 0xab5   :  { %v11463_v43 = vpop.eup %11462 }
 0xab6   :  { %v7923_v54 = vsub.f32 1.0, %v7919_v39  ;;  %v7918_v26 = vmul.f32 %v11463_v43, %v14093_v34 }
 0xab7   :  { %v11465_v41 = vpop.eup %11464 }
 0xab8   :  { %v7927_v13 = vmax.f32 %v7923_v54, 0.0  ;;  %v7922_v5 = vsub.f32 1.0, %v7918_v26  ;;  %v7921_v16 = vmul.f32 %v11465_v41, %v14093_v34 }
 0xab9   :  { %v11467_v52 = vpop.eup %11466 }
 0xaba   :  { %v7935_v3 = vmul.f32 %v7927_v13, %v7883_v24  ;;  %v7926_v19 = vmax.f32 %v7922_v5, 0.0  ;;  %v7925_v30 = vsub.f32 1.0, %v7921_v16  ;;  %v7920_v18 = vmul.f32 %v11467_v52, %v14093_v34 }
 0xabb   :  { %v7931_v60 = vmul.f32 %v7927_v13, %v13682_v35 }
 0xabc   :  { %v13694_v10 = vand.u32 4294901760, %v7935_v3  ;;  %v7934_v51 = vmul.f32 %v7926_v19, %v7877_v22  ;;  %v7929_v1 = vmax.f32 %v7925_v30, 0.0  ;;  %v7924_v49 = vsub.f32 1.0, %v7920_v18  ;;  %v14309_v30 = vld [vmem:[#allocation5_spill] sm:$0xff]  ;;  %v14310_v18 = vld [vmem:[#allocation23_spill] sm:$0xff] }
 0xabd   :  { %v7930_v57 = vmul.f32 %v7926_v19, %v13684_v23  ;;  %v13727_v62 = vand.u32 4294901760, %v7931_v60  ;;  %v14308_v19 = vld [vmem:[#allocation21_spill] sm:$0xff] }
 0xabe   :  { %v13696_v46 = vand.u32 4294901760, %v7934_v51  ;;  %v7933_v12 = vmul.f32 %v7929_v1, %v7871_v47  ;;  %v7937_v8 = vmul.f32 %v7929_v1, %v7895_v29  ;;  %v7928_v40 = vmax.f32 %v7924_v49, 0.0  ;;  %v14312_v1 = vld [vmem:[#allocation28_spill] sm:$0xff] }
 0xabf   :  { %v13699_v56 = vsub.f32 %v7935_v3, %v13694_v10  ;;  %v13740_v6 = vand.u32 4294901760, %v7930_v57  ;;  %v13751_v53 = vsub.f32 %v7931_v60, %v13727_v62  ;;  %v14313_v49 = vld [vmem:[#allocation20_spill] sm:$0xff]  ;;  %v14320_v60 = vld [vmem:[#allocation33_spill] sm:$0xff] }
 0xac0   :  { %v13701_v55 = vand.u32 4294901760, %v7937_v8  ;;  %v13703_v24 = vand.u32 4294901760, %v7933_v12  ;;  %v7932_v48 = vmul.f32 %v7928_v40, %v7865_v7  ;;  %v7936_v15 = vmul.f32 %v7928_v40, %v7889_v36  ;;  %v14316_v40 = vld [vmem:[#allocation25_spill] sm:$0xff] }
 0xac1   :  { %v13707_v33 = vsub.f32 %v7934_v51, %v13696_v46  ;;  %v13725_v45 = vand.u32 4294901760, %v13699_v56  ;;  %v13761_v25 = vsub.f32 %v7930_v57, %v13740_v6  ;;  %v13769_v39 = vand.u32 4294901760, %v13751_v53  ;;  %v14311_v51 = vld [vmem:[#allocation16_spill] sm:$0xff]  ;;  %v14323_v57 = vld [vmem:[#allocation26_spill] sm:$0xff] }
 0xac2   :  { %v8109_v22 = vsub.f32 %v7937_v8, %v13701_v55  ;;  %v13710_v44 = vand.u32 4294901760, %v7936_v15  ;;  %v13712_v47 = vand.u32 4294901760, %v7932_v48  ;;  %11228 = vmatprep.subr.mxu0 %v13701_v55  ;;  %v13718_v7 = vsub.f32 %v7933_v12, %v13703_v24  ;;  %v14314_v12 = vld [vmem:[#allocation31_spill] sm:$0xff]  ;;  %v14315_v8 = vld [vmem:[#allocation22_spill] sm:$0xff] }
 0xac3   :  { %11229 = vmatpush3.msra.mxu0 %v13701_v55  ;;  %v13738_v38 = vand.u32 4294901760, %v13707_v33  ;;  %v8125_v36 = vsub.f32 %v13699_v56, %v13725_v45  ;;  %v13776_v26 = vand.u32 4294901760, %v13761_v25  ;;  %v8153_v13 = vsub.f32 %v13751_v53, %v13769_v39 }
 0xac4   :  { %v8116_v35 = vsub.f32 %v7936_v15, %v13710_v44  ;;  %11230 = vmatprep.subr.mxu0 %v13710_v44  ;;  %v13722_v11 = vand.u32 4294901760, %v8109_v22  ;;  %v13731_v23 = vsub.f32 %v7932_v48, %v13712_v47  ;;  %v13748_v59 = vand.u32 4294901760, %v13718_v7  ;;  %v14318_v48 = vld [vmem:[#allocation27_spill] sm:$0xff] }
 0xac5   :  { %11231 = vmatpush3.msra.mxu0 %v13710_v44  ;;  %v8132_v27 = vsub.f32 %v13707_v33, %v13738_v38  ;;  %v8126_v37 = vand.u32 4294901760, %v8125_v36  ;;  %v8160_v16 = vsub.f32 %v13761_v25, %v13776_v26  ;;  %v8154_v52 = vand.u32 4294901760, %v8153_v13  ;;  %v14319_v15 = vld [vmem:[#allocation19_spill] sm:$0xff] }
 0xac6   :  { %11232 = vmatprep.subr.mxu0 %v13694_v10  ;;  %v8111_v29 = vsub.f32 %v8109_v22, %v13722_v11  ;;  %v13735_v21 = vand.u32 4294901760, %v8116_v35  ;;  %v13758_v9 = vand.u32 4294901760, %v13731_v23  ;;  %v8139_v50 = vsub.f32 %v13718_v7, %v13748_v59 }
 0xac7   :  { %11233 = vmatpush3.msra.mxu0 %v13694_v10  ;;  %v8133_v43 = vand.u32 4294901760, %v8132_v27  ;;  %v8161_v3 = vand.u32 4294901760, %v8160_v16 }
 0xac8   :  { %11234 = vmatprep.subr.mxu0 %v13696_v46  ;;  %v8112_v61 = vand.u32 4294901760, %v8111_v29  ;;  %v8118_v20 = vsub.f32 %v8116_v35, %v13735_v21  ;;  %v8146_v54 = vsub.f32 %v13731_v23, %v13758_v9  ;;  %v8140_v41 = vand.u32 4294901760, %v8139_v50 }
 0xac9   :  { %11235 = vmatpush3.msra.mxu0 %v13696_v46 }
 0xaca   :  { %11236 = vmatprep.subr.mxu0 %v13703_v24  ;;  %11256 = vmatprep.subr.mxu1 %v8112_v61  ;;  %v8119_v31 = vand.u32 4294901760, %v8118_v20  ;;  %v8147_v5 = vand.u32 4294901760, %v8146_v54 }
 0xacb   :  { %11237 = vmatpush3.msra.mxu0 %v13703_v24  ;;  %11257 = vmatpush3.msra.mxu1 %v8112_v61 }
 0xacc   :  { %11238 = vmatprep.subr.mxu0 %v13712_v47  ;;  %11258 = vmatprep.subr.mxu1 %v8119_v31 }
 0xacd   :  { %11239 = vmatpush3.msra.mxu0 %v13712_v47  ;;  %11259 = vmatpush3.msra.mxu1 %v8119_v31 }
 0xace   :  { %11240 = vmatprep.subr.mxu0 %v13727_v62  ;;  %11260 = vmatprep.subr.mxu1 %v8126_v37 }
 0xacf   :  { %11241 = vmatpush3.msra.mxu0 %v13727_v62  ;;  %11261 = vmatpush3.msra.mxu1 %v8126_v37 }
 0xad0   :  { %11242 = vmatprep.subr.mxu0 %v13740_v6  ;;  %11262 = vmatprep.subr.mxu1 %v8133_v43 }
 0xad1   :  { %11243 = vmatpush3.msra.mxu0 %v13740_v6  ;;  %11263 = vmatpush3.msra.mxu1 %v8133_v43 }
 0xad2   :  { %11245 = vmatmul.mubr.f32.vlgmr.msra.gmra.mxu0 %v14094_v4  ;;  %11264 = vmatprep.subr.mxu1 %v8140_v41  ;;  %v14307_v4 = vld [vmem:[#allocation18_spill] sm:$0xff] }
 0xad3   :  { %11284 = vmatprep.subr.mxu0 %v8109_v22  ;;  %11265 = vmatpush3.msra.mxu1 %v8140_v41 }
 0xad4   :  { %11285 = vmatpush3.msra.mxu0 %v8109_v22  ;;  %11266 = vmatprep.subr.mxu1 %v8147_v5  ;;  %v14322_v22 = vld [vmem:[#allocation34_spill] sm:$0xff] }
 0xad5   :  { %11286 = vmatprep.subr.mxu0 %v8116_v35  ;;  %11247 = vmatprep.mubr.f32.mxu0 %v12002_v58  ;;  %v14303_v58 = vld [vmem:[#allocation15_spill] sm:$0xff] }
 0xad6   :  { %11267 = vmatpush3.msra.mxu1 %v8147_v5  ;;  %11287 = vmatpush3.msra.mxu0 %v8116_v35  ;;  %v14327_v35 = vld [vmem:[#allocation35_spill] sm:$0xff] }
 0xad7   :  { %11248 = vmatmul.mubr.f32.gmra.mxu0 %v12014_v32  ;;  %11268 = vmatprep.subr.mxu1 %v8154_v52  ;;  %v14304_v32 = vld [vmem:[#allocation37_spill] sm:$0xff] }
 0xad8   :  { %11288 = vmatprep.subr.mxu0 %v13699_v56  ;;  %11269 = vmatpush3.msra.mxu1 %v8154_v52 }
 0xad9   :  { %11289 = vmatpush3.msra.mxu0 %v13699_v56  ;;  %11270 = vmatprep.subr.mxu1 %v8161_v3  ;;  %v14317_v56 = vld [vmem:[#allocation6_spill] sm:$0xff] }
 0xada   :  { %11290 = vmatprep.subr.mxu0 %v13707_v33  ;;  %11250 = vmatprep.mubr.f32.mxu0 %v12027_v42  ;;  %v14305_v42 = vld [vmem:[#allocation17_spill] sm:$0xff] }
 0xadb   :  { %11271 = vmatpush3.msra.mxu1 %v8161_v3  ;;  %11291 = vmatpush3.msra.mxu0 %v13707_v33  ;;  %v14321_v33 = vld [vmem:[#allocation24_spill] sm:$0xff] }
 0xadc   :  { %11251 = vmatmul.mubr.f32.gmra.mxu0 %v12034_v63  ;;  %11273 = vmatmul.mubr.f32.vlgmr.msra.gmra.mxu1 %v14303_v58  ;;  %v14306_v63 = vld [vmem:[#allocation38_spill] sm:$0xff] }
 0xadd   :  { %11292 = vmatprep.subr.mxu0 %v13718_v7  ;;  %11312 = vmatprep.subr.mxu1 %v13701_v55 }
 0xade   :  { %11293 = vmatpush3.msra.mxu0 %v13718_v7  ;;  %11313 = vmatpush3.msra.mxu1 %v13701_v55  ;;  %v14326_v7 = vld [vmem:[#allocation32_spill] sm:$0xff] }
 0xadf   :  { %11294 = vmatprep.subr.mxu0 %v13731_v23  ;;  %11314 = vmatprep.subr.mxu1 %v13710_v44 }
 0xae0   :  { %11253 = vmatprep.mubr.f32.mxu0 %v14304_v32  ;;  %11275 = vmatprep.mubr.f32.mxu1 %v14305_v42 }
 0xae1   :  { %11295 = vmatpush3.msra.mxu0 %v13731_v23  ;;  %11315 = vmatpush3.msra.mxu1 %v13710_v44 }
 0xae2   :  { %11254 = vmatmul.mubr.f32.gmra.mxu0 %v14306_v63  ;;  %11276 = vmatmul.mubr.f32.gmra.mxu1 %v14307_v4 }
 0xae3   :  { %11296 = vmatprep.subr.mxu0 %v13751_v53  ;;  %11316 = vmatprep.subr.mxu1 %v13694_v10 }
 0xae4   :  { %11297 = vmatpush3.msra.mxu0 %v13751_v53  ;;  %11317 = vmatpush3.msra.mxu1 %v13694_v10 }
 0xae5   :  { %11298 = vmatprep.subr.mxu0 %v13761_v25  ;;  %11318 = vmatprep.subr.mxu1 %v13696_v46 }
 0xae6   :  { %11278 = vmatprep.mubr.f32.mxu1 %v14308_v19  ;;  %11299 = vmatpush3.msra.mxu0 %v13761_v25 }
 0xae7   :  { %11300 = vmatprep.mubr.f32.mxu0 %v14309_v30  ;;  %11319 = vmatpush3.msra.mxu1 %v13696_v46 }
 0xae8   :  { %11279 = vmatmul.mubr.f32.gmra.mxu1 %v14310_v18  ;;  %11301 = vmatmul.mubr.f32.vlgmr.msra.gmra.mxu0 %v14311_v51 }
 0xae9   :  { %11320 = vmatprep.subr.mxu1 %v13703_v24  ;;  %11340 = vmatprep.subr.mxu0 %v13722_v11 }
 0xaea   :  { %11321 = vmatpush3.msra.mxu1 %v13703_v24  ;;  %11341 = vmatpush3.msra.mxu0 %v13722_v11 }
 0xaeb   :  { %11322 = vmatprep.subr.mxu1 %v13712_v47  ;;  %11342 = vmatprep.subr.mxu0 %v13735_v21 }
 0xaec   :  { %11281 = vmatprep.mubr.f32.mxu1 %v14312_v1  ;;  %11303 = vmatprep.mubr.f32.mxu0 %v14313_v49 }
 0xaed   :  { %11323 = vmatpush3.msra.mxu1 %v13712_v47  ;;  %11343 = vmatpush3.msra.mxu0 %v13735_v21 }
 0xaee   :  { %11282 = vmatmul.mubr.f32.gmra.mxu1 %v14314_v12  ;;  %11304 = vmatmul.mubr.f32.gmra.mxu0 %v14315_v8 }
 0xaef   :  { %11324 = vmatprep.subr.mxu1 %v13727_v62  ;;  %11344 = vmatprep.subr.mxu0 %v13725_v45 }
 0xaf0   :  { %11325 = vmatpush3.msra.mxu1 %v13727_v62  ;;  %11345 = vmatpush3.msra.mxu0 %v13725_v45 }
 0xaf1   :  { %11326 = vmatprep.subr.mxu1 %v13740_v6  ;;  %11346 = vmatprep.subr.mxu0 %v13738_v38 }
 0xaf2   :  { %11306 = vmatprep.mubr.f32.mxu0 %v14316_v40  ;;  %11327 = vmatpush3.msra.mxu1 %v13740_v6 }
 0xaf3   :  { %11328 = vmatprep.mubr.f32.mxu1 %v14317_v56  ;;  %11347 = vmatpush3.msra.mxu0 %v13738_v38 }
 0xaf4   :  { %11307 = vmatmul.mubr.f32.gmra.mxu0 %v14318_v48  ;;  %11329 = vmatmul.mubr.f32.vlgmr.msra.gmra.mxu1 %v14319_v15 }
 0xaf5   :  { %11348 = vmatprep.subr.mxu0 %v13748_v59  ;;  %11368 = vmatprep.subr.mxu1 %v13701_v55 }
 0xaf6   :  { %11349 = vmatpush3.msra.mxu0 %v13748_v59  ;;  %11369 = vmatpush3.msra.mxu1 %v13701_v55  ;;  %v14324_v55 = vld [vmem:[#allocation30_spill] sm:$0xff] }
 0xaf7   :  { %11350 = vmatprep.subr.mxu0 %v13758_v9  ;;  %11370 = vmatprep.subr.mxu1 %v13710_v44 }
 0xaf8   :  { %11309 = vmatprep.mubr.f32.mxu0 %v14320_v60  ;;  %11331 = vmatprep.mubr.f32.mxu1 %v14321_v33 }
 0xaf9   :  { %11351 = vmatpush3.msra.mxu0 %v13758_v9  ;;  %11371 = vmatpush3.msra.mxu1 %v13710_v44  ;;  %v14325_v44 = vld [vmem:[#allocation4_spill] sm:$0xff] }
 0xafa   :  { %11310 = vmatmul.mubr.f32.gmra.mxu0 %v14322_v22  ;;  %11332 = vmatmul.mubr.f32.gmra.mxu1 %v14323_v57 }
 0xafb   :  { %11352 = vmatprep.subr.mxu0 %v13769_v39  ;;  %11372 = vmatprep.subr.mxu1 %v13694_v10 }
 0xafc   :  { %11353 = vmatpush3.msra.mxu0 %v13769_v39  ;;  %11373 = vmatpush3.msra.mxu1 %v13694_v10  ;;  %v14328_v10 = vld [vmem:[#allocation36_spill] sm:$0xff] }
 0xafd   :  { %11354 = vmatprep.subr.mxu0 %v13776_v26  ;;  %11374 = vmatprep.subr.mxu1 %v13696_v46 }
 0xafe   :  { %11334 = vmatprep.mubr.f32.mxu1 %v14324_v55  ;;  %11355 = vmatpush3.msra.mxu0 %v13776_v26 }
 0xaff   :  { %11356 = vmatprep.mubr.f32.mxu0 %v14325_v44  ;;  %11375 = vmatpush3.msra.mxu1 %v13696_v46 }
 0xb00   :  { %11335 = vmatmul.mubr.f32.gmra.mxu1 %v14326_v7  ;;  %11357 = vmatmul.mubr.f32.vlgmr.msra.gmra.mxu0 %v14303_v58 }
 0xb01   :  { %11376 = vmatprep.subr.mxu1 %v13703_v24  ;;  %11337 = vmatprep.mubr.f32.mxu1 %v14327_v35 }
 0xb02   :  { %11377 = vmatpush3.msra.mxu1 %v13703_v24  ;;  %11359 = vmatprep.mubr.f32.mxu0 %v14305_v42 }
 0xb03   :  { %11378 = vmatprep.subr.mxu1 %v13712_v47 }
 0xb04   :  { %11379 = vmatpush3.msra.mxu1 %v13712_v47  ;;  %11360 = vmatmul.mubr.f32.gmra.mxu0 %v14307_v4 }
 0xb05   :  { %11338 = vmatmul.mubr.f32.gmra.mxu1 %v14328_v10  ;;  %11380 = vmatprep.subr.mxu1 %v13727_v62 }
 0xb06   :  { %11381 = vmatpush3.msra.mxu1 %v13727_v62  ;;  %11362 = vmatprep.mubr.f32.mxu0 %v14308_v19 }
 0xb07   :  { %11382 = vmatprep.subr.mxu1 %v13740_v6  ;;  %11384 = vmatprep.mubr.f32.mxu1 %v14325_v44 }
 0xb08   :  { %11383 = vmatpush3.msra.mxu1 %v13740_v6  ;;  %11363 = vmatmul.mubr.f32.gmra.mxu0 %v14310_v18 }
 0xb09   :  { %11385 = vmatmul.mubr.f32.vlgmr.msra.gmra.mxu1 %v14303_v58  ;;  %11365 = vmatprep.mubr.f32.mxu0 %v14312_v1 }
 0xb0a   :  { %11387 = vmatprep.mubr.f32.mxu1 %v14305_v42  ;;  %v14329_v42 = vld [vmem:[#allocation8_spill] sm:$0xff] }
 0xb0c   :  { %11366 = vmatmul.mubr.f32.gmra.mxu0 %v14314_v12 }
 0xb0d   :  { %11388 = vmatmul.mubr.f32.gmra.mxu1 %v14307_v4 }
 0xb0e   :  { %11390 = vmatprep.mubr.f32.mxu1 %v14308_v19  ;;  %v14330_v19 = vld [vmem:[#allocation9_spill] sm:$0xff] }
 0xb11   :  { %11391 = vmatmul.mubr.f32.gmra.mxu1 %v14310_v18 }
 0xb12   :  { %11393 = vmatprep.mubr.f32.mxu1 %v14312_v1 }
 0xb15   :  { %11394 = vmatmul.mubr.f32.gmra.mxu1 %v14314_v12  ;;  %v14331_v12 = vld [vmem:[#allocation11_spill] sm:$0xff] }
 0xb92   :  { %v11246_v46 = vpop.f32.mrf.mxu0 }
 0xb93   :  { %v8028_v63 = vadd.f32 %v11246_v46, %v14329_v42 }
 0xb94   :  { %v8017_v24 = vpop.f32.mrf.mxu0 }
 0xb95   :  { %v8018_v30 = vadd.f32 %v8017_v24, %v14330_v19 }
 0xb97   :  { %v11249_v47 = vpop.f32.mrf.mxu0 }
 0xb98   :  { %v8048_v8 = vadd.f32 %v11249_v47, %v14331_v12 }
 0xb99   :  { %v8037_v11 = vpop.f32.mrf.mxu0 }
 0xb9a   :  { %v8038_v33 = vadd.f32 %v8037_v11, %v11807_v2 }
 0xb9c   :  { %v11252_v45 = vpop.f32.mrf.mxu0  ;;  %v11274_v62 = vpop.f32.mrf.mxu1 }
 0xb9d   :  { %v8068_v51 = vadd.f32 %v11252_v45, %v14121_v17  ;;  %v8205_v1 = vadd.f32 %v11274_v62, %v8028_v63 }
 0xb9e   :  { %v8057_v23 = vpop.f32.mrf.mxu0  ;;  %v8198_v29 = vpop.f32.mrf.mxu1 }
 0xb9f   :  { %v8199_v40 = vadd.f32 %v8198_v29, %v8018_v30  ;;  %v8058_v48 = vadd.f32 %v8057_v23, %v11801_v0 }
 0xba2   :  { %v11255_v21 = vpop.f32.mrf.mxu0  ;;  %v11277_v38 = vpop.f32.mrf.mxu1 }
 0xba3   :  { %v8217_v22 = vadd.f32 %v11277_v38, %v8048_v8  ;;  %v8088_v7 = vadd.f32 %v11255_v21, %v14091_v28 }
 0xba4   :  { %v8077_v6 = vpop.f32.mrf.mxu0  ;;  %v8210_v61 = vpop.f32.mrf.mxu1 }
 0xba5   :  { %v8078_v46 = vadd.f32 %v8077_v6, %v14092_v14  ;;  %v8211_v24 = vadd.f32 %v8210_v61, %v8038_v33 }
 0xba8   :  { %v11280_v20 = vpop.f32.mrf.mxu1  ;;  %v11302_v36 = vpop.f32.mrf.mxu0 }
 0xba9   :  { %v8229_v15 = vadd.f32 %v11280_v20, %v8068_v51  ;;  %v8336_v60 = vadd.f32 %v11302_v36, %v8205_v1 }
 0xbaa   :  { %v8222_v59 = vpop.f32.mrf.mxu1  ;;  %v8328_v53 = vpop.f32.mrf.mxu0 }
 0xbab   :  { %v8329_v57 = vadd.f32 %v8328_v53, %v8199_v40  ;;  %v8223_v35 = vadd.f32 %v8222_v59, %v8058_v48 }
 0xbae   :  { %v11283_v31 = vpop.f32.mrf.mxu1  ;;  %v11305_v27 = vpop.f32.mrf.mxu0 }
 0xbaf   :  { %v8350_v47 = vadd.f32 %v11305_v27, %v8217_v22  ;;  %v8241_v0 = vadd.f32 %v11283_v31, %v8088_v7 }
 0xbb0   :  { %v8234_v9 = vpop.f32.mrf.mxu1  ;;  %v8342_v25 = vpop.f32.mrf.mxu0 }
 0xbb1   :  { %v8235_v2 = vadd.f32 %v8234_v9, %v8078_v46  ;;  %v8343_v11 = vadd.f32 %v8342_v25, %v8211_v24 }
 0xbb4   :  { %v11308_v37 = vpop.f32.mrf.mxu0  ;;  %v11330_v50 = vpop.f32.mrf.mxu1 }
 0xbb5   :  { %v8364_v17 = vadd.f32 %v11308_v37, %v8229_v15  ;;  %v8467_v10 = vadd.f32 %v11330_v50, %v8336_v60 }
 0xbb6   :  { %v8356_v39 = vpop.f32.mrf.mxu0  ;;  %v8458_v43 = vpop.f32.mrf.mxu1 }
 0xbb7   :  { %v8459_v45 = vadd.f32 %v8458_v43, %v8329_v57  ;;  %v8357_v23 = vadd.f32 %v8356_v39, %v8223_v35 }
 0xbba   :  { %v11311_v54 = vpop.f32.mrf.mxu0  ;;  %v11333_v26 = vpop.f32.mrf.mxu1 }
 0xbbb   :  { %v8483_v38 = vadd.f32 %v11333_v26, %v8350_v47  ;;  %v8378_v28 = vadd.f32 %v11311_v54, %v8241_v0 }
 0xbbc   :  { %v8370_v41 = vpop.f32.mrf.mxu0  ;;  %v8474_v13 = vpop.f32.mrf.mxu1 }
 0xbbd   :  { %v8371_v50 = vadd.f32 %v8370_v41, %v8235_v2  ;;  %v8475_v14 = vadd.f32 %v8474_v13, %v8343_v11 }
 0xbc0   :  { %v11336_v5 = vpop.f32.mrf.mxu1  ;;  %v11358_v16 = vpop.f32.mrf.mxu0 }
 0xbc1   :  { %v8499_v29 = vadd.f32 %v11336_v5, %v8364_v17  ;;  %v8616_v20 = vadd.f32 %v11358_v16, %v8467_v10 }
 0xbc2   :  { %v8490_v52 = vpop.f32.mrf.mxu1  ;;  %v8609_v3 = vpop.f32.mrf.mxu0 }
 0xbc3   :  { %v8610_v36 = vadd.f32 %v8609_v3, %v8459_v45  ;;  %v8491_v21 = vadd.f32 %v8490_v52, %v8357_v23 }
 0xbc4   :  { %v11361_v58 = vpop.f32.mrf.mxu0 }
 0xbc5   :  { %v11339_v32 = vpop.f32.mrf.mxu1  ;;  %v8628_v6 = vadd.f32 %v11361_v58, %v8483_v38 }
 0xbc6   :  { %v8621_v4 = vpop.f32.mrf.mxu0  ;;  %v8515_v43 = vadd.f32 %v11339_v32, %v8378_v28 }
 0xbc7   :  { %v8506_v18 = vpop.f32.mrf.mxu1  ;;  %v8622_v16 = vadd.f32 %v8621_v4, %v8475_v14 }
 0xbc8   :  { %v11364_v49 = vpop.f32.mrf.mxu0  ;;  %v8507_v5 = vadd.f32 %v8506_v18, %v8371_v50 }
 0xbc9   :  { %v11386_v56 = vpop.f32.mrf.mxu1  ;;  %v8640_v59 = vadd.f32 %v11364_v49, %v8499_v29 }
 0xbca   :  { %v8633_v55 = vpop.f32.mrf.mxu0  ;;  %v8737_v37 = vadd.f32 %v11386_v56, %v8616_v20 }
 0xbcb   :  { %v8730_v44 = vpop.f32.mrf.mxu1  ;;  %v8634_v31 = vadd.f32 %v8633_v55, %v8491_v21 }
 0xbcc   :  { %v11367_v53 = vpop.f32.mrf.mxu0  ;;  %v8731_v61 = vadd.f32 %v8730_v44, %v8610_v36  ;;  %v8777_v3 = vmul.f32 %v8737_v37, %v8737_v37 }
 0xbcd   :  { %v11389_v62 = vpop.f32.mrf.mxu1  ;;  %v8652_v63 = vadd.f32 %v11367_v53, %v8515_v43 }
 0xbce   :  { %v8749_v9 = vadd.f32 %v11389_v62, %v8628_v6  ;;  %v8645_v25 = vpop.f32.mrf.mxu0  ;;  %v8776_v52 = vmul.f32 %v8731_v61, %v8731_v61 }
 0xbcf   :  { %v8742_v42 = vpop.f32.mrf.mxu1  ;;  %v8646_v41 = vadd.f32 %v8645_v25, %v8507_v5 }
 0xbd0   :  { %v8743_v30 = vadd.f32 %v8742_v42, %v8622_v16  ;;  %v8779_v49 = vmul.f32 %v8749_v9, %v8749_v9 }
 0xbd1   :  { %v11392_v27 = vpop.f32.mrf.mxu1 }
 0xbd2   :  { %v8761_v39 = vadd.f32 %v11392_v27, %v8640_v59  ;;  %v8778_v40 = vmul.f32 %v8743_v30, %v8743_v30 }
 0xbd3   :  { %v8754_v26 = vpop.f32.mrf.mxu1 }
 0xbd4   :  { %v8781_v19 = vmul.f32 %v8761_v39, %v8761_v39  ;;  %v8755_v54 = vadd.f32 %v8754_v26, %v8634_v31 }
 0xbd5   :  { %v11395_v51 = vpop.f32.mrf.mxu1 }
 0xbd6   :  { %v8785_v13 = vadd.f32 %v8781_v19, %v8777_v3  ;;  %v8780_v58 = vmul.f32 %v8755_v54, %v8755_v54  ;;  %v8773_v1 = vadd.f32 %v11395_v51, %v8652_v63 }
 0xbd7   :  { %v8766_v32 = vpop.f32.mrf.mxu1 }
 0xbd8   :  { %v8789_v12 = vadd.f32 1e-30, %v8785_v13  ;;  %v8784_v8 = vadd.f32 %v8780_v58, %v8776_v52  ;;  %v8783_v18 = vmul.f32 %v8773_v1, %v8773_v1  ;;  %v8767_v4 = vadd.f32 %v8766_v32, %v8646_v41 }
 0xbda   :  { %11468 = vrsqrt.f32 %v8789_v12  ;;  %v8788_v56 = vadd.f32 1e-30, %v8784_v8  ;;  %v8787_v48 = vadd.f32 %v8783_v18, %v8779_v49  ;;  %v8782_v15 = vmul.f32 %v8767_v4, %v8767_v4 }
 0xbdc   :  { %11470 = vrsqrt.f32 %v8788_v56  ;;  %v8791_v60 = vadd.f32 1e-30, %v8787_v48  ;;  %v8786_v33 = vadd.f32 %v8782_v15, %v8778_v40 }
 0xbde   :  { %11472 = vrsqrt.f32 %v8791_v60  ;;  %v8790_v22 = vadd.f32 1e-30, %v8786_v33 }
 0xbe0   :  { %11474 = vrsqrt.f32 %v8790_v22 }
 0xbe7   :  { %v11469_v57 = vpop.eup %11468 }
 0xbe8   :  { %v8797_v55 = vmul.f32 %v11469_v57, %v14093_v34 }
 0xbe9   :  { %v11471_v44 = vpop.eup %11470 }
 0xbea   :  { %v8801_v7 = vsub.f32 1.0, %v8797_v55  ;;  %v8796_v35 = vmul.f32 %v11471_v44, %v14093_v34 }
 0xbeb   :  { %v11473_v17 = vpop.eup %11472 }
 0xbec   :  { %v8805_v10 = vmax.f32 %v8801_v7, 0.0  ;;  %v8800_v46 = vsub.f32 1.0, %v8796_v35  ;;  %v8799_v24 = vmul.f32 %v11473_v17, %v14093_v34 }
 0xbed   :  { %v11475_v47 = vpop.eup %11474 }
 0xbee   :  { %v8809_v45 = vmul.f32 %v8805_v10, %v8737_v37  ;;  %v8813_v62 = vmul.f32 %v8805_v10, %v8761_v39  ;;  %v8804_v0 = vmax.f32 %v8800_v46, 0.0  ;;  %v8803_v23 = vsub.f32 1.0, %v8799_v24 }
 0xbef   :  { %v8798_v29 = vmul.f32 %v11475_v47, %v14093_v34 }
 0xbf0   :  { %8817 = vst [vmem:[%s13930_s4 + $0x8] sm:$0xff] %v8809_v45  ;;  %8821 = vst [vmem:[%s13930_s4 + $0x28] sm:$0xff] %v8813_v62  ;;  %v8808_v20 = vmul.f32 %v8804_v0, %v8731_v61  ;;  %v8812_v2 = vmul.f32 %v8804_v0, %v8755_v54  ;;  %v8807_v11 = vmax.f32 %v8803_v23, 0.0 }
 0xbf1   :  { %v8802_v38 = vsub.f32 1.0, %v8798_v29 }
 0xbf2   :  { %8816 = vst [vmem:[%s13930_s4] sm:$0xff] %v8808_v20  ;;  %8820 = vst [vmem:[%s13930_s4 + $0x20] sm:$0xff] %v8812_v2  ;;  %v8811_v34 = vmul.f32 %v8807_v11, %v8749_v9  ;;  %v8815_v36 = vmul.f32 %v8807_v11, %v8773_v1 }
 0xbf3   :  { %v8806_v53 = vmax.f32 %v8802_v38, 0.0 }
 0xbf4   :  { %8819 = vst [vmem:[%s13930_s4 + $0x18] sm:$0xff] %v8811_v34  ;;  %8823 = vst [vmem:[%s13930_s4 + $0x38] sm:$0xff] %v8815_v36 }
 0xbf5   :  { %v8810_v42 = vmul.f32 %v8806_v53, %v8743_v30  ;;  %v8814_v28 = vmul.f32 %v8806_v53, %v8767_v4 }
 0xbf7   :  { %8818 = vst [vmem:[%s13930_s4 + $0x10] sm:$0xff] %v8810_v42  ;;  %8822 = vst [vmem:[%s13930_s4 + $0x30] sm:$0xff] %v8814_v28 }

</bundles_post_ra>
